<compile_context>
chip_gen: v5e
topology: v5e:2x2
jax: 0.10.0
libtpu: 0.0.40
codegen_flags: <defaults>
</compile_context>

<pallas_src>
import jax
import jax.numpy as jnp
from jax import lax
from jax.experimental import pallas as pl
from jax.experimental.pallas import tpu as pltpu

EPS = 1e-3          # BatchNorm2d eps
KH = KW = 3         # conv kernel size (3x3, stride 1, padding 1)


# ---------------------------------------------------------------------------
# Fused kernel: global BN stats -> BN-apply + ReLU -> 3x3 conv (9 MXU dots).
#   x_ref     : (N, H, W, Cin)   f32   whole batch (VMEM resident)
#   gamma_ref : (1, Cin)         f32   BN weight
#   beta_ref  : (1, Cin)         f32   BN bias
#   w_ref     : (9, Cin, Coutp)  bf16  conv weight, tap-major (kh*3 + kw)
#   o_ref     : (N, H*W, Coutp)  f32   lane-dense output (full 128-lane stores)
#   pad_ref   : (H+2, W+2, Cin)  f32   zero-halo scratch
# ---------------------------------------------------------------------------
def fused_bn_relu_conv_kernel(x_ref, gamma_ref, beta_ref, w_ref, o_ref, pad_ref):
    N, H, W, Cin = x_ref.shape
    HW = H * W
    coutp = o_ref.shape[-1]

    # ---- global batch statistics over (N, H, W) --------------------------
    s1 = jnp.zeros((1, Cin), jnp.float32)
    s2 = jnp.zeros((1, Cin), jnp.float32)
    for n in range(N):                       # N is tiny & static -> unrolled
        xn = x_ref[n].astype(jnp.float32).reshape(HW, Cin)
        s1 = s1 + jnp.sum(xn, axis=0, keepdims=True)
        s2 = s2 + jnp.sum(xn * xn, axis=0, keepdims=True)
    count = jnp.float32(N * HW)
    mean = s1 / count
    # TODO(synk): E[x^2]-E[x]^2 cancels badly when |mean| >> std; with the data
    # resident in VMEM a shifted two-pass variance would be cheap if needed.
    var = s2 / count - mean * mean           # biased var (PyTorch BN forward)
    scale = gamma_ref[...] * lax.rsqrt(var + EPS)       # (1, Cin)
    shift = beta_ref[...] - mean * scale                # (1, Cin)
    scale3 = scale.reshape(1, 1, Cin)
    shift3 = shift.reshape(1, 1, Cin)

    # Zero the conv halo once; interiors are fully rewritten for every image.
    pad_ref[...] = jnp.zeros_like(pad_ref)

    # ---- per image: BN + ReLU + 3x3 conv ---------------------------------
    for n in range(N):
        # BN/ReLU kept in the (H, W, Cin) layout: it feeds the padded scratch
        # with no lane->sublane relayout (VPU cost at 16K elems is negligible).
        y = jnp.maximum(x_ref[n].astype(jnp.float32) * scale3 + shift3, 0.0)
        pad_ref[1:H + 1, 1:W + 1, :] = y

        # 9 accumulating bf16 MXU dots replace the im2col scratch entirely.
        acc = jnp.zeros((HW, coutp), jnp.float32)
        for kh in range(KH):
            for kw in range(KW):
                tap = pad_ref[kh:kh + H, kw:kw + W, :].reshape(HW, Cin)
                acc = acc + jnp.dot(tap.astype(jnp.bfloat16),
                                    w_ref[kh * KW + kw],
                                    preferred_element_type=jnp.float32)
        o_ref[n] = acc.astype(o_ref.dtype)


# ---------------------------------------------------------------------------
# Wrapper: NCHW in, NCHW out (matches the PyTorch module).
# ---------------------------------------------------------------------------
@jax.jit
def bn_relu_conv(x_nchw, gamma, beta, w_oihw):
    N, Cin, H, W = x_nchw.shape
    Cout = w_oihw.shape[0]
    coutp = -(-Cout // 128) * 128            # pad Cout -> full-lane (96 -> 128)

    x_nhwc = jnp.transpose(x_nchw, (0, 2, 3, 1))       # the one input copy

    # Conv weight: OIHW -> (kh*kw, ci, co), pad Cout, cast bf16 (MXU operand).
    w_taps = jnp.transpose(w_oihw, (2, 3, 1, 0)).reshape(KH * KW, Cin, Cout)
    w_taps = jnp.pad(w_taps, ((0, 0), (0, 0), (0, coutp - Cout)))
    w_taps = w_taps.astype(jnp.bfloat16)

    out = pl.pallas_call(
        fused_bn_relu_conv_kernel,
        out_shape=jax.ShapeDtypeStruct((N, H * W, coutp), x_nchw.dtype),
        grid=(1,),   # batch stats couple all images; whole batch is VMEM-resident
        in_specs=[
            pl.BlockSpec((N, H, W, Cin), lambda i: (0, 0, 0, 0)),
            pl.BlockSpec((1, Cin), lambda i: (0, 0)),
            pl.BlockSpec((1, Cin), lambda i: (0, 0)),
            pl.BlockSpec((KH * KW, Cin, coutp), lambda i: (0, 0, 0)),
        ],
        out_specs=pl.BlockSpec((N, H * W, coutp), lambda i: (0, 0, 0)),
        scratch_shapes=[pltpu.VMEM((H + 2, W + 2, Cin), jnp.float32)],
        compiler_params=pltpu.CompilerParams(
            dimension_semantics=("arbitrary",)),
    )(x_nhwc, gamma.reshape(1, Cin), beta.reshape(1, Cin), w_taps)

    # (N, H*W, Coutp) -> NCHW; the Cout slice + reshape fuse into this transpose.
    out = out.reshape(N, H, W, coutp)[..., :Cout]
    return jnp.transpose(out, (0, 3, 1, 2))


# ---------------------------------------------------------------------------
# Pure-JAX reference of the PyTorch module forward (training-mode BN).
# ---------------------------------------------------------------------------
def reference(x, gamma, beta, w):
    mean = jnp.mean(x, axis=(0, 2, 3), keepdims=True)
    var = jnp.mean((x - mean) ** 2, axis=(0, 2, 3), keepdims=True)
    xn = (x - mean) / jnp.sqrt(var + EPS)
    xn = xn * gamma.reshape(1, -1, 1, 1) + beta.reshape(1, -1, 1, 1)
    xr = jnp.maximum(xn, 0.0)
    return lax.conv_general_dilated(
        xr, w, window_strides=(1, 1), padding=((1, 1), (1, 1)),
        dimension_numbers=("NCHW", "OIHW", "NCHW"))


if __name__ == "__main__":
    key = jax.random.PRNGKey(0)
    kx, kg, kb, kw = jax.random.split(key, 4)

    # Channel counts fixed by the module (64 -> 96); small batch / spatial size.
    N, Cin, H, W, Cout = 2, 64, 16, 16, 96
    x = jax.random.normal(kx, (N, Cin, H, W), dtype=jnp.float32)
    gamma = 1.0 + 0.1 * jax.random.normal(kg, (Cin,), dtype=jnp.float32)    # BN weight
    beta = 0.1 * jax.random.normal(kb, (Cin,), dtype=jnp.float32)           # BN bias
    w = 0.05 * jax.random.normal(kw, (Cout, Cin, 3, 3), dtype=jnp.float32)  # conv OIHW

    out = jax.block_until_ready(bn_relu_conv(x, gamma, beta, w))
    ref = reference(x, gamma, beta, w)

    assert out.shape == (N, Cout, H, W), out.shape
    # bf16 matmul operands (f32 accumulation) -> tolerance loosened vs f32 ref.
    assert jnp.allclose(out, ref, rtol=2e-2, atol=2e-2), "mismatch vs reference"

    print("KERNEL_OK")
</pallas_src>

<mosaic_0001>
module attributes {stable_mosaic.version = 11 : i64} {
  func.func @fused_bn_relu_conv_kernel(%arg0: i32, %arg1: memref<2x16x16x64xf32, #tpu.memory_space<vmem>>, %arg2: memref<1x64xf32, #tpu.memory_space<vmem>>, %arg3: memref<1x64xf32, #tpu.memory_space<vmem>>, %arg4: memref<9x64x128xbf16, #tpu.memory_space<vmem>>, %arg5: memref<2x256x128xf32, #tpu.memory_space<vmem>>, %arg6: memref<18x18x64xf32, #tpu.memory_space<vmem>>) attributes {dimension_semantics = [#tpu.dimension_semantics<arbitrary>], iteration_bounds = array<i64: 1>, scalar_prefetch = 0 : i64, scratch_operands = 1 : i64, tpu.core_type = #tpu.core_type<tc>, window_params = [{pipeline_mode = #tpu.pipeline_mode<synchronous>, transform_indices = @transform_0, window_bounds = array<i64: 2, 16, 16, 64>}, {pipeline_mode = #tpu.pipeline_mode<synchronous>, transform_indices = @transform_1, window_bounds = array<i64: 1, 64>}, {pipeline_mode = #tpu.pipeline_mode<synchronous>, transform_indices = @transform_2, window_bounds = array<i64: 1, 64>}, {pipeline_mode = #tpu.pipeline_mode<synchronous>, transform_indices = @transform_3, window_bounds = array<i64: 9, 64, 128>}, {pipeline_mode = #tpu.pipeline_mode<synchronous>, transform_indices = @transform_4, window_bounds = array<i64: 2, 256, 128>}]} {
    %cst = arith.constant 0.000000e+00 : f32
    %0 = vector.broadcast %cst : f32 to vector<1x64xf32>
    %cst_0 = arith.constant 0.000000e+00 : f32
    %1 = vector.broadcast %cst_0 : f32 to vector<1x64xf32>
    %c0 = arith.constant 0 : index
    %c0_1 = arith.constant 0 : index
    %c0_2 = arith.constant 0 : index
    %c0_3 = arith.constant 0 : index
    %2 = vector.load %arg1[%c0, %c0_1, %c0_2, %c0_3] : memref<2x16x16x64xf32, #tpu.memory_space<vmem>>, vector<1x16x16x64xf32>
    %3 = vector.shape_cast %2 : vector<1x16x16x64xf32> to vector<16x16x64xf32>
    %4 = vector.shape_cast %3 : vector<16x16x64xf32> to vector<256x64xf32>
    %cst_4 = arith.constant dense<0.000000e+00> : vector<64xf32>
    %5 = vector.multi_reduction <add>, %4, %cst_4 [0] : vector<256x64xf32> to vector<64xf32>
    %6 = vector.shape_cast %5 : vector<64xf32> to vector<1x64xf32>
    %7 = arith.addf %0, %6 : vector<1x64xf32>
    %8 = arith.mulf %4, %4 : vector<256x64xf32>
    %cst_5 = arith.constant dense<0.000000e+00> : vector<64xf32>
    %9 = vector.multi_reduction <add>, %8, %cst_5 [0] : vector<256x64xf32> to vector<64xf32>
    %10 = vector.shape_cast %9 : vector<64xf32> to vector<1x64xf32>
    %11 = arith.addf %1, %10 : vector<1x64xf32>
    %c1 = arith.constant 1 : index
    %c0_6 = arith.constant 0 : index
    %c0_7 = arith.constant 0 : index
    %c0_8 = arith.constant 0 : index
    %12 = vector.load %arg1[%c1, %c0_6, %c0_7, %c0_8] : memref<2x16x16x64xf32, #tpu.memory_space<vmem>>, vector<1x16x16x64xf32>
    %13 = vector.shape_cast %12 : vector<1x16x16x64xf32> to vector<16x16x64xf32>
    %14 = vector.shape_cast %13 : vector<16x16x64xf32> to vector<256x64xf32>
    %cst_9 = arith.constant dense<0.000000e+00> : vector<64xf32>
    %15 = vector.multi_reduction <add>, %14, %cst_9 [0] : vector<256x64xf32> to vector<64xf32>
    %16 = vector.shape_cast %15 : vector<64xf32> to vector<1x64xf32>
    %17 = arith.addf %7, %16 : vector<1x64xf32>
    %18 = arith.mulf %14, %14 : vector<256x64xf32>
    %cst_10 = arith.constant dense<0.000000e+00> : vector<64xf32>
    %19 = vector.multi_reduction <add>, %18, %cst_10 [0] : vector<256x64xf32> to vector<64xf32>
    %20 = vector.shape_cast %19 : vector<64xf32> to vector<1x64xf32>
    %21 = arith.addf %11, %20 : vector<1x64xf32>
    %cst_11 = arith.constant 5.120000e+02 : f32
    %22 = vector.broadcast %cst_11 : f32 to vector<1x64xf32>
    %23 = arith.divf %17, %22 : vector<1x64xf32>
    %cst_12 = arith.constant 5.120000e+02 : f32
    %24 = vector.broadcast %cst_12 : f32 to vector<1x64xf32>
    %25 = arith.divf %21, %24 : vector<1x64xf32>
    %26 = arith.mulf %23, %23 : vector<1x64xf32>
    %27 = arith.subf %25, %26 : vector<1x64xf32>
    %c0_13 = arith.constant 0 : index
    %c0_14 = arith.constant 0 : index
    %28 = vector.load %arg2[%c0_13, %c0_14] : memref<1x64xf32, #tpu.memory_space<vmem>>, vector<1x64xf32>
    %cst_15 = arith.constant 1.000000e-03 : f32
    %29 = vector.broadcast %cst_15 : f32 to vector<1x64xf32>
    %30 = arith.addf %27, %29 : vector<1x64xf32>
    %31 = math.rsqrt %30 : vector<1x64xf32>
    %32 = arith.mulf %28, %31 : vector<1x64xf32>
    %c0_16 = arith.constant 0 : index
    %c0_17 = arith.constant 0 : index
    %33 = vector.load %arg3[%c0_16, %c0_17] : memref<1x64xf32, #tpu.memory_space<vmem>>, vector<1x64xf32>
    %34 = arith.mulf %23, %32 : vector<1x64xf32>
    %35 = arith.subf %33, %34 : vector<1x64xf32>
    %36 = vector.shape_cast %32 : vector<1x64xf32> to vector<1x1x64xf32>
    %37 = vector.shape_cast %35 : vector<1x64xf32> to vector<1x1x64xf32>
    %cst_18 = arith.constant 0.000000e+00 : f32
    %38 = vector.broadcast %cst_18 : f32 to vector<18x18x64xf32>
    %c0_19 = arith.constant 0 : index
    %c0_20 = arith.constant 0 : index
    %c0_21 = arith.constant 0 : index
    %39 = vector.load %arg6[%c0_19, %c0_20, %c0_21] : memref<18x18x64xf32, #tpu.memory_space<vmem>>, vector<18x18x64xf32>
    tpu.vector_store %arg6[%c0_19, %c0_20, %c0_21], %38 {strides = array<i32>} : memref<18x18x64xf32, #tpu.memory_space<vmem>>, vector<18x18x64xf32>,
    %c0_22 = arith.constant 0 : index
    %c0_23 = arith.constant 0 : index
    %c0_24 = arith.constant 0 : index
    %c0_25 = arith.constant 0 : index
    %40 = vector.load %arg1[%c0_22, %c0_23, %c0_24, %c0_25] : memref<2x16x16x64xf32, #tpu.memory_space<vmem>>, vector<1x16x16x64xf32>
    %41 = vector.shape_cast %40 : vector<1x16x16x64xf32> to vector<16x16x64xf32>
    %42 = vector.broadcast %36 : vector<1x1x64xf32> to vector<16x16x64xf32>
    %43 = arith.mulf %41, %42 : vector<16x16x64xf32>
    %44 = vector.broadcast %37 : vector<1x1x64xf32> to vector<16x16x64xf32>
    %45 = arith.addf %43, %44 : vector<16x16x64xf32>
    %cst_26 = arith.constant 0.000000e+00 : f32
    %46 = vector.broadcast %cst_26 : f32 to vector<16x16x64xf32>
    %47 = arith.maximumf %45, %46 : vector<16x16x64xf32>
    %c1_27 = arith.constant 1 : index
    %c1_28 = arith.constant 1 : index
    %c0_29 = arith.constant 0 : index
    %48 = vector.load %arg6[%c1_27, %c1_28, %c0_29] : memref<18x18x64xf32, #tpu.memory_space<vmem>>, vector<16x16x64xf32>
    tpu.vector_store %arg6[%c1_27, %c1_28, %c0_29], %47 {strides = array<i32>} : memref<18x18x64xf32, #tpu.memory_space<vmem>>, vector<16x16x64xf32>,
    %cst_30 = arith.constant 0.000000e+00 : f32
    %49 = vector.broadcast %cst_30 : f32 to vector<256x128xf32>
    %c0_31 = arith.constant 0 : index
    %c0_32 = arith.constant 0 : index
    %c0_33 = arith.constant 0 : index
    %50 = vector.load %arg6[%c0_31, %c0_32, %c0_33] : memref<18x18x64xf32, #tpu.memory_space<vmem>>, vector<16x16x64xf32>
    %51 = vector.shape_cast %50 : vector<16x16x64xf32> to vector<256x64xf32>
    %52 = arith.truncf %51 : vector<256x64xf32> to vector<256x64xbf16>
    %c0_34 = arith.constant 0 : index
    %c0_35 = arith.constant 0 : index
    %c0_36 = arith.constant 0 : index
    %53 = vector.load %arg4[%c0_34, %c0_35, %c0_36] : memref<9x64x128xbf16, #tpu.memory_space<vmem>>, vector<1x64x128xbf16>
    %54 = vector.shape_cast %53 : vector<1x64x128xbf16> to vector<64x128xbf16>
    %cst_37 = arith.constant dense<0.000000e+00> : vector<256x128xf32>
    %55 = tpu.matmul %52, %54, %cst_37 {dimension_numbers = #tpu.dot_dimension_numbers<[1], [0], [0], [1], [0, 0, 1, 1], [], []>} : vector<256x64xbf16>, vector<64x128xbf16>, vector<256x128xf32> -> vector<256x128xf32>
    %56 = arith.addf %49, %55 : vector<256x128xf32>
    %c0_38 = arith.constant 0 : index
    %c1_39 = arith.constant 1 : index
    %c0_40 = arith.constant 0 : index
    %57 = vector.load %arg6[%c0_38, %c1_39, %c0_40] : memref<18x18x64xf32, #tpu.memory_space<vmem>>, vector<16x16x64xf32>
    %58 = vector.shape_cast %57 : vector<16x16x64xf32> to vector<256x64xf32>
    %59 = arith.truncf %58 : vector<256x64xf32> to vector<256x64xbf16>
    %c1_41 = arith.constant 1 : index
    %c0_42 = arith.constant 0 : index
    %c0_43 = arith.constant 0 : index
    %60 = vector.load %arg4[%c1_41, %c0_42, %c0_43] : memref<9x64x128xbf16, #tpu.memory_space<vmem>>, vector<1x64x128xbf16>
    %61 = vector.shape_cast %60 : vector<1x64x128xbf16> to vector<64x128xbf16>
    %cst_44 = arith.constant dense<0.000000e+00> : vector<256x128xf32>
    %62 = tpu.matmul %59, %61, %cst_44 {dimension_numbers = #tpu.dot_dimension_numbers<[1], [0], [0], [1], [0, 0, 1, 1], [], []>} : vector<256x64xbf16>, vector<64x128xbf16>, vector<256x128xf32> -> vector<256x128xf32>
    %63 = arith.addf %56, %62 : vector<256x128xf32>
    %c0_45 = arith.constant 0 : index
    %c2 = arith.constant 2 : index
    %c0_46 = arith.constant 0 : index
    %64 = vector.load %arg6[%c0_45, %c2, %c0_46] : memref<18x18x64xf32, #tpu.memory_space<vmem>>, vector<16x16x64xf32>
    %65 = vector.shape_cast %64 : vector<16x16x64xf32> to vector<256x64xf32>
    %66 = arith.truncf %65 : vector<256x64xf32> to vector<256x64xbf16>
    %c2_47 = arith.constant 2 : index
    %c0_48 = arith.constant 0 : index
    %c0_49 = arith.constant 0 : index
    %67 = vector.load %arg4[%c2_47, %c0_48, %c0_49] : memref<9x64x128xbf16, #tpu.memory_space<vmem>>, vector<1x64x128xbf16>
    %68 = vector.shape_cast %67 : vector<1x64x128xbf16> to vector<64x128xbf16>
    %cst_50 = arith.constant dense<0.000000e+00> : vector<256x128xf32>
    %69 = tpu.matmul %66, %68, %cst_50 {dimension_numbers = #tpu.dot_dimension_numbers<[1], [0], [0], [1], [0, 0, 1, 1], [], []>} : vector<256x64xbf16>, vector<64x128xbf16>, vector<256x128xf32> -> vector<256x128xf32>
    %70 = arith.addf %63, %69 : vector<256x128xf32>
    %c1_51 = arith.constant 1 : index
    %c0_52 = arith.constant 0 : index
    %c0_53 = arith.constant 0 : index
    %71 = vector.load %arg6[%c1_51, %c0_52, %c0_53] : memref<18x18x64xf32, #tpu.memory_space<vmem>>, vector<16x16x64xf32>
    %72 = vector.shape_cast %71 : vector<16x16x64xf32> to vector<256x64xf32>
    %73 = arith.truncf %72 : vector<256x64xf32> to vector<256x64xbf16>
    %c3 = arith.constant 3 : index
    %c0_54 = arith.constant 0 : index
    %c0_55 = arith.constant 0 : index
    %74 = vector.load %arg4[%c3, %c0_54, %c0_55] : memref<9x64x128xbf16, #tpu.memory_space<vmem>>, vector<1x64x128xbf16>
    %75 = vector.shape_cast %74 : vector<1x64x128xbf16> to vector<64x128xbf16>
    %cst_56 = arith.constant dense<0.000000e+00> : vector<256x128xf32>
    %76 = tpu.matmul %73, %75, %cst_56 {dimension_numbers = #tpu.dot_dimension_numbers<[1], [0], [0], [1], [0, 0, 1, 1], [], []>} : vector<256x64xbf16>, vector<64x128xbf16>, vector<256x128xf32> -> vector<256x128xf32>
    %77 = arith.addf %70, %76 : vector<256x128xf32>
    %c1_57 = arith.constant 1 : index
    %c1_58 = arith.constant 1 : index
    %c0_59 = arith.constant 0 : index
    %78 = vector.load %arg6[%c1_57, %c1_58, %c0_59] : memref<18x18x64xf32, #tpu.memory_space<vmem>>, vector<16x16x64xf32>
    %79 = vector.shape_cast %78 : vector<16x16x64xf32> to vector<256x64xf32>
    %80 = arith.truncf %79 : vector<256x64xf32> to vector<256x64xbf16>
    %c4 = arith.constant 4 : index
    %c0_60 = arith.constant 0 : index
    %c0_61 = arith.constant 0 : index
    %81 = vector.load %arg4[%c4, %c0_60, %c0_61] : memref<9x64x128xbf16, #tpu.memory_space<vmem>>, vector<1x64x128xbf16>
    %82 = vector.shape_cast %81 : vector<1x64x128xbf16> to vector<64x128xbf16>
    %cst_62 = arith.constant dense<0.000000e+00> : vector<256x128xf32>
    %83 = tpu.matmul %80, %82, %cst_62 {dimension_numbers = #tpu.dot_dimension_numbers<[1], [0], [0], [1], [0, 0, 1, 1], [], []>} : vector<256x64xbf16>, vector<64x128xbf16>, vector<256x128xf32> -> vector<256x128xf32>
    %84 = arith.addf %77, %83 : vector<256x128xf32>
    %c1_63 = arith.constant 1 : index
    %c2_64 = arith.constant 2 : index
    %c0_65 = arith.constant 0 : index
    %85 = vector.load %arg6[%c1_63, %c2_64, %c0_65] : memref<18x18x64xf32, #tpu.memory_space<vmem>>, vector<16x16x64xf32>
    %86 = vector.shape_cast %85 : vector<16x16x64xf32> to vector<256x64xf32>
    %87 = arith.truncf %86 : vector<256x64xf32> to vector<256x64xbf16>
    %c5 = arith.constant 5 : index
    %c0_66 = arith.constant 0 : index
    %c0_67 = arith.constant 0 : index
    %88 = vector.load %arg4[%c5, %c0_66, %c0_67] : memref<9x64x128xbf16, #tpu.memory_space<vmem>>, vector<1x64x128xbf16>
    %89 = vector.shape_cast %88 : vector<1x64x128xbf16> to vector<64x128xbf16>
    %cst_68 = arith.constant dense<0.000000e+00> : vector<256x128xf32>
    %90 = tpu.matmul %87, %89, %cst_68 {dimension_numbers = #tpu.dot_dimension_numbers<[1], [0], [0], [1], [0, 0, 1, 1], [], []>} : vector<256x64xbf16>, vector<64x128xbf16>, vector<256x128xf32> -> vector<256x128xf32>
    %91 = arith.addf %84, %90 : vector<256x128xf32>
    %c2_69 = arith.constant 2 : index
    %c0_70 = arith.constant 0 : index
    %c0_71 = arith.constant 0 : index
    %92 = vector.load %arg6[%c2_69, %c0_70, %c0_71] : memref<18x18x64xf32, #tpu.memory_space<vmem>>, vector<16x16x64xf32>
    %93 = vector.shape_cast %92 : vector<16x16x64xf32> to vector<256x64xf32>
    %94 = arith.truncf %93 : vector<256x64xf32> to vector<256x64xbf16>
    %c6 = arith.constant 6 : index
    %c0_72 = arith.constant 0 : index
    %c0_73 = arith.constant 0 : index
    %95 = vector.load %arg4[%c6, %c0_72, %c0_73] : memref<9x64x128xbf16, #tpu.memory_space<vmem>>, vector<1x64x128xbf16>
    %96 = vector.shape_cast %95 : vector<1x64x128xbf16> to vector<64x128xbf16>
    %cst_74 = arith.constant dense<0.000000e+00> : vector<256x128xf32>
    %97 = tpu.matmul %94, %96, %cst_74 {dimension_numbers = #tpu.dot_dimension_numbers<[1], [0], [0], [1], [0, 0, 1, 1], [], []>} : vector<256x64xbf16>, vector<64x128xbf16>, vector<256x128xf32> -> vector<256x128xf32>
    %98 = arith.addf %91, %97 : vector<256x128xf32>
    %c2_75 = arith.constant 2 : index
    %c1_76 = arith.constant 1 : index
    %c0_77 = arith.constant 0 : index
    %99 = vector.load %arg6[%c2_75, %c1_76, %c0_77] : memref<18x18x64xf32, #tpu.memory_space<vmem>>, vector<16x16x64xf32>
    %100 = vector.shape_cast %99 : vector<16x16x64xf32> to vector<256x64xf32>
    %101 = arith.truncf %100 : vector<256x64xf32> to vector<256x64xbf16>
    %c7 = arith.constant 7 : index
    %c0_78 = arith.constant 0 : index
    %c0_79 = arith.constant 0 : index
    %102 = vector.load %arg4[%c7, %c0_78, %c0_79] : memref<9x64x128xbf16, #tpu.memory_space<vmem>>, vector<1x64x128xbf16>
    %103 = vector.shape_cast %102 : vector<1x64x128xbf16> to vector<64x128xbf16>
    %cst_80 = arith.constant dense<0.000000e+00> : vector<256x128xf32>
    %104 = tpu.matmul %101, %103, %cst_80 {dimension_numbers = #tpu.dot_dimension_numbers<[1], [0], [0], [1], [0, 0, 1, 1], [], []>} : vector<256x64xbf16>, vector<64x128xbf16>, vector<256x128xf32> -> vector<256x128xf32>
    %105 = arith.addf %98, %104 : vector<256x128xf32>
    %c2_81 = arith.constant 2 : index
    %c2_82 = arith.constant 2 : index
    %c0_83 = arith.constant 0 : index
    %106 = vector.load %arg6[%c2_81, %c2_82, %c0_83] : memref<18x18x64xf32, #tpu.memory_space<vmem>>, vector<16x16x64xf32>
    %107 = vector.shape_cast %106 : vector<16x16x64xf32> to vector<256x64xf32>
    %108 = arith.truncf %107 : vector<256x64xf32> to vector<256x64xbf16>
    %c8 = arith.constant 8 : index
    %c0_84 = arith.constant 0 : index
    %c0_85 = arith.constant 0 : index
    %109 = vector.load %arg4[%c8, %c0_84, %c0_85] : memref<9x64x128xbf16, #tpu.memory_space<vmem>>, vector<1x64x128xbf16>
    %110 = vector.shape_cast %109 : vector<1x64x128xbf16> to vector<64x128xbf16>
    %cst_86 = arith.constant dense<0.000000e+00> : vector<256x128xf32>
    %111 = tpu.matmul %108, %110, %cst_86 {dimension_numbers = #tpu.dot_dimension_numbers<[1], [0], [0], [1], [0, 0, 1, 1], [], []>} : vector<256x64xbf16>, vector<64x128xbf16>, vector<256x128xf32> -> vector<256x128xf32>
    %112 = arith.addf %105, %111 : vector<256x128xf32>
    %c0_87 = arith.constant 0 : index
    %c0_88 = arith.constant 0 : index
    %c0_89 = arith.constant 0 : index
    %113 = vector.load %arg5[%c0_87, %c0_88, %c0_89] : memref<2x256x128xf32, #tpu.memory_space<vmem>>, vector<1x256x128xf32>
    %114 = vector.shape_cast %113 : vector<1x256x128xf32> to vector<256x128xf32>
    %115 = vector.shape_cast %112 : vector<256x128xf32> to vector<1x256x128xf32>
    tpu.vector_store %arg5[%c0_87, %c0_88, %c0_89], %115 {strides = array<i32>} : memref<2x256x128xf32, #tpu.memory_space<vmem>>, vector<1x256x128xf32>,
    %c1_90 = arith.constant 1 : index
    %c0_91 = arith.constant 0 : index
    %c0_92 = arith.constant 0 : index
    %c0_93 = arith.constant 0 : index
    %116 = vector.load %arg1[%c1_90, %c0_91, %c0_92, %c0_93] : memref<2x16x16x64xf32, #tpu.memory_space<vmem>>, vector<1x16x16x64xf32>
    %117 = vector.shape_cast %116 : vector<1x16x16x64xf32> to vector<16x16x64xf32>
    %118 = vector.broadcast %36 : vector<1x1x64xf32> to vector<16x16x64xf32>
    %119 = arith.mulf %117, %118 : vector<16x16x64xf32>
    %120 = vector.broadcast %37 : vector<1x1x64xf32> to vector<16x16x64xf32>
    %121 = arith.addf %119, %120 : vector<16x16x64xf32>
    %cst_94 = arith.constant 0.000000e+00 : f32
    %122 = vector.broadcast %cst_94 : f32 to vector<16x16x64xf32>
    %123 = arith.maximumf %121, %122 : vector<16x16x64xf32>
    %c1_95 = arith.constant 1 : index
    %c1_96 = arith.constant 1 : index
    %c0_97 = arith.constant 0 : index
    %124 = vector.load %arg6[%c1_95, %c1_96, %c0_97] : memref<18x18x64xf32, #tpu.memory_space<vmem>>, vector<16x16x64xf32>
    tpu.vector_store %arg6[%c1_95, %c1_96, %c0_97], %123 {strides = array<i32>} : memref<18x18x64xf32, #tpu.memory_space<vmem>>, vector<16x16x64xf32>,
    %cst_98 = arith.constant 0.000000e+00 : f32
    %125 = vector.broadcast %cst_98 : f32 to vector<256x128xf32>
    %c0_99 = arith.constant 0 : index
    %c0_100 = arith.constant 0 : index
    %c0_101 = arith.constant 0 : index
    %126 = vector.load %arg6[%c0_99, %c0_100, %c0_101] : memref<18x18x64xf32, #tpu.memory_space<vmem>>, vector<16x16x64xf32>
    %127 = vector.shape_cast %126 : vector<16x16x64xf32> to vector<256x64xf32>
    %128 = arith.truncf %127 : vector<256x64xf32> to vector<256x64xbf16>
    %c0_102 = arith.constant 0 : index
    %c0_103 = arith.constant 0 : index
    %c0_104 = arith.constant 0 : index
    %129 = vector.load %arg4[%c0_102, %c0_103, %c0_104] : memref<9x64x128xbf16, #tpu.memory_space<vmem>>, vector<1x64x128xbf16>
    %130 = vector.shape_cast %129 : vector<1x64x128xbf16> to vector<64x128xbf16>
    %cst_105 = arith.constant dense<0.000000e+00> : vector<256x128xf32>
    %131 = tpu.matmul %128, %130, %cst_105 {dimension_numbers = #tpu.dot_dimension_numbers<[1], [0], [0], [1], [0, 0, 1, 1], [], []>} : vector<256x64xbf16>, vector<64x128xbf16>, vector<256x128xf32> -> vector<256x128xf32>
    %132 = arith.addf %125, %131 : vector<256x128xf32>
    %c0_106 = arith.constant 0 : index
    %c1_107 = arith.constant 1 : index
    %c0_108 = arith.constant 0 : index
    %133 = vector.load %arg6[%c0_106, %c1_107, %c0_108] : memref<18x18x64xf32, #tpu.memory_space<vmem>>, vector<16x16x64xf32>
    %134 = vector.shape_cast %133 : vector<16x16x64xf32> to vector<256x64xf32>
    %135 = arith.truncf %134 : vector<256x64xf32> to vector<256x64xbf16>
    %c1_109 = arith.constant 1 : index
    %c0_110 = arith.constant 0 : index
    %c0_111 = arith.constant 0 : index
    %136 = vector.load %arg4[%c1_109, %c0_110, %c0_111] : memref<9x64x128xbf16, #tpu.memory_space<vmem>>, vector<1x64x128xbf16>
    %137 = vector.shape_cast %136 : vector<1x64x128xbf16> to vector<64x128xbf16>
    %cst_112 = arith.constant dense<0.000000e+00> : vector<256x128xf32>
    %138 = tpu.matmul %135, %137, %cst_112 {dimension_numbers = #tpu.dot_dimension_numbers<[1], [0], [0], [1], [0, 0, 1, 1], [], []>} : vector<256x64xbf16>, vector<64x128xbf16>, vector<256x128xf32> -> vector<256x128xf32>
    %139 = arith.addf %132, %138 : vector<256x128xf32>
    %c0_113 = arith.constant 0 : index
    %c2_114 = arith.constant 2 : index
    %c0_115 = arith.constant 0 : index
    %140 = vector.load %arg6[%c0_113, %c2_114, %c0_115] : memref<18x18x64xf32, #tpu.memory_space<vmem>>, vector<16x16x64xf32>
    %141 = vector.shape_cast %140 : vector<16x16x64xf32> to vector<256x64xf32>
    %142 = arith.truncf %141 : vector<256x64xf32> to vector<256x64xbf16>
    %c2_116 = arith.constant 2 : index
    %c0_117 = arith.constant 0 : index
    %c0_118 = arith.constant 0 : index
    %143 = vector.load %arg4[%c2_116, %c0_117, %c0_118] : memref<9x64x128xbf16, #tpu.memory_space<vmem>>, vector<1x64x128xbf16>
    %144 = vector.shape_cast %143 : vector<1x64x128xbf16> to vector<64x128xbf16>
    %cst_119 = arith.constant dense<0.000000e+00> : vector<256x128xf32>
    %145 = tpu.matmul %142, %144, %cst_119 {dimension_numbers = #tpu.dot_dimension_numbers<[1], [0], [0], [1], [0, 0, 1, 1], [], []>} : vector<256x64xbf16>, vector<64x128xbf16>, vector<256x128xf32> -> vector<256x128xf32>
    %146 = arith.addf %139, %145 : vector<256x128xf32>
    %c1_120 = arith.constant 1 : index
    %c0_121 = arith.constant 0 : index
    %c0_122 = arith.constant 0 : index
    %147 = vector.load %arg6[%c1_120, %c0_121, %c0_122] : memref<18x18x64xf32, #tpu.memory_space<vmem>>, vector<16x16x64xf32>
    %148 = vector.shape_cast %147 : vector<16x16x64xf32> to vector<256x64xf32>
    %149 = arith.truncf %148 : vector<256x64xf32> to vector<256x64xbf16>
    %c3_123 = arith.constant 3 : index
    %c0_124 = arith.constant 0 : index
    %c0_125 = arith.constant 0 : index
    %150 = vector.load %arg4[%c3_123, %c0_124, %c0_125] : memref<9x64x128xbf16, #tpu.memory_space<vmem>>, vector<1x64x128xbf16>
    %151 = vector.shape_cast %150 : vector<1x64x128xbf16> to vector<64x128xbf16>
    %cst_126 = arith.constant dense<0.000000e+00> : vector<256x128xf32>
    %152 = tpu.matmul %149, %151, %cst_126 {dimension_numbers = #tpu.dot_dimension_numbers<[1], [0], [0], [1], [0, 0, 1, 1], [], []>} : vector<256x64xbf16>, vector<64x128xbf16>, vector<256x128xf32> -> vector<256x128xf32>
    %153 = arith.addf %146, %152 : vector<256x128xf32>
    %c1_127 = arith.constant 1 : index
    %c1_128 = arith.constant 1 : index
    %c0_129 = arith.constant 0 : index
    %154 = vector.load %arg6[%c1_127, %c1_128, %c0_129] : memref<18x18x64xf32, #tpu.memory_space<vmem>>, vector<16x16x64xf32>
    %155 = vector.shape_cast %154 : vector<16x16x64xf32> to vector<256x64xf32>
    %156 = arith.truncf %155 : vector<256x64xf32> to vector<256x64xbf16>
    %c4_130 = arith.constant 4 : index
    %c0_131 = arith.constant 0 : index
    %c0_132 = arith.constant 0 : index
    %157 = vector.load %arg4[%c4_130, %c0_131, %c0_132] : memref<9x64x128xbf16, #tpu.memory_space<vmem>>, vector<1x64x128xbf16>
    %158 = vector.shape_cast %157 : vector<1x64x128xbf16> to vector<64x128xbf16>
    %cst_133 = arith.constant dense<0.000000e+00> : vector<256x128xf32>
    %159 = tpu.matmul %156, %158, %cst_133 {dimension_numbers = #tpu.dot_dimension_numbers<[1], [0], [0], [1], [0, 0, 1, 1], [], []>} : vector<256x64xbf16>, vector<64x128xbf16>, vector<256x128xf32> -> vector<256x128xf32>
    %160 = arith.addf %153, %159 : vector<256x128xf32>
    %c1_134 = arith.constant 1 : index
    %c2_135 = arith.constant 2 : index
    %c0_136 = arith.constant 0 : index
    %161 = vector.load %arg6[%c1_134, %c2_135, %c0_136] : memref<18x18x64xf32, #tpu.memory_space<vmem>>, vector<16x16x64xf32>
    %162 = vector.shape_cast %161 : vector<16x16x64xf32> to vector<256x64xf32>
    %163 = arith.truncf %162 : vector<256x64xf32> to vector<256x64xbf16>
    %c5_137 = arith.constant 5 : index
    %c0_138 = arith.constant 0 : index
    %c0_139 = arith.constant 0 : index
    %164 = vector.load %arg4[%c5_137, %c0_138, %c0_139] : memref<9x64x128xbf16, #tpu.memory_space<vmem>>, vector<1x64x128xbf16>
    %165 = vector.shape_cast %164 : vector<1x64x128xbf16> to vector<64x128xbf16>
    %cst_140 = arith.constant dense<0.000000e+00> : vector<256x128xf32>
    %166 = tpu.matmul %163, %165, %cst_140 {dimension_numbers = #tpu.dot_dimension_numbers<[1], [0], [0], [1], [0, 0, 1, 1], [], []>} : vector<256x64xbf16>, vector<64x128xbf16>, vector<256x128xf32> -> vector<256x128xf32>
    %167 = arith.addf %160, %166 : vector<256x128xf32>
    %c2_141 = arith.constant 2 : index
    %c0_142 = arith.constant 0 : index
    %c0_143 = arith.constant 0 : index
    %168 = vector.load %arg6[%c2_141, %c0_142, %c0_143] : memref<18x18x64xf32, #tpu.memory_space<vmem>>, vector<16x16x64xf32>
    %169 = vector.shape_cast %168 : vector<16x16x64xf32> to vector<256x64xf32>
    %170 = arith.truncf %169 : vector<256x64xf32> to vector<256x64xbf16>
    %c6_144 = arith.constant 6 : index
    %c0_145 = arith.constant 0 : index
    %c0_146 = arith.constant 0 : index
    %171 = vector.load %arg4[%c6_144, %c0_145, %c0_146] : memref<9x64x128xbf16, #tpu.memory_space<vmem>>, vector<1x64x128xbf16>
    %172 = vector.shape_cast %171 : vector<1x64x128xbf16> to vector<64x128xbf16>
    %cst_147 = arith.constant dense<0.000000e+00> : vector<256x128xf32>
    %173 = tpu.matmul %170, %172, %cst_147 {dimension_numbers = #tpu.dot_dimension_numbers<[1], [0], [0], [1], [0, 0, 1, 1], [], []>} : vector<256x64xbf16>, vector<64x128xbf16>, vector<256x128xf32> -> vector<256x128xf32>
    %174 = arith.addf %167, %173 : vector<256x128xf32>
    %c2_148 = arith.constant 2 : index
    %c1_149 = arith.constant 1 : index
    %c0_150 = arith.constant 0 : index
    %175 = vector.load %arg6[%c2_148, %c1_149, %c0_150] : memref<18x18x64xf32, #tpu.memory_space<vmem>>, vector<16x16x64xf32>
    %176 = vector.shape_cast %175 : vector<16x16x64xf32> to vector<256x64xf32>
    %177 = arith.truncf %176 : vector<256x64xf32> to vector<256x64xbf16>
    %c7_151 = arith.constant 7 : index
    %c0_152 = arith.constant 0 : index
    %c0_153 = arith.constant 0 : index
    %178 = vector.load %arg4[%c7_151, %c0_152, %c0_153] : memref<9x64x128xbf16, #tpu.memory_space<vmem>>, vector<1x64x128xbf16>
    %179 = vector.shape_cast %178 : vector<1x64x128xbf16> to vector<64x128xbf16>
    %cst_154 = arith.constant dense<0.000000e+00> : vector<256x128xf32>
    %180 = tpu.matmul %177, %179, %cst_154 {dimension_numbers = #tpu.dot_dimension_numbers<[1], [0], [0], [1], [0, 0, 1, 1], [], []>} : vector<256x64xbf16>, vector<64x128xbf16>, vector<256x128xf32> -> vector<256x128xf32>
    %181 = arith.addf %174, %180 : vector<256x128xf32>
    %c2_155 = arith.constant 2 : index
    %c2_156 = arith.constant 2 : index
    %c0_157 = arith.constant 0 : index
    %182 = vector.load %arg6[%c2_155, %c2_156, %c0_157] : memref<18x18x64xf32, #tpu.memory_space<vmem>>, vector<16x16x64xf32>
    %183 = vector.shape_cast %182 : vector<16x16x64xf32> to vector<256x64xf32>
    %184 = arith.truncf %183 : vector<256x64xf32> to vector<256x64xbf16>
    %c8_158 = arith.constant 8 : index
    %c0_159 = arith.constant 0 : index
    %c0_160 = arith.constant 0 : index
    %185 = vector.load %arg4[%c8_158, %c0_159, %c0_160] : memref<9x64x128xbf16, #tpu.memory_space<vmem>>, vector<1x64x128xbf16>
    %186 = vector.shape_cast %185 : vector<1x64x128xbf16> to vector<64x128xbf16>
    %cst_161 = arith.constant dense<0.000000e+00> : vector<256x128xf32>
    %187 = tpu.matmul %184, %186, %cst_161 {dimension_numbers = #tpu.dot_dimension_numbers<[1], [0], [0], [1], [0, 0, 1, 1], [], []>} : vector<256x64xbf16>, vector<64x128xbf16>, vector<256x128xf32> -> vector<256x128xf32>
    %188 = arith.addf %181, %187 : vector<256x128xf32>
    %c1_162 = arith.constant 1 : index
    %c0_163 = arith.constant 0 : index
    %c0_164 = arith.constant 0 : index
    %189 = vector.load %arg5[%c1_162, %c0_163, %c0_164] : memref<2x256x128xf32, #tpu.memory_space<vmem>>, vector<1x256x128xf32>
    %190 = vector.shape_cast %189 : vector<1x256x128xf32> to vector<256x128xf32>
    %191 = vector.shape_cast %188 : vector<256x128xf32> to vector<1x256x128xf32>
    tpu.vector_store %arg5[%c1_162, %c0_163, %c0_164], %191 {strides = array<i32>} : memref<2x256x128xf32, #tpu.memory_space<vmem>>, vector<1x256x128xf32>,
    return
  }
  func.func @transform_0(%arg0: i32) -> (i32, i32, i32, i32) {
    %c0_i32 = arith.constant 0 : i32
    %c0_i32_0 = arith.constant 0 : i32
    %c0_i32_1 = arith.constant 0 : i32
    %c0_i32_2 = arith.constant 0 : i32
    %c0_i32_3 = arith.constant 0 : i32
    return %c0_i32, %c0_i32_0, %c0_i32_1, %c0_i32_2 : i32, i32, i32, i32
  }
  func.func @transform_1(%arg0: i32) -> (i32, i32) {
    %c0_i32 = arith.constant 0 : i32
    %c0_i32_0 = arith.constant 0 : i32
    %c0_i32_1 = arith.constant 0 : i32
    return %c0_i32, %c0_i32_0 : i32, i32
  }
  func.func @transform_2(%arg0: i32) -> (i32, i32) {
    %c0_i32 = arith.constant 0 : i32
    %c0_i32_0 = arith.constant 0 : i32
    %c0_i32_1 = arith.constant 0 : i32
    return %c0_i32, %c0_i32_0 : i32, i32
  }
  func.func @transform_3(%arg0: i32) -> (i32, i32, i32) {
    %c0_i32 = arith.constant 0 : i32
    %c0_i32_0 = arith.constant 0 : i32
    %c0_i32_1 = arith.constant 0 : i32
    %c0_i32_2 = arith.constant 0 : i32
    return %c0_i32, %c0_i32_0, %c0_i32_1 : i32, i32, i32
  }
  func.func @transform_4(%arg0: i32) -> (i32, i32, i32) {
    %c0_i32 = arith.constant 0 : i32
    %c0_i32_0 = arith.constant 0 : i32
    %c0_i32_1 = arith.constant 0 : i32
    %c0_i32_2 = arith.constant 0 : i32
    return %c0_i32, %c0_i32_0, %c0_i32_1 : i32, i32, i32
  }
}

</mosaic_0001>

<bundles_post_ra>
// kernel: bn_relu_conv.1
= control target key start
LH: loop header
LB: loop body
LE: loop exit
PB: predicated region body
PF: predicated region fallthrough
CT: control target
= control target key end

     0   :  { %vm50_vm0 = vcmask 523264   ;;  %vm457_vm2 = vcmask 517120   ;;  %s8522_s3 = inlined_call_operand.vmem [shape: bf16[9,64,128], index: 3, kind: input, shape index: {}]   ;;  %s8523_s0 = inlined_call_operand.vmem [shape: f32[2,16,16,64], index: 0, kind: input, shape index: {}]   ;;  %s8524_s1 = inlined_call_operand.vmem [shape: f32[1,64], index: 1, kind: input, shape index: {}]   ;;  %s8525_s2 = inlined_call_operand.vmem [shape: f32[1,64], index: 2, kind: input, shape index: {}]   ;;  %s8526_s4 = inlined_call_operand.vmem [shape: f32[2,256,128], index: 4, kind: output, shape index: {}]  }
   0x1   :  { %v6076_v0 = vld [vmem:[%s8522_s3 + $0x38] sm:$0xff]  ;;  %v6075_v2 = vld [vmem:[%s8522_s3 + $0x30] sm:$0xff]  ;;  %v18_v4 = vld [vmem:[%s8523_s0] sm:$0xff] }
   0x2   :  { %v6072_v1 = vld [vmem:[%s8522_s3 + $0x18] sm:$0xff]  ;;  %6141 = vmatpush.bf16.msra.mxu2 %v6076_v0  ;;  %v6071_v3 = vld [vmem:[%s8522_s3 + $0x10] sm:$0xff]  ;;  %866 = vmatpush.bf16.msra.mxu0 %v6076_v0  ;;  %v19_v5 = vld [vmem:[%s8523_s0 + $0x8] sm:$0xff]  ;;  %v51_v8 = vsel %vm50_vm0, %v18_v4, 0.0  ;;  %v121_v26 = vmul.f32 %v18_v4, %v18_v4 }
   0x3   :  { %6145 = vmatpush.bf16.msra.mxu3 %v6072_v1  ;;  %1027 = vmatpush.bf16.msra.mxu1 %v6072_v1  ;;  %v20_v6 = vld [vmem:[%s8523_s0 + $0x10] sm:$0xff]  ;;  %v21_v7 = vld [vmem:[%s8523_s0 + $0x18] sm:$0xff]  ;;  %v52_v9 = vsel %vm50_vm0, %v19_v5, 0.0  ;;  %v22_v11 = vld [vmem:[%s8523_s0 + $0x20] sm:$0xff]  ;;  %v122_v30 = vmul.f32 %v19_v5, %v19_v5 }
   0x4   :  { %v54_v10 = vsel %vm50_vm0, %v20_v6, 0.0  ;;  %v53_v12 = vadd.f32 %v52_v9, %v51_v8  ;;  %v6074_v13 = vld [vmem:[%s8522_s3 + $0x28] sm:$0xff]  ;;  %v56_v15 = vsel %vm50_vm0, %v21_v7, 0.0  ;;  %v58_v18 = vsel %vm50_vm0, %v22_v11, 0.0  ;;  %v24_v19 = vld [vmem:[%s8523_s0 + $0x30] sm:$0xff]  ;;  %v6073_v21 = vld [vmem:[%s8522_s3 + $0x20] sm:$0xff] }
   0x5   :  { %v6070_v14 = vld [vmem:[%s8522_s3 + $0x8] sm:$0xff]  ;;  %v6069_v22 = vld [vmem:[%s8522_s3] sm:$0xff]  ;;  %v25_v24 = vld [vmem:[%s8523_s0 + $0x38] sm:$0xff]  ;;  %v62_v27 = vsel %vm50_vm0, %v24_v19, 0.0  ;;  %v123_v32 = vmul.f32 %v20_v6, %v20_v6  ;;  %v124_v35 = vmul.f32 %v21_v7, %v21_v7  ;;  %v153_v36 = vsel %vm50_vm0, %v121_v26, 0.0 }
   0x6   :  { %6142 = vmatpush.bf16.msra.mxu2 %v6075_v2  ;;  %867 = vmatpush.bf16.msra.mxu0 %v6075_v2  ;;  %v23_v16 = vld [vmem:[%s8523_s0 + $0x28] sm:$0xff]  ;;  %v55_v17 = vadd.f32 %v54_v10, %v53_v12  ;;  %v26_v28 = vld [vmem:[%s8523_s0 + $0x40] sm:$0xff]  ;;  %v64_v31 = vsel %vm50_vm0, %v25_v24, 0.0  ;;  %v28_v38 = vld [vmem:[%s8523_s0 + $0x50] sm:$0xff]  ;;  %v125_v40 = vmul.f32 %v22_v11, %v22_v11  ;;  %v154_v41 = vsel %vm50_vm0, %v122_v30, 0.0 }
   0x7   :  { %6146 = vmatpush.bf16.msra.mxu3 %v6071_v3  ;;  %1028 = vmatpush.bf16.msra.mxu1 %v6071_v3  ;;  %v60_v23 = vsel %vm50_vm0, %v23_v16, 0.0  ;;  %v27_v33 = vld [vmem:[%s8523_s0 + $0x48] sm:$0xff]  ;;  %v66_v37 = vsel %vm50_vm0, %v26_v28, 0.0  ;;  %v155_v43 = vadd.f32 %v154_v41, %v153_v36  ;;  %v156_v44 = vsel %vm50_vm0, %v123_v32, 0.0  ;;  %v29_v45 = vld [vmem:[%s8523_s0 + $0x58] sm:$0xff]  ;;  %v30_v51 = vld [vmem:[%s8523_s0 + $0x60] sm:$0xff] }
   0x8   :  { %v57_v20 = vadd.f32 %v56_v15, %v55_v17  ;;  %v68_v42 = vsel %vm50_vm0, %v27_v33, 0.0  ;;  %v126_v47 = vmul.f32 %v23_v16, %v23_v16  ;;  %v158_v48 = vsel %vm50_vm0, %v124_v35, 0.0  ;;  %v31_v57 = vld [vmem:[%s8523_s0 + $0x68] sm:$0xff]  ;;  %v6270_v63 = vld [vmem:[%s8523_s0 + $0x70] sm:$0xff]  ;;  %v6276_v3 = vld [vmem:[%s8523_s0 + $0x100] sm:$0xff] }
   0x9   :  { %v70_v49 = vsel %vm50_vm0, %v28_v38, 0.0  ;;  %v157_v50 = vadd.f32 %v156_v44, %v155_v43  ;;  %v127_v53 = vmul.f32 %v24_v19, %v24_v19  ;;  %v160_v54 = vsel %vm50_vm0, %v125_v40, 0.0  ;;  %v6282_v6 = vld [vmem:[%s8523_s0 + $0x108] sm:$0xff]  ;;  %v6287_v7 = vld [vmem:[%s8523_s0 + $0x78] sm:$0xff]  ;;  %v6293_v11 = vld [vmem:[%s8523_s0 + $0x110] sm:$0xff] }
   0xa   :  { %6143 = vmatpush.bf16.msra.mxu2 %v6074_v13  ;;  %868 = vmatpush.bf16.msra.mxu0 %v6074_v13  ;;  %v59_v25 = vadd.f32 %v58_v18, %v57_v20  ;;  %v72_v55 = vsel %vm50_vm0, %v29_v45, 0.0  ;;  %v128_v59 = vmul.f32 %v25_v24, %v25_v24  ;;  %v162_v60 = vsel %vm50_vm0, %v126_v47, 0.0  ;;  %v34_v16 = vld [vmem:[%s8523_s0 + $0x80] sm:$0xff]  ;;  %v35_v26 = vld [vmem:[%s8523_s0 + $0x88] sm:$0xff]  ;;  %v6338_v41 = vld [vmem:[%s8523_s0 + $0x130] sm:$0xff] }
   0xb   :  { %6147 = vmatpush.bf16.msra.mxu3 %v6070_v14  ;;  %1029 = vmatpush.bf16.msra.mxu1 %v6070_v14  ;;  %v159_v56 = vadd.f32 %v158_v48, %v157_v50  ;;  %v74_v61 = vsel %vm50_vm0, %v30_v51, 0.0  ;;  %v129_v1 = vmul.f32 %v26_v28, %v26_v28  ;;  %v164_v2 = vsel %vm50_vm0, %v127_v53, 0.0  ;;  %v6300_v14 = vld [vmem:[%s8523_s0 + $0x118] sm:$0xff]  ;;  %v36_v47 = vld [vmem:[%s8523_s0 + $0x90] sm:$0xff] }
   0xc   :  { %v61_v29 = vadd.f32 %v60_v23, %v59_v25  ;;  %v76_v4 = vsel %vm50_vm0, %v31_v57, 0.0  ;;  %v130_v9 = vmul.f32 %v27_v33, %v27_v33  ;;  %v166_v10 = vsel %vm50_vm0, %v128_v59, 0.0  ;;  %v6315_v23 = vld [vmem:[%s8523_s0 + $0x120] sm:$0xff]  ;;  %v6329_v33 = vld [vmem:[%s8523_s0 + $0x128] sm:$0xff] }
   0xd   :  { %v161_v62 = vadd.f32 %v160_v54, %v159_v56  ;;  %v78_v12 = vsel %vm50_vm0, %v6270_v63, 0.0  ;;  %v256_v15 = vsel %vm50_vm0, %v6276_v3, 0.0  ;;  %v131_v18 = vmul.f32 %v28_v38, %v28_v38  ;;  %v6359_v56 = vld [vmem:[%s8523_s0 + $0x140] sm:$0xff] }
   0xe   :  { %6144 = vmatpush.bf16.msra.mxu2 %v6073_v21  ;;  %869 = vmatpush.bf16.msra.mxu0 %v6073_v21  ;;  %v63_v34 = vadd.f32 %v62_v27, %v61_v29  ;;  %v168_v19 = vsel %vm50_vm0, %v129_v1, 0.0  ;;  %v257_v20 = vsel %vm50_vm0, %v6282_v6, 0.0  ;;  %v80_v21 = vsel %vm50_vm0, %v6287_v7, 0.0  ;;  %v6373_v1 = vld [vmem:[%s8523_s0 + $0x148] sm:$0xff] }
   0xf   :  { %6148 = vmatpush.bf16.msra.mxu3 %v6069_v22  ;;  %1030 = vmatpush.bf16.msra.mxu1 %v6069_v22  ;;  %v163_v5 = vadd.f32 %v162_v60, %v161_v62  ;;  %v258_v24 = vadd.f32 %v257_v20, %v256_v15  ;;  %v259_v25 = vsel %vm50_vm0, %v6293_v11, 0.0  ;;  %v132_v28 = vmul.f32 %v29_v45, %v29_v45  ;;  %v37_v62 = vld [vmem:[%s8523_s0 + $0x98] sm:$0xff] }
  0x10   :  { %v65_v39 = vadd.f32 %v64_v31, %v63_v34  ;;  %v170_v29 = vsel %vm50_vm0, %v130_v9, 0.0  ;;  %v261_v30 = vsel %vm50_vm0, %v6300_v14, 0.0  ;;  %v82_v31 = vsel %vm50_vm0, %v34_v16, 0.0 }
  0x11   :  { %v165_v13 = vadd.f32 %v164_v2, %v163_v5  ;;  %v260_v34 = vadd.f32 %v259_v25, %v258_v24  ;;  %v133_v36 = vmul.f32 %v30_v51, %v30_v51  ;;  %v263_v38 = vsel %vm50_vm0, %v6315_v23, 0.0 }
  0x12   :  { %v67_v46 = vadd.f32 %v66_v37, %v65_v39  ;;  %v172_v37 = vsel %vm50_vm0, %v131_v18, 0.0  ;;  %v84_v39 = vsel %vm50_vm0, %v35_v26, 0.0  ;;  %v134_v44 = vmul.f32 %v31_v57, %v31_v57 }
  0x13   :  { %v167_v22 = vadd.f32 %v166_v10, %v165_v13  ;;  %v174_v45 = vsel %vm50_vm0, %v132_v28, 0.0  ;;  %v135_v51 = vmul.f32 %v6270_v63, %v6270_v63  ;;  %v267_v53 = vsel %vm50_vm0, %v6338_v41, 0.0 }
  0x14   :  { %v69_v52 = vadd.f32 %v68_v42, %v67_v46  ;;  %v262_v42 = vadd.f32 %v261_v30, %v260_v34  ;;  %v265_v46 = vsel %vm50_vm0, %v6329_v33, 0.0  ;;  %v136_v59 = vmul.f32 %v6287_v7, %v6287_v7 }
  0x15   :  { %v169_v32 = vadd.f32 %v168_v19, %v167_v22  ;;  %v178_v60 = vsel %vm50_vm0, %v134_v44, 0.0  ;;  %v180_v5 = vsel %vm50_vm0, %v135_v51, 0.0  ;;  %v88_v15 = vsel %vm50_vm0, %v37_v62, 0.0  ;;  %v38_v19 = vld [vmem:[%s8523_s0 + $0xa0] sm:$0xff] }
  0x16   :  { %v71_v58 = vadd.f32 %v70_v49, %v69_v52  ;;  %v6349_v49 = vld [vmem:[%s8523_s0 + $0x138] sm:$0xff]  ;;  %v264_v50 = vadd.f32 %v263_v38, %v262_v42  ;;  %v176_v52 = vsel %vm50_vm0, %v133_v36, 0.0  ;;  %v182_v18 = vsel %vm50_vm0, %v136_v59, 0.0  ;;  %v6413_v38 = vld [vmem:[%s8523_s0 + $0x168] sm:$0xff] }
  0x17   :  { %v171_v40 = vadd.f32 %v170_v29, %v169_v32  ;;  %v139_v24 = vmul.f32 %v36_v47, %v36_v47  ;;  %v6401_v29 = vld [vmem:[%s8523_s0 + $0x160] sm:$0xff]  ;;  %v90_v32 = vsel %vm50_vm0, %v38_v19, 0.0  ;;  %v140_v34 = vmul.f32 %v37_v62, %v37_v62 }
  0x18   :  { %v73_v0 = vadd.f32 %v72_v55, %v71_v58  ;;  %v266_v57 = vadd.f32 %v265_v46, %v264_v50  ;;  %v86_v58 = vsel %vm50_vm0, %v36_v47, 0.0  ;;  %v279_v42 = vsel %vm50_vm0, %v6401_v29, 0.0  ;;  %v6425_v47 = vld [vmem:[%s8523_s0 + $0x170] sm:$0xff] }
  0x19   :  { %v173_v48 = vadd.f32 %v172_v37, %v171_v40  ;;  %v188_v40 = vsel %vm50_vm0, %v139_v24, 0.0  ;;  %v141_v50 = vmul.f32 %v38_v19, %v38_v19  ;;  %v190_v51 = vsel %vm50_vm0, %v140_v34, 0.0  ;;  %v6476_v24 = vld [vmem:[%s8523_s0 + $0x190] sm:$0xff]  ;;  %v6487_v34 = vld [vmem:[%s8523_s0 + $0x198] sm:$0xff] }
  0x1a   :  { %v75_v8 = vadd.f32 %v74_v61, %v73_v0  ;;  %v269_v61 = vsel %vm50_vm0, %v6349_v49, 0.0  ;;  %v268_v2 = vadd.f32 %v267_v53, %v266_v57  ;;  %v326_v53 = vmul.f32 %v6276_v3, %v6276_v3  ;;  %v41_v3 = vld [vmem:[%s8523_s0 + $0xb8] sm:$0xff] }
  0x1b   :  { %v175_v55 = vadd.f32 %v174_v45, %v173_v48  ;;  %v328_v59 = vmul.f32 %v6293_v11, %v6293_v11  ;;  %v329_v11 = vmul.f32 %v6300_v14, %v6300_v14 }
  0x1c   :  { %v77_v17 = vadd.f32 %v76_v4, %v75_v8  ;;  %v137_v4 = vmul.f32 %v34_v16, %v34_v16  ;;  %v271_v8 = vsel %vm50_vm0, %v6359_v56, 0.0  ;;  %v270_v13 = vadd.f32 %v269_v61, %v268_v2  ;;  %v6450_v2 = vld [vmem:[%s8523_s0 + $0x180] sm:$0xff] }
  0x1d   :  { %v177_v0 = vadd.f32 %v176_v52, %v175_v55  ;;  %v273_v16 = vsel %vm50_vm0, %v6373_v1, 0.0  ;;  %v281_v52 = vsel %vm50_vm0, %v6413_v38, 0.0  ;;  %v6435_v55 = vld [vmem:[%s8523_s0 + $0x178] sm:$0xff]  ;;  %v283_v61 = vsel %vm50_vm0, %v6425_v47, 0.0 }
  0x1e   :  { %v79_v27 = vadd.f32 %v78_v12, %v77_v17  ;;  %v6381_v12 = vld [vmem:[%s8523_s0 + $0x150] sm:$0xff]  ;;  %v138_v17 = vmul.f32 %v35_v26, %v35_v26  ;;  %v272_v22 = vadd.f32 %v271_v8, %v270_v13  ;;  %v184_v25 = vsel %vm50_vm0, %v137_v4, 0.0 }
  0x1f   :  { %v179_v10 = vadd.f32 %v178_v60, %v177_v0  ;;  %v275_v26 = vsel %vm50_vm0, %v6381_v12, 0.0  ;;  %v285_v8 = vsel %vm50_vm0, %v6435_v55, 0.0  ;;  %v361_v14 = vsel %vm50_vm0, %v328_v59, 0.0 }
  0x20   :  { %v81_v35 = vadd.f32 %v80_v21, %v79_v27  ;;  %v6393_v21 = vld [vmem:[%s8523_s0 + $0x158] sm:$0xff]  ;;  %v274_v30 = vadd.f32 %v273_v16, %v272_v22  ;;  %v287_v16 = vsel %vm50_vm0, %v6450_v2, 0.0 }
  0x21   :  { %v181_v20 = vadd.f32 %v180_v5, %v179_v10  ;;  %v277_v36 = vsel %vm50_vm0, %v6393_v21, 0.0  ;;  %v192_v5 = vsel %vm50_vm0, %v141_v50, 0.0  ;;  %v6461_v10 = vld [vmem:[%s8523_s0 + $0x188] sm:$0xff]  ;;  %v293_v50 = vsel %vm50_vm0, %v6487_v34, 0.0 }
  0x22   :  { %v83_v43 = vadd.f32 %v82_v31, %v81_v35  ;;  %v39_v31 = vld [vmem:[%s8523_s0 + $0xa8] sm:$0xff]  ;;  %v186_v35 = vsel %vm50_vm0, %v138_v17, 0.0 }
  0x23   :  { %v183_v28 = vadd.f32 %v182_v18, %v181_v20  ;;  %v92_v45 = vsel %vm50_vm0, %v39_v31, 0.0  ;;  %v142_v0 = vmul.f32 %v39_v31, %v39_v31  ;;  %v96_v18 = vsel %vm50_vm0, %v41_v3, 0.0  ;;  %v42_v20 = vld [vmem:[%s8523_s0 + $0xc0] sm:$0xff] }
  0x24   :  { %v85_v54 = vadd.f32 %v84_v39, %v83_v43  ;;  %v276_v39 = vadd.f32 %v275_v26, %v274_v30  ;;  %v40_v43 = vld [vmem:[%s8523_s0 + $0xb0] sm:$0xff]  ;;  %v363_v26 = vsel %vm50_vm0, %v329_v11, 0.0  ;;  %v289_v30 = vsel %vm50_vm0, %v6461_v10, 0.0 }
  0x25   :  { %v185_v37 = vadd.f32 %v184_v25, %v183_v28  ;;  %v94_v60 = vsel %vm50_vm0, %v40_v43, 0.0  ;;  %v331_v25 = vmul.f32 %v6329_v33, %v6329_v33  ;;  %v145_v59 = vmul.f32 %v42_v20, %v42_v20 }
  0x26   :  { %v87_v9 = vadd.f32 %v86_v58, %v85_v54  ;;  %v278_v48 = vadd.f32 %v277_v36, %v276_v39  ;;  %v327_v58 = vmul.f32 %v6282_v6, %v6282_v6  ;;  %v332_v36 = vmul.f32 %v6338_v41, %v6338_v41 }
  0x27   :  { %v187_v46 = vadd.f32 %v186_v35, %v185_v37  ;;  %v98_v37 = vsel %vm50_vm0, %v42_v20, 0.0  ;;  %v291_v39 = vsel %vm50_vm0, %v6476_v24, 0.0  ;;  %v367_v41 = vsel %vm50_vm0, %v331_v25, 0.0 }
  0x28   :  { %v89_v27 = vadd.f32 %v88_v15, %v87_v9  ;;  %v280_v57 = vadd.f32 %v279_v42, %v278_v48  ;;  %v358_v9 = vsel %vm50_vm0, %v326_v53, 0.0  ;;  %v330_v15 = vmul.f32 %v6315_v23, %v6315_v23 }
  0x29   :  { %v189_v54 = vadd.f32 %v188_v40, %v187_v46  ;;  %v359_v17 = vsel %vm50_vm0, %v327_v58, 0.0  ;;  %v144_v46 = vmul.f32 %v41_v3, %v41_v3  ;;  %v369_v58 = vsel %vm50_vm0, %v332_v36, 0.0 }
  0x2a   :  { %v91_v44 = vadd.f32 %v90_v32, %v89_v27  ;;  %v282_v6 = vadd.f32 %v281_v52, %v280_v57  ;;  %v360_v19 = vadd.f32 %v359_v17, %v358_v9  ;;  %v143_v27 = vmul.f32 %v40_v43, %v40_v43  ;;  %v6498_v43 = vld [vmem:[%s8523_s0 + $0x1a0] sm:$0xff]  ;;  %v43_v52 = vld [vmem:[%s8523_s0 + $0xc8] sm:$0xff]  ;;  %v44_v9 = vld [vmem:[%s8523_s0 + $0xd0] sm:$0xff] }
  0x2b   :  { %v191_v4 = vadd.f32 %v190_v51, %v189_v54  ;;  %v194_v32 = vsel %vm50_vm0, %v142_v0, 0.0  ;;  %v365_v33 = vsel %vm50_vm0, %v330_v15, 0.0  ;;  %v6512_v54 = vld [vmem:[%s8523_s0 + $0x1a8] sm:$0xff]  ;;  %v334_v57 = vmul.f32 %v6359_v56, %v6359_v56  ;;  %v6537_v15 = vld [vmem:[%s8523_s0 + $0x1b8] sm:$0xff] }
  0x2c   :  { %v93_v62 = vadd.f32 %v92_v45, %v91_v44  ;;  %v284_v13 = vadd.f32 %v283_v61, %v282_v6  ;;  %v362_v31 = vadd.f32 %v361_v14, %v360_v19  ;;  %v333_v45 = vmul.f32 %v6349_v49, %v6349_v49 }
  0x2d   :  { %v193_v28 = vadd.f32 %v192_v5, %v191_v4  ;;  %v196_v53 = vsel %vm50_vm0, %v143_v27, 0.0  ;;  %v335_v6 = vmul.f32 %v6373_v1, %v6373_v1  ;;  %v100_v56 = vsel %vm50_vm0, %v43_v52, 0.0 }
  0x2e   :  { %v95_v22 = vadd.f32 %v94_v60, %v93_v62  ;;  %v286_v23 = vadd.f32 %v285_v8, %v284_v13  ;;  %v364_v40 = vadd.f32 %v363_v26, %v362_v31  ;;  %v295_v60 = vsel %vm50_vm0, %v6498_v43, 0.0  ;;  %v6522_v62 = vld [vmem:[%s8523_s0 + $0x1b0] sm:$0xff]  ;;  %v45_v31 = vld [vmem:[%s8523_s0 + $0xd8] sm:$0xff] }
  0x2f   :  { %v195_v48 = vadd.f32 %v194_v32, %v193_v28  ;;  %v371_v11 = vsel %vm50_vm0, %v333_v45, 0.0  ;;  %v297_v5 = vsel %vm50_vm0, %v6512_v54, 0.0  ;;  %v198_v13 = vsel %vm50_vm0, %v144_v46, 0.0 }
  0x30   :  { %v288_v35 = vadd.f32 %v287_v16, %v286_v23  ;;  %v97_v42 = vadd.f32 %v96_v18, %v95_v22  ;;  %v366_v51 = vadd.f32 %v365_v33, %v364_v40  ;;  %v336_v17 = vmul.f32 %v6381_v12, %v6381_v12  ;;  %v6547_v22 = vld [vmem:[%s8523_s0 + $0x1c0] sm:$0xff] }
  0x31   :  { %v197_v4 = vadd.f32 %v196_v53, %v195_v48  ;;  %v373_v14 = vsel %vm50_vm0, %v334_v57, 0.0  ;;  %v146_v18 = vmul.f32 %v43_v52, %v43_v52  ;;  %v299_v16 = vsel %vm50_vm0, %v6522_v62, 0.0  ;;  %v46_v52 = vld [vmem:[%s8523_s0 + $0xe0] sm:$0xff] }
  0x32   :  { %v290_v44 = vadd.f32 %v289_v30, %v288_v35  ;;  %v368_v61 = vadd.f32 %v367_v41, %v366_v51  ;;  %v99_v3 = vadd.f32 %v98_v37, %v97_v42  ;;  %v337_v25 = vmul.f32 %v6393_v21, %v6393_v21  ;;  %v6562_v35 = vld [vmem:[%s8523_s0 + $0x1c8] sm:$0xff] }
  0x33   :  { %v375_v26 = vsel %vm50_vm0, %v335_v6, 0.0  ;;  %v102_v12 = vsel %vm50_vm0, %v44_v9, 0.0  ;;  %v199_v27 = vadd.f32 %v198_v13, %v197_v4  ;;  %v301_v28 = vsel %vm50_vm0, %v6537_v15, 0.0 }
  0x34   :  { %v292_v49 = vadd.f32 %v291_v39, %v290_v44  ;;  %v370_v8 = vadd.f32 %v369_v58, %v368_v61  ;;  %v101_v20 = vadd.f32 %v100_v56, %v99_v3  ;;  %v200_v32 = vsel %vm50_vm0, %v145_v59, 0.0  ;;  %v6572_v44 = vld [vmem:[%s8523_s0 + $0x1d0] sm:$0xff] }
  0x35   :  { %v338_v36 = vmul.f32 %v6401_v29, %v6401_v29  ;;  %v377_v33 = vsel %vm50_vm0, %v336_v17, 0.0  ;;  %v147_v37 = vmul.f32 %v44_v9, %v44_v9  ;;  %v303_v39 = vsel %vm50_vm0, %v6547_v22, 0.0  ;;  %v47_v9 = vld [vmem:[%s8523_s0 + $0xe8] sm:$0xff] }
  0x36   :  { %v294_v0 = vadd.f32 %v293_v50, %v292_v49  ;;  %v372_v19 = vadd.f32 %v371_v11, %v370_v8  ;;  %v103_v42 = vadd.f32 %v102_v12, %v101_v20  ;;  %v339_v41 = vmul.f32 %v6413_v38, %v6413_v38  ;;  %v6587_v49 = vld [vmem:[%s8523_s0 + $0x1d8] sm:$0xff] }
  0x37   :  { %v379_v46 = vsel %vm50_vm0, %v337_v25, 0.0  ;;  %v104_v29 = vsel %vm50_vm0, %v45_v31, 0.0  ;;  %v201_v48 = vadd.f32 %v200_v32, %v199_v27  ;;  %v305_v50 = vsel %vm50_vm0, %v6562_v35, 0.0 }
  0x38   :  { %v296_v1 = vadd.f32 %v295_v60, %v294_v0  ;;  %v374_v30 = vadd.f32 %v373_v14, %v372_v19  ;;  %v202_v53 = vsel %vm50_vm0, %v146_v18, 0.0  ;;  %v340_v57 = vmul.f32 %v6425_v47, %v6425_v47  ;;  %v6597_v0 = vld [vmem:[%s8523_s0 + $0x1e0] sm:$0xff]  ;;  %v6615_v18 = vld [vmem:[%s8523_s0 + $0x1e8] sm:$0xff] }
  0x39   :  { %v381_v58 = vsel %vm50_vm0, %v338_v36, 0.0  ;;  %v148_v59 = vmul.f32 %v45_v31, %v45_v31  ;;  %v307_v60 = vsel %vm50_vm0, %v6572_v44, 0.0  ;;  %v105_v3 = vadd.f32 %v104_v29, %v103_v42  ;;  %v6635_v36 = vld [vmem:[%s8523_s0 + $0x1f0] sm:$0xff]  ;;  %v49_v29 = vld [vmem:[%s8523_s0 + $0xf8] sm:$0xff] }
  0x3a   :  { %v298_v23 = vadd.f32 %v297_v5, %v296_v1  ;;  %v376_v40 = vadd.f32 %v375_v26, %v374_v30  ;;  %v341_v11 = vmul.f32 %v6435_v55, %v6435_v55  ;;  %v383_v56 = vsel %vm50_vm0, %v339_v41, 0.0  ;;  %v48_v30 = vld [vmem:[%s8523_s0 + $0xf0] sm:$0xff] }
  0x3b   :  { %v106_v47 = vsel %vm50_vm0, %v46_v52, 0.0  ;;  %v203_v4 = vadd.f32 %v202_v53, %v201_v48  ;;  %v309_v5 = vsel %vm50_vm0, %v6587_v49, 0.0  ;;  %v204_v13 = vsel %vm50_vm0, %v147_v37, 0.0 }
  0x3c   :  { %v300_v21 = vadd.f32 %v299_v16, %v298_v23  ;;  %v378_v51 = vadd.f32 %v377_v33, %v376_v40  ;;  %v342_v17 = vmul.f32 %v6450_v2, %v6450_v2  ;;  %v385_v55 = vsel %vm50_vm0, %v340_v57, 0.0 }
  0x3d   :  { %v149_v14 = vmul.f32 %v46_v52, %v46_v52  ;;  %v311_v16 = vsel %vm50_vm0, %v6597_v0, 0.0  ;;  %v107_v20 = vadd.f32 %v106_v47, %v105_v3  ;;  %v343_v25 = vmul.f32 %v6461_v10, %v6461_v10  ;;  %v5300_v52 = vld [vmem:[%s8523_s0 + $0x1f8] sm:$0xff] }
  0x3e   :  { %v302_v45 = vadd.f32 %v301_v28, %v300_v21  ;;  %v380_v61 = vadd.f32 %v379_v46, %v378_v51  ;;  %v387_v26 = vsel %vm50_vm0, %v341_v11, 0.0  ;;  %v108_v2 = vsel %vm50_vm0, %v47_v9, 0.0 }
  0x3f   :  { %v205_v12 = vadd.f32 %v204_v13, %v203_v4  ;;  %v206_v27 = vsel %vm50_vm0, %v148_v59, 0.0  ;;  %v313_v32 = vsel %vm50_vm0, %v6615_v18, 0.0  ;;  %v344_v21 = vmul.f32 %v6476_v24, %v6476_v24 }
  0x40   :  { %v304_v38 = vadd.f32 %v303_v39, %v302_v45  ;;  %v382_v8 = vadd.f32 %v381_v58, %v380_v61  ;;  %v389_v10 = vsel %vm50_vm0, %v342_v17, 0.0  ;;  %v109_v37 = vadd.f32 %v108_v2, %v107_v20 }
  0x41   :  { %v150_v39 = vmul.f32 %v47_v9, %v47_v9  ;;  %v345_v40 = vmul.f32 %v6487_v34, %v6487_v34  ;;  %v391_v42 = vsel %vm50_vm0, %v343_v25, 0.0  ;;  %v110_v45 = vsel %vm50_vm0, %v48_v30, 0.0 }
  0x42   :  { %v306_v6 = vadd.f32 %v305_v50, %v304_v38  ;;  %v384_v19 = vadd.f32 %v383_v56, %v382_v8  ;;  %v207_v41 = vadd.f32 %v206_v27, %v205_v12  ;;  %v208_v48 = vsel %vm50_vm0, %v149_v14, 0.0 }
  0x43   :  { %v315_v50 = vsel %vm50_vm0, %v6635_v36, 0.0  ;;  %v346_v51 = vmul.f32 %v6498_v43, %v6498_v43  ;;  %v393_v34 = vsel %vm50_vm0, %v344_v21, 0.0  ;;  %v111_v38 = vadd.f32 %v110_v45, %v109_v37 }
  0x44   :  { %v308_v1 = vadd.f32 %v307_v60, %v306_v6  ;;  %v386_v28 = vadd.f32 %v385_v55, %v384_v19  ;;  %v151_v57 = vmul.f32 %v48_v30, %v48_v30  ;;  %v347_v58 = vmul.f32 %v6512_v54, %v6512_v54 }
  0x45   :  { %v395_v59 = vsel %vm50_vm0, %v345_v40, 0.0  ;;  %v112_v60 = vsel %vm50_vm0, %v49_v29, 0.0  ;;  %v209_v61 = vadd.f32 %v208_v48, %v207_v41  ;;  %v210_v43 = vsel %vm50_vm0, %v150_v39, 0.0 }
  0x46   :  { %v310_v23 = vadd.f32 %v309_v5, %v308_v1  ;;  %v388_v33 = vadd.f32 %v387_v26, %v386_v28  ;;  %v317_v11 = vsel %vm50_vm0, %v5300_v52, 0.0  ;;  %v348_v56 = vmul.f32 %v6522_v62, %v6522_v62 }
  0x47   :  { %v397_v47 = vsel %vm50_vm0, %v346_v51, 0.0  ;;  %v113_v5 = vadd.f32 %v112_v60, %v111_v38  ;;  %v349_v54 = vmul.f32 %v6537_v15, %v6537_v15  ;;  %v399_v8 = vsel %vm50_vm0, %v347_v58, 0.0 }
  0x48   :  { %v312_v31 = vadd.f32 %v311_v16, %v310_v23  ;;  %v390_v24 = vadd.f32 %v389_v10, %v388_v33  ;;  %v152_v9 = vmul.f32 %v49_v29, %v49_v29  ;;  %v211_v13 = vadd.f32 %v210_v43, %v209_v61 }
  0x49   :  { %v212_v55 = vsel %vm50_vm0, %v151_v57, 0.0  ;;  %v350_v14 = vmul.f32 %v6547_v22, %v6547_v22  ;;  %v401_v62 = vsel %vm50_vm0, %v348_v56, 0.0  ;;  %v114_v19 = vrot.slane %v113_v5, 4 }
  0x4a   :  { %v314_v46 = vadd.f32 %v313_v32, %v312_v31  ;;  %v392_v53 = vadd.f32 %v391_v42, %v390_v24  ;;  %v351_v20 = vmul.f32 %v6562_v35, %v6562_v35  ;;  %v403_v15 = vsel %vm50_vm0, %v349_v54, 0.0 }
  0x4b   :  { %v213_v23 = vadd.f32 %v212_v55, %v211_v13  ;;  %v6155_v2 = vmov 512.0   ;;  %v214_v12 = vsel %vm50_vm0, %v152_v9, 0.0  ;;  %v352_v27 = vmul.f32 %v6572_v44, %v6572_v44 }
  0x4c   :  { %v316_v3 = vadd.f32 %v315_v50, %v314_v46  ;;  %v394_v6 = vadd.f32 %v393_v34, %v392_v53  ;;  %6151 = vrcp.f32 %v6155_v2  ;;  %v405_v22 = vsel %vm50_vm0, %v350_v14, 0.0 }
  0x4d   :  { %v353_v30 = vmul.f32 %v6587_v49, %v6587_v49  ;;  %v407_v35 = vsel %vm50_vm0, %v351_v20, 0.0  ;;  %v115_v31 = vadd.f32 %v114_v19, %v113_v5  ;;  %v215_v32 = vadd.f32 %v214_v12, %v213_v23 }
  0x4e   :  { %v396_v4 = vadd.f32 %v395_v59, %v394_v6  ;;  %v318_v1 = vadd.f32 %v317_v11, %v316_v3  ;;  %v354_v33 = vmul.f32 %v6597_v0, %v6597_v0  ;;  %v409_v37 = vsel %vm50_vm0, %v352_v27, 0.0 }
  0x4f   :  { %v355_v44 = vmul.f32 %v6615_v18, %v6615_v18  ;;  %v411_v42 = vsel %vm50_vm0, %v353_v30, 0.0  ;;  %v116_v45 = vrot.slane %v115_v31, 2  ;;  %v216_v49 = vrot.slane %v215_v32, 4 }
  0x50   :  { %v398_v17 = vadd.f32 %v397_v47, %v396_v4  ;;  %v319_v25 = vrot.slane %v318_v1, 4  ;;  %v356_v24 = vmul.f32 %v6635_v36, %v6635_v36  ;;  %v413_v29 = vsel %vm50_vm0, %v354_v33, 0.0 }
  0x51   :  { %v357_v50 = vmul.f32 %v5300_v52, %v5300_v52  ;;  %v415_v51 = vsel %vm50_vm0, %v355_v44, 0.0  ;;  %v117_v34 = vadd.f32 %v116_v45, %v115_v31  ;;  %v217_v53 = vadd.f32 %v216_v49, %v215_v32  ;;  %v439_v44 = vld [vmem:[%s8524_s1] sm:$0x1]  ;;  %v6092_v45 = vld [vmem:[%s8522_s3 + $0xb8] sm:$0xff] }
  0x52   :  { %v400_v16 = vadd.f32 %v399_v8, %v398_v17  ;;  %v320_v21 = vadd.f32 %v319_v25, %v318_v1  ;;  %v6152_v39 = vpop.eup %6151  ;;  %v417_v57 = vsel %vm50_vm0, %v356_v24, 0.0  ;;  %v6156_v19 = vmov 0.0   ;;  %1995 = vmatpush.bf16.msrb.mxu1 %v6092_v45 }
  0x53   :  { %v429_v48 = vmul.f32 512.0, %v6152_v39  ;;  %v419_v60 = vsel %vm50_vm0, %v357_v50, 0.0  ;;  %v118_v61 = vrot.slane %v117_v34, 1  ;;  %v218_v3 = vrot.slane %v217_v53, 2  ;;  %480 = vst.msk [vmem:[#allocation2 + $0xc0] sm:$0xff] %vm50_vm0, %v6156_v19 }
  0x54   :  { %v402_v26 = vadd.f32 %v401_v62, %v400_v16  ;;  %v321_v41 = vrot.slane %v320_v21, 2  ;;  %vm433_vm1 = vweird.f32 %v6152_v39  ;;  %481 = vst.msk [vmem:[#allocation2 + $0xc8] sm:$0xff] %vm50_vm0, %v6156_v19 }
  0x55   :  { %v430_v58 = vsub.f32 1.0, %v429_v48  ;;  %v119_v56 = vadd.f32 %v118_v61, %v117_v34  ;;  %v219_v52 = vadd.f32 %v218_v3, %v217_v53  ;;  %482 = vst.msk [vmem:[#allocation2 + $0xd0] sm:$0x3] %vm457_vm2, %v6156_v19  ;;  %v528_v61 = vld [vmem:[%s8523_s0 + $0x90] sm:$0xff] }
  0x56   :  { %v404_v28 = vadd.f32 %v403_v15, %v402_v26  ;;  %v322_v38 = vadd.f32 %v321_v41, %v320_v21  ;;  %455 = vst.msk [vmem:[#allocation2] sm:$0xff] %vm50_vm0, %v6156_v19 }
  0x57   :  { %v431_v43 = vmul.f32 %v6152_v39, %v430_v58  ;;  %v220_v8 = vrot.slane %v219_v52, 1  ;;  %456 = vst.msk [vmem:[#allocation2 + $0x8] sm:$0xff] %vm50_vm0, %v6156_v19 }
  0x58   :  { %v406_v10 = vadd.f32 %v405_v22, %v404_v28  ;;  %v323_v36 = vrot.slane %v322_v38, 1  ;;  %458 = vst.msk [vmem:[#allocation2 + $0x10] sm:$0x3] %vm457_vm2, %v6156_v19 }
  0x59   :  { %v432_v5 = vadd.f32 %v6152_v39, %v431_v43  ;;  %v221_v55 = vadd.f32 %v220_v8, %v219_v52  ;;  %459 = vst.msk [vmem:[#allocation2 + $0x18] sm:$0xff] %vm50_vm0, %v6156_v19  ;;  %v529_v43 = vld [vmem:[%s8523_s0 + $0x98] sm:$0xff] }
  0x5a   :  { %v408_v40 = vadd.f32 %v407_v35, %v406_v10  ;;  %v324_v47 = vadd.f32 %v323_v36, %v322_v38  ;;  %460 = vst.msk [vmem:[#allocation2 + $0x20] sm:$0xff] %vm50_vm0, %v6156_v19  ;;  %v526_v38 = vld [vmem:[%s8523_s0 + $0x80] sm:$0xff] }
  0x5b   :  { %v434_v1 = vsel %vm433_vm1, %v6152_v39, %v432_v5  ;;  %461 = vst.msk [vmem:[#allocation2 + $0x28] sm:$0x3] %vm457_vm2, %v6156_v19  ;;  %v6084_v39 = vld [vmem:[%s8522_s3 + $0x78] sm:$0xff] }
  0x5c   :  { %v410_v46 = vadd.f32 %v409_v37, %v408_v40  ;;  %v325_v9 = vadd.f32 %v324_v47, %v119_v56  ;;  %462 = vst.msk [vmem:[#allocation2 + $0x30] sm:$0xff] %vm50_vm0, %v6156_v19  ;;  %v6080_v37 = vld [vmem:[%s8522_s3 + $0x58] sm:$0xff]  ;;  %1495 = vmatpush.bf16.msrb.mxu3 %v6084_v39  ;;  %v512_v47 = vld [vmem:[%s8523_s0 + $0x10] sm:$0xff] }
  0x5d   :  { %463 = vst.msk [vmem:[#allocation2 + $0x38] sm:$0xff] %vm50_vm0, %v6156_v19  ;;  %v677_v35 = vld [vmem:[#allocation2] sm:$0xff]  ;;  %v6088_v40 = vld [vmem:[%s8522_s3 + $0x98] sm:$0xff]  ;;  %1245 = vmatpush.bf16.msrb.mxu2 %v6080_v37 }
  0x5e   :  { %v412_v0 = vadd.f32 %v411_v42, %v410_v46  ;;  %v6691_v62 = vmul.f32 %v434_v1, %v325_v9  ;;  %464 = vst.msk [vmem:[#allocation2 + $0x40] sm:$0x3] %vm457_vm2, %v6156_v19  ;;  %v733_v27 = vld [vmem:[#allocation2 + $0x1] sm:$0xff]  ;;  %1745 = vmatpush.bf16.msrb.mxu0 %v6088_v40  ;;  %v452_v46 = vld [vmem:[%s8525_s2] sm:$0x1]  ;;  %v513_v9 = vld [vmem:[%s8523_s0 + $0x18] sm:$0xff] }
  0x5f   :  { %465 = vst.msk [vmem:[#allocation2 + $0x48] sm:$0xff] %vm50_vm0, %v6156_v19  ;;  %v734_v22 = vld [vmem:[#allocation2 + $0x9] sm:$0xff] }
  0x60   :  { %v414_v18 = vadd.f32 %v413_v29, %v412_v0  ;;  %v437_v15 = vmul.f32 %v6691_v62, %v6691_v62  ;;  %466 = vst.msk [vmem:[#allocation2 + $0x50] sm:$0xff] %vm50_vm0, %v6156_v19  ;;  %v765_v30 = vpack.c.bf16 %v734_v22, %v733_v27  ;;  %v678_v31 = vld [vmem:[#allocation2 + $0x8] sm:$0xff] }
  0x61   :  { %467 = vst.msk [vmem:[#allocation2 + $0x58] sm:$0x3] %vm457_vm2, %v6156_v19  ;;  %v709_v32 = vpack.c.bf16 %v678_v31, %v677_v35  ;;  %v6091_v35 = vld [vmem:[%s8522_s3 + $0xb0] sm:$0xff] }
  0x62   :  { %v416_v59 = vadd.f32 %v415_v51, %v414_v18  ;;  %468 = vst.msk [vmem:[#allocation2 + $0x60] sm:$0xff] %vm50_vm0, %v6156_v19  ;;  %5325 = vmatmul.msk.bf16.vlgmr.msra.gmra.mxu0 %vm50_vm0, %v765_v30  ;;  %v527_v18 = vld [vmem:[%s8523_s0 + $0x88] sm:$0xff]  ;;  %v6087_v30 = vld [vmem:[%s8522_s3 + $0x90] sm:$0xff]  ;;  %1996 = vmatpush.bf16.msrb.mxu1 %v6091_v35 }
  0x63   :  { %469 = vst.msk [vmem:[#allocation2 + $0x68] sm:$0xff] %vm50_vm0, %v6156_v19  ;;  %5357 = vmatmul.msk.bf16.vlgmr.msra.gmra.mxu1 %vm50_vm0, %v709_v32  ;;  %1746 = vmatpush.bf16.msrb.mxu0 %v6087_v30  ;;  %v535_v30 = vld [vmem:[%s8523_s0 + $0xc8] sm:$0xff] }
  0x64   :  { %v418_v6 = vadd.f32 %v417_v57, %v416_v59  ;;  %470 = vst.msk [vmem:[#allocation2 + $0x70] sm:$0x3] %vm457_vm2, %v6156_v19  ;;  %v510_v57 = vld [vmem:[%s8523_s0] sm:$0xff]  ;;  %v511_v59 = vld [vmem:[%s8523_s0 + $0x8] sm:$0xff] }
  0x65   :  { %471 = vst.msk [vmem:[#allocation2 + $0x78] sm:$0xff] %vm50_vm0, %v6156_v19  ;;  %v6078_v35 = vld [vmem:[%s8522_s3 + $0x48] sm:$0xff] }
  0x66   :  { %v420_v11 = vadd.f32 %v419_v60, %v418_v6  ;;  %472 = vst.msk [vmem:[#allocation2 + $0x80] sm:$0xff] %vm50_vm0, %v6156_v19 }
  0x67   :  { %473 = vst.msk [vmem:[#allocation2 + $0x88] sm:$0x3] %vm457_vm2, %v6156_v19 }
  0x68   :  { %v421_v4 = vrot.slane %v420_v11, 4  ;;  %474 = vst.msk [vmem:[#allocation2 + $0x90] sm:$0xff] %vm50_vm0, %v6156_v19 }
  0x69   :  { %475 = vst.msk [vmem:[#allocation2 + $0x98] sm:$0xff] %vm50_vm0, %v6156_v19 }
  0x6a   :  { %v422_v54 = vadd.f32 %v421_v4, %v420_v11  ;;  %476 = vst.msk [vmem:[#allocation2 + $0xa0] sm:$0x3] %vm457_vm2, %v6156_v19 }
  0x6b   :  { %477 = vst.msk [vmem:[#allocation2 + $0xa8] sm:$0xff] %vm50_vm0, %v6156_v19 }
  0x6c   :  { %v423_v13 = vrot.slane %v422_v54, 2  ;;  %478 = vst.msk [vmem:[#allocation2 + $0xb0] sm:$0xff] %vm50_vm0, %v6156_v19 }
  0x6d   :  { %479 = vst.msk [vmem:[#allocation2 + $0xb8] sm:$0x3] %vm457_vm2, %v6156_v19 }
  0x6e   :  { %v424_v17 = vadd.f32 %v423_v13, %v422_v54  ;;  %483 = vst.msk [vmem:[#allocation2 + $0xd8] sm:$0xff] %vm50_vm0, %v6156_v19 }
  0x6f   :  { %484 = vst.msk [vmem:[#allocation2 + $0xe0] sm:$0xff] %vm50_vm0, %v6156_v19 }
  0x70   :  { %v425_v14 = vrot.slane %v424_v17, 1  ;;  %485 = vst.msk [vmem:[#allocation2 + $0xe8] sm:$0x3] %vm457_vm2, %v6156_v19 }
  0x71   :  { %486 = vst.msk [vmem:[#allocation2 + $0xf0] sm:$0xff] %vm50_vm0, %v6156_v19 }
  0x72   :  { %v426_v16 = vadd.f32 %v425_v14, %v424_v17  ;;  %487 = vst.msk [vmem:[#allocation2 + $0xf8] sm:$0xff] %vm50_vm0, %v6156_v19  ;;  %v530_v14 = vld [vmem:[%s8523_s0 + $0xa0] sm:$0xff] }
  0x73   :  { %488 = vst.msk [vmem:[#allocation2 + $0x100] sm:$0x3] %vm457_vm2, %v6156_v19 }
  0x74   :  { %v427_v20 = vadd.f32 %v426_v16, %v221_v55  ;;  %489 = vst.msk [vmem:[#allocation2 + $0x108] sm:$0xff] %vm50_vm0, %v6156_v19 }
  0x75   :  { %490 = vst.msk [vmem:[#allocation2 + $0x110] sm:$0xff] %vm50_vm0, %v6156_v19 }
  0x76   :  { %v436_v23 = vmul.f32 %v434_v1, %v427_v20  ;;  %491 = vst.msk [vmem:[#allocation2 + $0x118] sm:$0x3] %vm457_vm2, %v6156_v19  ;;  %v6079_v20 = vld [vmem:[%s8522_s3 + $0x50] sm:$0xff] }
  0x77   :  { %492 = vst.msk [vmem:[#allocation2 + $0x120] sm:$0xff] %vm50_vm0, %v6156_v19  ;;  %1246 = vmatpush.bf16.msrb.mxu2 %v6079_v20 }
  0x78   :  { %v438_v25 = vsub.f32 %v436_v23, %v437_v15  ;;  %493 = vst.msk [vmem:[#allocation2 + $0x128] sm:$0xff] %vm50_vm0, %v6156_v19 }
  0x79   :  { %494 = vst.msk [vmem:[#allocation2 + $0x130] sm:$0x3] %vm457_vm2, %v6156_v19 }
  0x7a   :  { %v440_v26 = vadd.f32 0.001, %v438_v25  ;;  %495 = vst.msk [vmem:[#allocation2 + $0x138] sm:$0xff] %vm50_vm0, %v6156_v19 }
  0x7b   :  { %496 = vst.msk [vmem:[#allocation2 + $0x140] sm:$0xff] %vm50_vm0, %v6156_v19  ;;  %1247 = vmatpush.bf16.msrb.mxu2 %v6078_v35  ;;  %v538_v35 = vld [vmem:[%s8523_s0 + $0xe0] sm:$0xff] }
  0x7c   :  { %6153 = vrsqrt.f32 %v440_v26  ;;  %vm447_vm3 = vweird.f32 %v440_v26  ;;  %497 = vst.msk [vmem:[#allocation2 + $0x148] sm:$0x3] %vm457_vm2, %v6156_v19 }
  0x7d   :  { %498 = vst.msk [vmem:[#allocation2 + $0x150] sm:$0xff] %vm50_vm0, %v6156_v19 }
  0x7e   :  { %499 = vst.msk [vmem:[#allocation2 + $0x158] sm:$0xff] %vm50_vm0, %v6156_v19 }
  0x7f   :  { %500 = vst.msk [vmem:[#allocation2 + $0x160] sm:$0x3] %vm457_vm2, %v6156_v19 }
  0x80   :  { %501 = vst.msk [vmem:[#allocation2 + $0x168] sm:$0xff] %vm50_vm0, %v6156_v19 }
  0x81   :  { %502 = vst.msk [vmem:[#allocation2 + $0x170] sm:$0xff] %vm50_vm0, %v6156_v19 }
  0x82   :  { %v6154_v2 = vpop.eup %6153  ;;  %503 = vst.msk [vmem:[#allocation2 + $0x178] sm:$0x3] %vm457_vm2, %v6156_v19 }
  0x83   :  { %v442_v12 = vmul.f32 %v6154_v2, %v440_v26  ;;  %vm448_vm4 = vweird.f32 %v6154_v2  ;;  %504 = vst.msk [vmem:[#allocation2 + $0x180] sm:$0xff] %vm50_vm0, %v6156_v19 }
  0x84   :  { %vm6741_vm5 = vmor %vm447_vm3, %vm448_vm4  ;;  %505 = vst.msk [vmem:[#allocation2 + $0x188] sm:$0xff] %vm50_vm0, %v6156_v19 }
  0x85   :  { %v443_v28 = vmul.f32 %v6154_v2, %v442_v12  ;;  %506 = vst.msk [vmem:[#allocation2 + $0x190] sm:$0x3] %vm457_vm2, %v6156_v19  ;;  %v515_v12 = vld [vmem:[%s8523_s0 + $0x28] sm:$0xff] }
  0x86   :  { %507 = vst.msk [vmem:[#allocation2 + $0x198] sm:$0xff] %vm50_vm0, %v6156_v19 }
  0x87   :  { %v444_v21 = vmul.f32 0.5, %v443_v28  ;;  %v6083_v28 = vld [vmem:[%s8522_s3 + $0x70] sm:$0xff]  ;;  %508 = vst.msk [vmem:[#allocation2 + $0x1a0] sm:$0xff] %vm50_vm0, %v6156_v19 }
  0x88   :  { %509 = vst.msk [vmem:[#allocation2 + $0x1a8] sm:$0x3] %vm457_vm2, %v6156_v19  ;;  %1496 = vmatpush.bf16.msrb.mxu3 %v6083_v28  ;;  %v534_v28 = vld [vmem:[%s8523_s0 + $0xc0] sm:$0xff] }
  0x89   :  { %v445_v10 = vsub.f32 1.5, %v444_v21 }
  0x8b   :  { %v446_v42 = vmul.f32 %v6154_v2, %v445_v10 }
  0x8d   :  { %v450_v49 = vsel %vm6741_vm5, %v6154_v2, %v446_v42  ;;  %v514_v2 = vld [vmem:[%s8523_s0 + $0x20] sm:$0xff] }
  0x8e   :  { %v451_v41 = vmul.f32 %v450_v49, %v439_v44 }
  0x90   :  { %v453_v24 = vmul.f32 %v451_v41, %v6691_v62  ;;  %v6780_v29 = vperm.slane %v451_v41, 0  ;;  %v531_v62 = vld [vmem:[%s8523_s0 + $0xa8] sm:$0xff] }
  0x92   :  { %v454_v48 = vsub.f32 %v452_v46, %v453_v24  ;;  %v559_v0 = vmul.f32 %v6780_v29, %v6270_v63  ;;  %v560_v50 = vmul.f32 %v6780_v29, %v6287_v7  ;;  %v561_v58 = vmul.f32 %v6780_v29, %v526_v38 }
  0x93   :  { %v562_v60 = vmul.f32 %v6780_v29, %v527_v18  ;;  %v545_v6 = vmul.f32 %v6780_v29, %v510_v57  ;;  %v546_v52 = vmul.f32 %v6780_v29, %v511_v59  ;;  %v563_v8 = vmul.f32 %v6780_v29, %v528_v61  ;;  %v532_v61 = vld [vmem:[%s8523_s0 + $0xb0] sm:$0xff] }
  0x94   :  { %v6794_v51 = vperm.slane %v454_v48, 0  ;;  %v564_v1 = vmul.f32 %v6780_v29, %v529_v43  ;;  %v547_v55 = vmul.f32 %v6780_v29, %v512_v47  ;;  %v548_v15 = vmul.f32 %v6780_v29, %v513_v9  ;;  %v517_v47 = vld [vmem:[%s8523_s0 + $0x38] sm:$0xff] }
  0x95   :  { %v565_v26 = vmul.f32 %v6780_v29, %v530_v14  ;;  %v566_v31 = vmul.f32 %v6780_v29, %v531_v62  ;;  %v549_v10 = vmul.f32 %v6780_v29, %v514_v2  ;;  %v550_v39 = vmul.f32 %v6780_v29, %v515_v12 }
  0x96   :  { %v594_v34 = vadd.f32 %v6794_v51, %v559_v0  ;;  %v595_v63 = vadd.f32 %v6794_v51, %v560_v50  ;;  %v596_v54 = vadd.f32 %v6794_v51, %v561_v58  ;;  %v597_v13 = vadd.f32 %v6794_v51, %v562_v60 }
  0x97   :  { %v580_v17 = vadd.f32 %v6794_v51, %v545_v6  ;;  %v581_v16 = vadd.f32 %v6794_v51, %v546_v52  ;;  %v598_v25 = vadd.f32 %v6794_v51, %v563_v8  ;;  %v599_v22 = vadd.f32 %v6794_v51, %v564_v1  ;;  %v533_v6 = vld [vmem:[%s8523_s0 + $0xb8] sm:$0xff] }
  0x98   :  { %v626_v7 = vmax.f32 %v594_v34, 0.0  ;;  %v627_v53 = vmax.f32 %v595_v63, 0.0  ;;  %v628_v23 = vmax.f32 %v596_v54, 0.0  ;;  %v629_v27 = vmax.f32 %v597_v13, 0.0 }
  0x99   :  { %v612_v32 = vmax.f32 %v580_v17, 0.0  ;;  %v582_v21 = vadd.f32 %v6794_v51, %v547_v55  ;;  %v613_v33 = vmax.f32 %v581_v16, 0.0  ;;  %v583_v37 = vadd.f32 %v6794_v51, %v548_v15 }
  0x9a   :  { %659 = vst.msk [vmem:[#allocation2 + $0xc1] sm:$0xff] %vm50_vm0, %v626_v7  ;;  %v630_v40 = vmax.f32 %v598_v25, 0.0  ;;  %v600_v44 = vadd.f32 %v6794_v51, %v565_v26  ;;  %v631_v42 = vmax.f32 %v599_v22, 0.0  ;;  %v601_v45 = vadd.f32 %v6794_v51, %v566_v31 }
  0x9b   :  { %660 = vst.msk [vmem:[#allocation2 + $0xc9] sm:$0xff] %vm50_vm0, %v627_v53  ;;  %v614_v19 = vmax.f32 %v582_v21, 0.0  ;;  %v584_v49 = vadd.f32 %v6794_v51, %v549_v10  ;;  %v615_v41 = vmax.f32 %v583_v37, 0.0  ;;  %v585_v46 = vadd.f32 %v6794_v51, %v550_v39  ;;  %v518_v21 = vld [vmem:[%s8523_s0 + $0x40] sm:$0xff]  ;;  %v6082_v10 = vld [vmem:[%s8522_s3 + $0x68] sm:$0xff] }
  0x9c   :  { %661 = vst.msk [vmem:[#allocation2 + $0xd9] sm:$0xff] %vm50_vm0, %v628_v23  ;;  %v632_v24 = vmax.f32 %v600_v44, 0.0  ;;  %v633_v48 = vmax.f32 %v601_v45, 0.0  ;;  %v567_v43 = vmul.f32 %v6780_v29, %v532_v61  ;;  %v552_v54 = vmul.f32 %v6780_v29, %v517_v47  ;;  %v6090_v37 = vld [vmem:[%s8522_s3 + $0xa8] sm:$0xff]  ;;  %1497 = vmatpush.bf16.msrb.mxu3 %v6082_v10  ;;  %v536_v61 = vld [vmem:[%s8523_s0 + $0xd0] sm:$0xff]  ;;  %v521_v47 = vld [vmem:[%s8523_s0 + $0x58] sm:$0xff] }
  0x9d   :  { %662 = vst.msk [vmem:[#allocation2 + $0xe1] sm:$0xff] %vm50_vm0, %v629_v27  ;;  %v616_v0 = vmax.f32 %v584_v49, 0.0  ;;  %v617_v63 = vmax.f32 %v585_v46, 0.0  ;;  %v569_v31 = vmul.f32 %v6780_v29, %v534_v28  ;;  %v519_v44 = vld [vmem:[%s8523_s0 + $0x48] sm:$0xff]  ;;  %1997 = vmatpush.bf16.msrb.mxu1 %v6090_v37  ;;  %v6081_v37 = vld [vmem:[%s8522_s3 + $0x60] sm:$0xff] }
  0x9e   :  { %645 = vst.msk [vmem:[#allocation2 + $0x19] sm:$0xff] %vm50_vm0, %v612_v32  ;;  %v602_v52 = vadd.f32 %v6794_v51, %v567_v43  ;;  %v587_v1 = vadd.f32 %v6794_v51, %v552_v54  ;;  %v570_v32 = vmul.f32 %v6780_v29, %v535_v30  ;;  %v571_v43 = vmul.f32 %v6780_v29, %v536_v61 }
  0x9f   :  { %646 = vst.msk [vmem:[#allocation2 + $0x21] sm:$0xff] %vm50_vm0, %v613_v33  ;;  %v6086_v33 = vld [vmem:[%s8522_s3 + $0x88] sm:$0xff]  ;;  %v604_v39 = vadd.f32 %v6794_v51, %v569_v31  ;;  %v556_v54 = vmul.f32 %v6780_v29, %v521_v47 }
  0xa0   :  { %663 = vst.msk [vmem:[#allocation2 + $0xf1] sm:$0xff] %vm50_vm0, %v630_v40  ;;  %v634_v8 = vmax.f32 %v602_v52, 0.0  ;;  %v619_v55 = vmax.f32 %v587_v1, 0.0  ;;  %v605_v40 = vadd.f32 %v6794_v51, %v570_v32  ;;  %1747 = vmatpush.bf16.msrb.mxu0 %v6086_v33  ;;  %v606_v52 = vadd.f32 %v6794_v51, %v571_v43  ;;  %v539_v31 = vld [vmem:[%s8523_s0 + $0xe8] sm:$0xff]  ;;  %v6077_v32 = vld [vmem:[%s8522_s3 + $0x40] sm:$0xff]  ;;  %1498 = vmatpush.bf16.msrb.mxu3 %v6081_v37 }
  0xa1   :  { %v749_v3 = vld [vmem:[#allocation2 + $0xc1] sm:$0xff]  ;;  %664 = vst.msk [vmem:[#allocation2 + $0xf9] sm:$0xff] %vm50_vm0, %v631_v42  ;;  %v553_v42 = vmul.f32 %v6780_v29, %v518_v21  ;;  %v636_v45 = vmax.f32 %v604_v39, 0.0  ;;  %v591_v1 = vadd.f32 %v6794_v51, %v556_v54  ;;  %v573_v21 = vmul.f32 %v6780_v29, %v538_v35  ;;  %1248 = vmatpush.bf16.msrb.mxu2 %v6077_v32 }
  0xa2   :  { %v693_v36 = vld [vmem:[#allocation2 + $0xc0] sm:$0xff]  ;;  %v750_v11 = vld [vmem:[#allocation2 + $0xc9] sm:$0xff]  ;;  %647 = vst.msk [vmem:[#allocation2 + $0x31] sm:$0xff] %vm50_vm0, %v614_v19  ;;  %v554_v19 = vmul.f32 %v6780_v29, %v519_v44  ;;  %v637_v49 = vmax.f32 %v605_v40, 0.0  ;;  %v574_v10 = vmul.f32 %v6780_v29, %v539_v31 }
  0xa3   :  { %v694_v56 = vld [vmem:[#allocation2 + $0xc8] sm:$0xff]  ;;  %v773_v4 = vpack.c.bf16 %v750_v11, %v749_v3  ;;  %v751_v50 = vld [vmem:[#allocation2 + $0xd9] sm:$0xff]  ;;  %648 = vst.msk [vmem:[#allocation2 + $0x39] sm:$0xff] %vm50_vm0, %v615_v41  ;;  %v568_v11 = vmul.f32 %v6780_v29, %v533_v6  ;;  %v588_v41 = vadd.f32 %v6794_v51, %v553_v42  ;;  %v608_v44 = vadd.f32 %v6794_v51, %v573_v21 }
  0xa4   :  { %v717_v5 = vpack.c.bf16 %v694_v56, %v693_v36  ;;  %v695_v34 = vld [vmem:[#allocation2 + $0xd8] sm:$0xff]  ;;  %v752_v7 = vld [vmem:[#allocation2 + $0xe1] sm:$0xff]  ;;  %665 = vst.msk [vmem:[#allocation2 + $0x109] sm:$0xff] %vm50_vm0, %v632_v24  ;;  %v516_v56 = vld [vmem:[%s8523_s0 + $0x30] sm:$0xff]  ;;  %v589_v46 = vadd.f32 %v6794_v51, %v554_v19  ;;  %v609_v42 = vadd.f32 %v6794_v51, %v574_v10 }
  0xa5   :  { %5333 = vmatmul.msk.bf16.vlgmr.msra.gmra.mxu2 %vm50_vm0, %v773_v4  ;;  %v696_v53 = vld [vmem:[#allocation2 + $0xe0] sm:$0xff]  ;;  %v774_v38 = vpack.c.bf16 %v752_v7, %v751_v50  ;;  %v679_v58 = vld [vmem:[#allocation2 + $0x18] sm:$0xff]  ;;  %666 = vst.msk [vmem:[#allocation2 + $0x111] sm:$0xff] %vm50_vm0, %v633_v48  ;;  %v603_v4 = vadd.f32 %v6794_v51, %v568_v11  ;;  %v620_v24 = vmax.f32 %v588_v41, 0.0 }
  0xa6   :  { %5365 = vmatmul.msk.bf16.vlgmr.msra.gmra.mxu3 %vm50_vm0, %v717_v5  ;;  %v718_v18 = vpack.c.bf16 %v696_v53, %v695_v34  ;;  %v735_v57 = vld [vmem:[#allocation2 + $0x19] sm:$0xff]  ;;  %v736_v59 = vld [vmem:[#allocation2 + $0x21] sm:$0xff]  ;;  %649 = vst.msk [vmem:[#allocation2 + $0x49] sm:$0xff] %vm50_vm0, %v616_v0  ;;  %v551_v5 = vmul.f32 %v6780_v29, %v516_v56  ;;  %v621_v0 = vmax.f32 %v589_v46, 0.0  ;;  %v520_v56 = vld [vmem:[%s8523_s0 + $0x50] sm:$0xff]  ;;  %v641_v46 = vmax.f32 %v609_v42, 0.0 }
  0xa7   :  { %v680_v60 = vld [vmem:[#allocation2 + $0x20] sm:$0xff]  ;;  %v6932_v3 = vpack.c.bf16 %v736_v59, %v735_v57  ;;  %650 = vst.msk [vmem:[#allocation2 + $0x51] sm:$0xff] %vm50_vm0, %v617_v63  ;;  %v635_v9 = vmax.f32 %v603_v4, 0.0  ;;  %v753_v14 = vld [vmem:[#allocation2 + $0xf1] sm:$0xff]  ;;  %v5654_v42 = vld [vmem:[%s8523_s0 + $0x108] sm:$0xff] }
  0xa8   :  { %v6934_v36 = vpack.c.bf16 %v680_v60, %v679_v58  ;;  %v586_v13 = vadd.f32 %v6794_v51, %v551_v5  ;;  %667 = vst.msk [vmem:[#allocation2 + $0x121] sm:$0xff] %vm50_vm0, %v634_v8  ;;  %v754_v62 = vld [vmem:[#allocation2 + $0xf9] sm:$0xff]  ;;  %v697_v16 = vld [vmem:[#allocation2 + $0xf0] sm:$0xff]  ;;  %v555_v5 = vmul.f32 %v6780_v29, %v520_v56  ;;  %v638_v8 = vmax.f32 %v606_v52, 0.0 }
  0xa9   :  { %5326 = vmatmul.msk.bf16.gmra.mxu0 %vm50_vm0, %v6932_v3  ;;  %668 = vst.msk [vmem:[#allocation2 + $0x129] sm:$0xff] %vm50_vm0, %v635_v9  ;;  %v698_v20 = vld [vmem:[#allocation2 + $0xf8] sm:$0xff]  ;;  %v681_v25 = vld [vmem:[#allocation2 + $0x30] sm:$0xff]  ;;  %v775_v2 = vpack.c.bf16 %v754_v62, %v753_v14  ;;  %v522_v33 = vld [vmem:[%s8523_s0 + $0x60] sm:$0xff] }
  0xaa   :  { %5358 = vmatmul.msk.bf16.gmra.mxu1 %vm50_vm0, %v6934_v36  ;;  %v618_v17 = vmax.f32 %v586_v13, 0.0  ;;  %v737_v15 = vld [vmem:[#allocation2 + $0x31] sm:$0xff]  ;;  %652 = vst.msk [vmem:[#allocation2 + $0x69] sm:$0xff] %vm50_vm0, %v619_v55  ;;  %v738_v23 = vld [vmem:[#allocation2 + $0x39] sm:$0xff]  ;;  %v719_v12 = vpack.c.bf16 %v698_v20, %v697_v16  ;;  %v590_v13 = vadd.f32 %v6794_v51, %v555_v5  ;;  %v623_v55 = vmax.f32 %v591_v1, 0.0 }
  0xab   :  { %v682_v26 = vld [vmem:[#allocation2 + $0x38] sm:$0xff]  ;;  %v6962_v27 = vpack.c.bf16 %v738_v23, %v737_v15  ;;  %669 = vst.msk [vmem:[#allocation2 + $0x139] sm:$0xff] %vm50_vm0, %v636_v45  ;;  %v755_v48 = vld [vmem:[#allocation2 + $0x109] sm:$0xff]  ;;  %v6085_v39 = vld [vmem:[%s8522_s3 + $0x80] sm:$0xff]  ;;  %v557_v19 = vmul.f32 %v6780_v29, %v522_v33 }
  0xac   :  { %651 = vst.msk [vmem:[#allocation2 + $0x61] sm:$0xff] %vm50_vm0, %v618_v17  ;;  %v6964_v22 = vpack.c.bf16 %v682_v26, %v681_v25  ;;  %v756_v50 = vld [vmem:[#allocation2 + $0x111] sm:$0xff]  ;;  %v699_v34 = vld [vmem:[#allocation2 + $0x108] sm:$0xff]  ;;  %v622_v17 = vmax.f32 %v590_v13, 0.0  ;;  %v6089_v40 = vld [vmem:[%s8522_s3 + $0xa0] sm:$0xff]  ;;  %1748 = vmatpush.bf16.msrb.mxu0 %v6085_v39 }
  0xad   :  { %670 = vst.msk [vmem:[#allocation2 + $0x141] sm:$0xff] %vm50_vm0, %v637_v49  ;;  %v700_v63 = vld [vmem:[#allocation2 + $0x110] sm:$0xff]  ;;  %v776_v57 = vpack.c.bf16 %v756_v50, %v755_v48  ;;  %v537_v6 = vld [vmem:[%s8523_s0 + $0xd8] sm:$0xff]  ;;  %v523_v45 = vld [vmem:[%s8523_s0 + $0x68] sm:$0xff]  ;;  %v640_v49 = vmax.f32 %v608_v44, 0.0  ;;  %1998 = vmatpush.bf16.msrb.mxu1 %v6089_v40 }
  0xae   :  { %653 = vst.msk [vmem:[#allocation2 + $0x79] sm:$0xff] %vm50_vm0, %v620_v24  ;;  %v739_v7 = vld [vmem:[#allocation2 + $0x49] sm:$0xff]  ;;  %v740_v53 = vld [vmem:[#allocation2 + $0x51] sm:$0xff]  ;;  %v720_v58 = vpack.c.bf16 %v700_v63, %v699_v34  ;;  %v572_v11 = vmul.f32 %v6780_v29, %v537_v6  ;;  %v558_v41 = vmul.f32 %v6780_v29, %v523_v45  ;;  %v592_v24 = vadd.f32 %v6794_v51, %v557_v19  ;;  %v5653_v44 = vld [vmem:[%s8523_s0 + $0x100] sm:$0xff] }
  0xaf   :  { %654 = vst.msk [vmem:[#allocation2 + $0x81] sm:$0xff] %vm50_vm0, %v621_v0  ;;  %v7008_v59 = vpack.c.bf16 %v740_v53, %v739_v7  ;;  %v757_v14 = vld [vmem:[#allocation2 + $0x121] sm:$0xff]  ;;  %v6112_v10 = vld [vmem:[%s8522_s3 + $0x38] sm:$0xff]  ;;  %v2927_v45 = vmul.f32 %v5653_v44, %v6780_v29  ;;  %v2928_v19 = vmul.f32 %v5654_v42, %v6780_v29 }
  0xb0   :  { %v607_v4 = vadd.f32 %v6794_v51, %v572_v11  ;;  %671 = vst.msk [vmem:[#allocation2 + $0x151] sm:$0xff] %vm50_vm0, %v638_v8  ;;  %v758_v62 = vld [vmem:[#allocation2 + $0x129] sm:$0xff]  ;;  %v701_v16 = vld [vmem:[#allocation2 + $0x120] sm:$0xff]  ;;  %v593_v48 = vadd.f32 %v6794_v51, %v558_v41  ;;  %v624_v0 = vmax.f32 %v592_v24, 0.0 }
  0xb1   :  { %v702_v20 = vld [vmem:[#allocation2 + $0x128] sm:$0xff]  ;;  %655 = vst.msk [vmem:[#allocation2 + $0x91] sm:$0xff] %vm50_vm0, %v622_v17  ;;  %3243 = vmatpush.bf16.msra.mxu1 %v6112_v10  ;;  %v2960_v41 = vadd.f32 %v2928_v19, %v6794_v51 }
  0xb2   :  { %v639_v9 = vmax.f32 %v607_v4, 0.0  ;;  %656 = vst.msk [vmem:[#allocation2 + $0x99] sm:$0xff] %vm50_vm0, %v623_v55  ;;  %v742_v23 = vld [vmem:[#allocation2 + $0x69] sm:$0xff]  ;;  %v759_v50 = vld [vmem:[#allocation2 + $0x139] sm:$0xff]  ;;  %v625_v34 = vmax.f32 %v593_v48, 0.0 }
  0xb3   :  { %v741_v15 = vld [vmem:[#allocation2 + $0x61] sm:$0xff]  ;;  %673 = vst.msk [vmem:[#allocation2 + $0x169] sm:$0xff] %vm50_vm0, %v640_v49  ;;  %v703_v7 = vld [vmem:[#allocation2 + $0x138] sm:$0xff]  ;;  %v2959_v49 = vadd.f32 %v2927_v45, %v6794_v51  ;;  %v2992_v24 = vmax.f32 %v2960_v41, 0.0  ;;  %v1869_v19 = vld [vmem:[#allocation2 + $0x6a] sm:$0xff] }
  0xb4   :  { %672 = vst.msk [vmem:[#allocation2 + $0x159] sm:$0xff] %vm50_vm0, %v639_v9  ;;  %v685_v25 = vld [vmem:[#allocation2 + $0x60] sm:$0xff]  ;;  %v686_v26 = vld [vmem:[#allocation2 + $0x68] sm:$0xff]  ;;  %v7042_v28 = vpack.c.bf16 %v742_v23, %v741_v15  ;;  %v6100_v15 = vld [vmem:[%s8522_s3 + $0xf8] sm:$0xff] }
  0xb5   :  { %5334 = vmatmul.msk.bf16.gmra.mxu2 %vm50_vm0, %v774_v38  ;;  %v683_v38 = vld [vmem:[#allocation2 + $0x48] sm:$0xff]  ;;  %v7044_v30 = vpack.c.bf16 %v686_v26, %v685_v25  ;;  %674 = vst.msk [vmem:[#allocation2 + $0x171] sm:$0xff] %vm50_vm0, %v641_v46  ;;  %v704_v53 = vld [vmem:[#allocation2 + $0x140] sm:$0xff]  ;;  %v6104_v23 = vld [vmem:[%s8522_s3 + $0x118] sm:$0xff]  ;;  %2496 = vmatpush.bf16.msra.mxu3 %v6100_v15  ;;  %v2991_v46 = vmax.f32 %v2959_v49, 0.0 }
  0xb6   :  { %5366 = vmatmul.msk.bf16.gmra.mxu3 %vm50_vm0, %v718_v18  ;;  %v684_v18 = vld [vmem:[#allocation2 + $0x50] sm:$0xff]  ;;  %v760_v63 = vld [vmem:[#allocation2 + $0x141] sm:$0xff]  ;;  %657 = vst.msk [vmem:[#allocation2 + $0xa9] sm:$0xff] %vm50_vm0, %v624_v0  ;;  %v722_v6 = vpack.c.bf16 %v704_v53, %v703_v7  ;;  %2746 = vmatpush.bf16.msra.mxu0 %v6104_v23 }
  0xb7   :  { %v7010_v60 = vpack.c.bf16 %v684_v18, %v683_v38  ;;  %v743_v38 = vld [vmem:[#allocation2 + $0x79] sm:$0xff]  ;;  %658 = vst.msk [vmem:[#allocation2 + $0xb1] sm:$0xff] %vm50_vm0, %v625_v34  ;;  %v744_v18 = vld [vmem:[#allocation2 + $0x81] sm:$0xff]  ;;  %v778_v61 = vpack.c.bf16 %v760_v63, %v759_v50  ;;  %v761_v56 = vld [vmem:[#allocation2 + $0x151] sm:$0xff] }
  0xb8   :  { %v7088_v43 = vpack.c.bf16 %v744_v18, %v743_v38  ;;  %v705_v47 = vld [vmem:[#allocation2 + $0x150] sm:$0xff]  ;;  %v1862_v48 = vld [vmem:[#allocation2 + $0x1a] sm:$0xff]  ;;  %v1863_v0 = vld [vmem:[#allocation2 + $0x22] sm:$0xff] }
  0xb9   :  { %5327 = vmatmul.msk.bf16.gmra.mxu0 %vm50_vm0, %v6962_v27  ;;  %v745_v5 = vld [vmem:[#allocation2 + $0x91] sm:$0xff]  ;;  %v746_v54 = vld [vmem:[#allocation2 + $0x99] sm:$0xff]  ;;  %3023 = vst.msk [vmem:[#allocation2 + $0x19] sm:$0xff] %vm50_vm0, %v2991_v46  ;;  %v1112_v50 = vld [vmem:[#allocation2 + $0x2] sm:$0xff]  ;;  %v1894_v7 = vpack.c.bf16 %v1863_v0, %v1862_v48 }
  0xba   :  { %5359 = vmatmul.msk.bf16.gmra.mxu1 %vm50_vm0, %v6964_v22  ;;  %v689_v8 = vld [vmem:[#allocation2 + $0x90] sm:$0xff]  ;;  %v690_v9 = vld [vmem:[#allocation2 + $0x98] sm:$0xff]  ;;  %v7098_v17 = vpack.c.bf16 %v746_v54, %v745_v5  ;;  %3024 = vst.msk [vmem:[#allocation2 + $0x21] sm:$0xff] %vm50_vm0, %v2992_v24  ;;  %v1868_v45 = vld [vmem:[#allocation2 + $0x62] sm:$0xff] }
  0xbb   :  { %v762_v52 = vld [vmem:[#allocation2 + $0x159] sm:$0xff]  ;;  %v7100_v55 = vpack.c.bf16 %v690_v9, %v689_v8  ;;  %v763_v25 = vld [vmem:[#allocation2 + $0x169] sm:$0xff]  ;;  %v7208_v46 = vpack.c.bf16 %v1869_v19, %v1868_v45 }
  0xbc   :  { %v706_v4 = vld [vmem:[#allocation2 + $0x158] sm:$0xff]  ;;  %v779_v13 = vpack.c.bf16 %v762_v52, %v761_v56  ;;  %v1113_v34 = vld [vmem:[#allocation2 + $0xa] sm:$0xff] }
  0xbd   :  { %v723_v1 = vpack.c.bf16 %v706_v4, %v705_v47  ;;  %v764_v26 = vld [vmem:[#allocation2 + $0x171] sm:$0xff]  ;;  %v747_v35 = vld [vmem:[#allocation2 + $0xa9] sm:$0xff]  ;;  %v1144_v63 = vpack.c.bf16 %v1113_v34, %v1112_v50  ;;  %v1865_v47 = vld [vmem:[#allocation2 + $0x3a] sm:$0xff] }
  0xbe   :  { %v691_v31 = vld [vmem:[#allocation2 + $0xa8] sm:$0xff]  ;;  %v748_v32 = vld [vmem:[#allocation2 + $0xb1] sm:$0xff]  ;;  %v780_v33 = vpack.c.bf16 %v764_v26, %v763_v25 }
  0xbf   :  { %v692_v21 = vld [vmem:[#allocation2 + $0xb0] sm:$0xff]  ;;  %v7124_v39 = vpack.c.bf16 %v748_v32, %v747_v35 }
  0xc0   :  { %v7126_v40 = vpack.c.bf16 %v692_v21, %v691_v31  ;;  %v1864_v52 = vld [vmem:[#allocation2 + $0x32] sm:$0xff]  ;;  %v1866_v15 = vld [vmem:[#allocation2 + $0x4a] sm:$0xff] }
  0xc1   :  { %v1867_v23 = vld [vmem:[#allocation2 + $0x52] sm:$0xff] }
  0xc2   :  { %v6099_v35 = vld [vmem:[%s8522_s3 + $0xf0] sm:$0xff] }
  0xc3   :  { %2497 = vmatpush.bf16.msra.mxu3 %v6099_v35  ;;  %v6111_v41 = vld [vmem:[%s8522_s3 + $0x30] sm:$0xff] }
  0xc4   :  { %3244 = vmatpush.bf16.msra.mxu1 %v6111_v41 }
  0xc5   :  { %5335 = vmatmul.msk.bf16.gmra.mxu2 %vm50_vm0, %v775_v2  ;;  %v777_v2 = vpack.c.bf16 %v758_v62, %v757_v14 }
  0xc6   :  { %5367 = vmatmul.msk.bf16.gmra.mxu3 %vm50_vm0, %v719_v12  ;;  %v721_v12 = vpack.c.bf16 %v702_v20, %v701_v16  ;;  %v6096_v20 = vld [vmem:[%s8522_s3 + $0xd8] sm:$0xff] }
  0xc7   :  { %2246 = vmatpush.bf16.msra.mxu2 %v6096_v20 }
  0xc9   :  { %5328 = vmatmul.msk.bf16.gmra.mxu0 %vm50_vm0, %v7008_v59 }
  0xca   :  { %5360 = vmatmul.msk.bf16.gmra.mxu1 %vm50_vm0, %v7010_v60 }
  0xd5   :  { %5336 = vmatmul.msk.bf16.gmra.mxu2 %vm50_vm0, %v776_v57  ;;  %v687_v57 = vld [vmem:[#allocation2 + $0x78] sm:$0xff] }
  0xd6   :  { %5368 = vmatmul.msk.bf16.gmra.mxu3 %vm50_vm0, %v720_v58  ;;  %v688_v58 = vld [vmem:[#allocation2 + $0x80] sm:$0xff] }
  0xd7   :  { %v7090_v11 = vpack.c.bf16 %v688_v58, %v687_v57 }
  0xd9   :  { %5329 = vmatmul.msk.bf16.gmra.mxu0 %vm50_vm0, %v7042_v28 }
  0xda   :  { %5361 = vmatmul.msk.bf16.gmra.mxu1 %vm50_vm0, %v7044_v30 }
  0xdf   :  { %v871_v14 = vpop.f32.mrf.mxu0 }
  0xe0   :  { %v1032_v62 = vpop.f32.mrf.mxu1 }
  0xe1   :  { %v7104_v16 = vadd.f32 %v1032_v62, %v871_v14 }
  0xe5   :  { %5337 = vmatmul.msk.bf16.gmra.mxu2 %vm50_vm0, %v777_v2  ;;  %v707_v2 = vld [vmem:[#allocation2 + $0x168] sm:$0xff] }
  0xe6   :  { %5369 = vmatmul.msk.bf16.gmra.mxu3 %vm50_vm0, %v721_v12  ;;  %v708_v12 = vld [vmem:[#allocation2 + $0x170] sm:$0xff] }
  0xe7   :  { %v7122_v37 = vpack.c.bf16 %v708_v12, %v707_v2  ;;  %v7155_v57 = vpop.f32.mrf.mxu0  ;;  %v6095_v12 = vld [vmem:[%s8522_s3 + $0xd0] sm:$0xff] }
  0xe8   :  { %v7157_v58 = vpop.f32.mrf.mxu1  ;;  %2247 = vmatpush.bf16.msra.mxu2 %v6095_v12  ;;  %v1873_v12 = vld [vmem:[#allocation2 + $0x9a] sm:$0xff] }
  0xe9   :  { %5330 = vmatmul.msk.bf16.gmra.mxu0 %vm50_vm0, %v7088_v43 }
  0xea   :  { %5362 = vmatmul.msk.bf16.gmra.mxu1 %vm50_vm0, %v7090_v11 }
  0xf5   :  { %5338 = vmatmul.msk.bf16.gmra.mxu2 %vm50_vm0, %v778_v61 }
  0xf6   :  { %5370 = vmatmul.msk.bf16.gmra.mxu3 %vm50_vm0, %v722_v6 }
  0xf9   :  { %5331 = vmatmul.msk.bf16.gmra.mxu0 %vm50_vm0, %v7098_v17 }
  0xfa   :  { %5363 = vmatmul.msk.bf16.gmra.mxu1 %vm50_vm0, %v7100_v55 }
 0x105   :  { %5339 = vmatmul.msk.bf16.gmra.mxu2 %vm50_vm0, %v779_v13 }
 0x106   :  { %5371 = vmatmul.msk.bf16.gmra.mxu3 %vm50_vm0, %v723_v1 }
 0x109   :  { %5332 = vmatmul.msk.bf16.gmra.mxu0 %vm50_vm0, %v7124_v39 }
 0x10a   :  { %5364 = vmatmul.msk.bf16.gmra.mxu1 %vm50_vm0, %v7126_v40 }
 0x115   :  { %5340 = vmatmul.msk.bf16.gmra.mxu2 %vm50_vm0, %v780_v33 }
 0x116   :  { %5372 = vmatmul.msk.bf16.gmra.mxu3 %vm50_vm0, %v7122_v37 }
 0x119   :  { %5477 = vmatmul.msk.bf16.vlgmr.msrb.gmra.mxu0 %vm50_vm0, %v6932_v3 }
 0x11a   :  { %5517 = vmatmul.msk.bf16.vlgmr.msrb.gmra.mxu1 %vm50_vm0, %v1894_v7 }
 0x125   :  { %5397 = vmatmul.msk.bf16.vlgmr.msrb.gmra.mxu2 %vm50_vm0, %v1144_v63 }
 0x126   :  { %5437 = vmatmul.msk.bf16.vlgmr.msrb.gmra.mxu3 %vm50_vm0, %v6934_v36  ;;  %v7161_v36 = vpack.c.bf16 %v1865_v47, %v1864_v52  ;;  %v876_v4 = vpop.f32.mrf.mxu0  ;;  %v1870_v52 = vld [vmem:[#allocation2 + $0x7a] sm:$0xff]  ;;  %v1871_v47 = vld [vmem:[#allocation2 + $0x82] sm:$0xff] }
 0x127   :  { %v1037_v3 = vpop.f32.mrf.mxu1 }
 0x128   :  { %v911_v53 = vpop.f32.mrf.mxu2  ;;  %v7163_v5 = vadd.f32 %v1037_v3, %v876_v4 }
 0x129   :  { %v1072_v38 = vpop.f32.mrf.mxu3  ;;  %5478 = vmatmul.msk.bf16.gmra.mxu0 %vm50_vm0, %v6962_v27 }
 0x12a   :  { %v7153_v18 = vadd.f32 %v1072_v38, %v911_v53  ;;  %5518 = vmatmul.msk.bf16.gmra.mxu1 %vm50_vm0, %v7161_v36 }
 0x12e   :  { %v878_v13 = vpop.f32.mrf.mxu0 }
 0x12f   :  { %v1039_v1 = vpop.f32.mrf.mxu1 }
 0x130   :  { %v913_v61 = vpop.f32.mrf.mxu2  ;;  %v7174_v14 = vadd.f32 %v1039_v1, %v878_v13 }
 0x131   :  { %v1074_v6 = vpop.f32.mrf.mxu3 }
 0x132   :  { %v7159_v56 = vadd.f32 %v1074_v6, %v913_v61 }
 0x135   :  { %5398 = vmatmul.msk.bf16.gmra.mxu2 %vm50_vm0, %v1894_v7 }
 0x136   :  { %5438 = vmatmul.msk.bf16.gmra.mxu3 %vm50_vm0, %v6964_v22  ;;  %v7178_v22 = vpack.c.bf16 %v1867_v23, %v1866_v15  ;;  %v881_v27 = vpop.f32.mrf.mxu0 }
 0x137   :  { %v1042_v26 = vpop.f32.mrf.mxu1 }
 0x138   :  { %v916_v54 = vpop.f32.mrf.mxu2  ;;  %v7180_v2 = vadd.f32 %v1042_v26, %v881_v27  ;;  %v1872_v26 = vld [vmem:[#allocation2 + $0x92] sm:$0xff] }
 0x139   :  { %v1077_v8 = vpop.f32.mrf.mxu3  ;;  %5479 = vmatmul.msk.bf16.gmra.mxu0 %vm50_vm0, %v7008_v59  ;;  %v6103_v59 = vld [vmem:[%s8522_s3 + $0x110] sm:$0xff] }
 0x13a   :  { %v7172_v9 = vadd.f32 %v1077_v8, %v916_v54  ;;  %5519 = vmatmul.msk.bf16.gmra.mxu1 %vm50_vm0, %v7178_v22  ;;  %2747 = vmatpush.bf16.msra.mxu0 %v6103_v59 }
 0x13f   :  { %v1044_v10 = vpop.f32.mrf.mxu1 }
 0x140   :  { %v918_v62 = vpop.f32.mrf.mxu2 }
 0x141   :  { %v1079_v20 = vpop.f32.mrf.mxu3 }
 0x142   :  { %v7176_v25 = vadd.f32 %v1079_v20, %v918_v62 }
 0x145   :  { %5399 = vmatmul.msk.bf16.gmra.mxu2 %vm50_vm0, %v7161_v36 }
 0x146   :  { %5439 = vmatmul.msk.bf16.gmra.mxu3 %vm50_vm0, %v7010_v60  ;;  %v883_v60 = vpop.f32.mrf.mxu0 }
 0x147   :  { %v7198_v33 = vadd.f32 %v1044_v10, %v883_v60  ;;  %v1047_v48 = vpop.f32.mrf.mxu1 }
 0x148   :  { %v921_v31 = vpop.f32.mrf.mxu2 }
 0x149   :  { %v1082_v32 = vpop.f32.mrf.mxu3  ;;  %5480 = vmatmul.msk.bf16.gmra.mxu0 %vm50_vm0, %v7042_v28 }
 0x14a   :  { %v7196_v21 = vadd.f32 %v1082_v32, %v921_v31  ;;  %5520 = vmatmul.msk.bf16.gmra.mxu1 %vm50_vm0, %v7208_v46 }
 0x14e   :  { %v886_v24 = vpop.f32.mrf.mxu0 }
 0x14f   :  { %v7210_v0 = vadd.f32 %v1047_v48, %v886_v24  ;;  %v1049_v53 = vpop.f32.mrf.mxu1  ;;  %v1874_v24 = vld [vmem:[#allocation2 + $0xaa] sm:$0xff]  ;;  %v1875_v48 = vld [vmem:[#allocation2 + $0xb2] sm:$0xff] }
 0x150   :  { %v923_v44 = vpop.f32.mrf.mxu2 }
 0x151   :  { %v1084_v42 = vpop.f32.mrf.mxu3 }
 0x152   :  { %v7203_v49 = vadd.f32 %v1084_v42, %v923_v44 }
 0x155   :  { %5400 = vmatmul.msk.bf16.gmra.mxu2 %vm50_vm0, %v7178_v22 }
 0x156   :  { %5440 = vmatmul.msk.bf16.gmra.mxu3 %vm50_vm0, %v7044_v30  ;;  %v888_v7 = vpop.f32.mrf.mxu0  ;;  %v7226_v30 = vpack.c.bf16 %v1871_v47, %v1870_v52 }
 0x157   :  { %v7222_v38 = vadd.f32 %v1049_v53, %v888_v7  ;;  %v1052_v3 = vpop.f32.mrf.mxu1  ;;  %v6094_v53 = vld [vmem:[%s8522_s3 + $0xc8] sm:$0xff] }
 0x158   :  { %v926_v50 = vpop.f32.mrf.mxu2  ;;  %2248 = vmatpush.bf16.msra.mxu2 %v6094_v53 }
 0x159   :  { %v1087_v34 = vpop.f32.mrf.mxu3  ;;  %5481 = vmatmul.msk.bf16.gmra.mxu0 %vm50_vm0, %v7088_v43 }
 0x15a   :  { %v7220_v63 = vadd.f32 %v1087_v34, %v926_v50  ;;  %5521 = vmatmul.msk.bf16.gmra.mxu1 %vm50_vm0, %v7226_v30 }
 0x15e   :  { %v891_v28 = vpop.f32.mrf.mxu0 }
 0x15f   :  { %v7228_v54 = vadd.f32 %v1052_v3, %v891_v28  ;;  %v1054_v20 = vpop.f32.mrf.mxu1 }
 0x160   :  { %v928_v61 = vpop.f32.mrf.mxu2 }
 0x161   :  { %v1089_v6 = vpop.f32.mrf.mxu3 }
 0x162   :  { %v7224_v4 = vadd.f32 %v1089_v6, %v928_v61  ;;  %v6098_v61 = vld [vmem:[%s8522_s3 + $0xe8] sm:$0xff] }
 0x163   :  { %2498 = vmatpush.bf16.msra.mxu3 %v6098_v61  ;;  %v1379_v61 = vld [vmem:[#allocation2 + $0xe0] sm:$0xff] }
 0x165   :  { %5401 = vmatmul.msk.bf16.gmra.mxu2 %vm50_vm0, %v7208_v46 }
 0x166   :  { %5441 = vmatmul.msk.bf16.gmra.mxu3 %vm50_vm0, %v7090_v11  ;;  %v893_v62 = vpop.f32.mrf.mxu0  ;;  %v1899_v11 = vpack.c.bf16 %v1873_v12, %v1872_v26  ;;  %v1876_v26 = vld [vmem:[#allocation2 + $0xc2] sm:$0xff]  ;;  %v1877_v12 = vld [vmem:[#allocation2 + $0xca] sm:$0xff] }
 0x167   :  { %v7240_v15 = vadd.f32 %v1054_v20, %v893_v62  ;;  %v1057_v43 = vpop.f32.mrf.mxu1  ;;  %v1626_v62 = vld [vmem:[#allocation2 + $0xc1] sm:$0xff] }
 0x168   :  { %v931_v8 = vpop.f32.mrf.mxu2 }
 0x169   :  { %v1092_v13 = vpop.f32.mrf.mxu3  ;;  %5482 = vmatmul.msk.bf16.gmra.mxu0 %vm50_vm0, %v7098_v17 }
 0x16a   :  { %v7238_v1 = vadd.f32 %v1092_v13, %v931_v8  ;;  %5522 = vmatmul.msk.bf16.gmra.mxu1 %vm50_vm0, %v1899_v11  ;;  %v1376_v8 = vld [vmem:[#allocation2 + $0xc0] sm:$0xff]  ;;  %v1377_v13 = vld [vmem:[#allocation2 + $0xc8] sm:$0xff] }
 0x16e   :  { %v896_v31 = vpop.f32.mrf.mxu0 }
 0x16f   :  { %v7244_v32 = vadd.f32 %v1057_v43, %v896_v31  ;;  %v1059_v42 = vpop.f32.mrf.mxu1  ;;  %v1401_v31 = vpack.c.bf16 %v1377_v13, %v1376_v8  ;;  %v1879_v8 = vld [vmem:[#allocation2 + $0xe2] sm:$0xff] }
 0x170   :  { %v933_v23 = vpop.f32.mrf.mxu2 }
 0x171   :  { %v1094_v27 = vpop.f32.mrf.mxu3 }
 0x172   :  { %v7242_v35 = vadd.f32 %v1094_v27, %v933_v23  ;;  %v1627_v27 = vld [vmem:[#allocation2 + $0xc9] sm:$0xff] }
 0x173   :  { %v1651_v43 = vpack.c.bf16 %v1627_v27, %v1626_v62 }
 0x175   :  { %5402 = vmatmul.msk.bf16.gmra.mxu2 %vm50_vm0, %v7226_v30 }
 0x176   :  { %5442 = vmatmul.msk.bf16.gmra.mxu3 %vm50_vm0, %v7100_v55  ;;  %v898_v44 = vpop.f32.mrf.mxu0  ;;  %v1900_v55 = vpack.c.bf16 %v1875_v48, %v1874_v24 }
 0x177   :  { %v7255_v45 = vadd.f32 %v1059_v42, %v898_v44  ;;  %v1062_v7 = vpop.f32.mrf.mxu1 }
 0x178   :  { %v936_v60 = vpop.f32.mrf.mxu2 }
 0x179   :  { %v1097_v10 = vpop.f32.mrf.mxu3  ;;  %5483 = vmatmul.msk.bf16.gmra.mxu0 %vm50_vm0, %v7124_v39  ;;  %v6102_v39 = vld [vmem:[%s8522_s3 + $0x108] sm:$0xff] }
 0x17a   :  { %v7253_v59 = vadd.f32 %v1097_v10, %v936_v60  ;;  %5523 = vmatmul.msk.bf16.gmra.mxu1 %vm50_vm0, %v1900_v55  ;;  %2748 = vmatpush.bf16.msra.mxu0 %v6102_v39  ;;  %v1901_v60 = vpack.c.bf16 %v1877_v12, %v1876_v26  ;;  %v1878_v39 = vld [vmem:[#allocation2 + $0xda] sm:$0xff] }
 0x17e   :  { %v901_v34 = vpop.f32.mrf.mxu0 }
 0x17f   :  { %v7259_v17 = vadd.f32 %v1062_v7, %v901_v34  ;;  %v1064_v28 = vpop.f32.mrf.mxu1 }
 0x180   :  { %v938_v19 = vpop.f32.mrf.mxu2 }
 0x181   :  { %v1099_v41 = vpop.f32.mrf.mxu3 }
 0x182   :  { %v7257_v50 = vadd.f32 %v1099_v41, %v938_v19  ;;  %v6110_v19 = vld [vmem:[%s8522_s3 + $0x28] sm:$0xff] }
 0x183   :  { %3245 = vmatpush.bf16.msra.mxu1 %v6110_v19 }
 0x185   :  { %5403 = vmatmul.msk.bf16.gmra.mxu2 %vm50_vm0, %v1899_v11 }
 0x186   :  { %5443 = vmatmul.msk.bf16.gmra.mxu3 %vm50_vm0, %v7126_v40  ;;  %v903_v40 = vpop.f32.mrf.mxu0 }
 0x187   :  { %v7275_v3 = vadd.f32 %v1064_v28, %v903_v40  ;;  %v1067_v44 = vpop.f32.mrf.mxu1  ;;  %v1629_v28 = vld [vmem:[#allocation2 + $0xe1] sm:$0xff] }
 0x188   :  { %v941_v6 = vpop.f32.mrf.mxu2 }
 0x189   :  { %v1102_v52 = vpop.f32.mrf.mxu3  ;;  %5484 = vmatmul.msk.bf16.gmra.mxu0 %vm50_vm0, %v1651_v43 }
 0x18a   :  { %v7273_v47 = vadd.f32 %v1102_v52, %v941_v6  ;;  %5524 = vmatmul.msk.bf16.gmra.mxu1 %vm50_vm0, %v1901_v60  ;;  %v1628_v6 = vld [vmem:[#allocation2 + $0xd9] sm:$0xff] }
 0x18e   :  { %v906_v10 = vpop.f32.mrf.mxu0 }
 0x18f   :  { %v7282_v42 = vadd.f32 %v1067_v44, %v906_v10  ;;  %v1069_v7 = vpop.f32.mrf.mxu1 }
 0x190   :  { %v943_v20 = vpop.f32.mrf.mxu2 }
 0x191   :  { %v1104_v23 = vpop.f32.mrf.mxu3 }
 0x192   :  { %v7280_v11 = vadd.f32 %v1104_v23, %v943_v20  ;;  %v1652_v20 = vpack.c.bf16 %v1629_v28, %v1628_v6  ;;  %v1902_v23 = vpack.c.bf16 %v1879_v8, %v1878_v39  ;;  %v1881_v28 = vld [vmem:[#allocation2 + $0xfa] sm:$0xff] }
 0x195   :  { %5404 = vmatmul.msk.bf16.gmra.mxu2 %vm50_vm0, %v1900_v55  ;;  %v1378_v55 = vld [vmem:[#allocation2 + $0xd8] sm:$0xff] }
 0x196   :  { %5444 = vmatmul.msk.bf16.gmra.mxu3 %vm50_vm0, %v1401_v31  ;;  %v908_v34 = vpop.f32.mrf.mxu0  ;;  %v1402_v62 = vpack.c.bf16 %v1379_v61, %v1378_v55 }
 0x197   :  { %v7293_v53 = vadd.f32 %v1069_v7, %v908_v34  ;;  %v2000_v26 = vpop.f32.mrf.mxu1  ;;  %v1381_v34 = vld [vmem:[#allocation2 + $0xf8] sm:$0xff]  ;;  %v1035_v7 = vadd.f32 %v7157_v58, %v7155_v57 }
 0x198   :  { %v946_v41 = vpop.f32.mrf.mxu2 }
 0x199   :  { %v1107_v24 = vpop.f32.mrf.mxu3  ;;  %5485 = vmatmul.msk.bf16.gmra.mxu0 %vm50_vm0, %v1652_v20 }
 0x19a   :  { %v7291_v48 = vadd.f32 %v1107_v24, %v946_v41  ;;  %5525 = vmatmul.msk.bf16.gmra.mxu1 %vm50_vm0, %v1902_v23  ;;  %v1380_v24 = vld [vmem:[#allocation2 + $0xf0] sm:$0xff] }
 0x19b   :  { %v1403_v8 = vpack.c.bf16 %v1381_v34, %v1380_v24 }
 0x19e   :  { %v1750_v27 = vpop.f32.mrf.mxu0 }
 0x19f   :  { %v2002_v19 = vpop.f32.mrf.mxu1 }
 0x1a0   :  { %v948_v52 = vpop.f32.mrf.mxu2 }
 0x1a1   :  { %v1109_v40 = vpop.f32.mrf.mxu3 }
 0x1a2   :  { %v7295_v13 = vadd.f32 %v1109_v40, %v948_v52  ;;  %v1631_v52 = vld [vmem:[#allocation2 + $0xf9] sm:$0xff] }
 0x1a3   :  { %v1880_v40 = vld [vmem:[#allocation2 + $0xf2] sm:$0xff] }
 0x1a4   :  { %v1903_v20 = vpack.c.bf16 %v1881_v28, %v1880_v40  ;;  %v1882_v40 = vld [vmem:[#allocation2 + $0x10a] sm:$0xff]  ;;  %v1883_v28 = vld [vmem:[#allocation2 + $0x112] sm:$0xff] }
 0x1a5   :  { %5405 = vmatmul.msk.bf16.gmra.mxu2 %vm50_vm0, %v1901_v60  ;;  %v1630_v60 = vld [vmem:[#allocation2 + $0xf1] sm:$0xff] }
 0x1a6   :  { %5445 = vmatmul.msk.bf16.gmra.mxu3 %vm50_vm0, %v1402_v62  ;;  %v1752_v44 = vpop.f32.mrf.mxu0  ;;  %v1653_v62 = vpack.c.bf16 %v1631_v52, %v1630_v60  ;;  %v1632_v60 = vld [vmem:[#allocation2 + $0x109] sm:$0xff]  ;;  %v1633_v52 = vld [vmem:[#allocation2 + $0x111] sm:$0xff] }
 0x1a8   :  { %v1250_v12 = vpop.f32.mrf.mxu2 }
 0x1a9   :  { %v1500_v31 = vpop.f32.mrf.mxu3  ;;  %v1330_v43 = vadd.f32 %v1250_v12, %v7104_v16  ;;  %5486 = vmatmul.msk.bf16.gmra.mxu0 %vm50_vm0, %v1653_v62 }
 0x1aa   :  { %5526 = vmatmul.msk.bf16.gmra.mxu1 %vm50_vm0, %v1903_v20 }
 0x1ab   :  { %v1580_v10 = vadd.f32 %v1500_v31, %v1330_v43 }
 0x1ad   :  { %v1830_v41 = vadd.f32 %v1750_v27, %v1580_v10  ;;  %v2005_v27 = vpop.f32.mrf.mxu1 }
 0x1ae   :  { %v1755_v12 = vpop.f32.mrf.mxu0 }
 0x1af   :  { %v7304_v55 = vadd.f32 %v2000_v26, %v1830_v41 }
 0x1b0   :  { %v1252_v61 = vpop.f32.mrf.mxu2 }
 0x1b1   :  { %v1502_v6 = vpop.f32.mrf.mxu3  ;;  %v1331_v39 = vadd.f32 %v1252_v61, %v1035_v7  ;;  %v1382_v7 = vld [vmem:[#allocation2 + $0x108] sm:$0xff] }
 0x1b3   :  { %v1581_v16 = vadd.f32 %v1502_v6, %v1331_v39 }
 0x1b5   :  { %v1831_v31 = vadd.f32 %v1752_v44, %v1581_v16  ;;  %5406 = vmatmul.msk.bf16.gmra.mxu2 %vm50_vm0, %v1902_v23  ;;  %v2007_v24 = vpop.f32.mrf.mxu1  ;;  %v1383_v44 = vld [vmem:[#allocation2 + $0x110] sm:$0xff]  ;;  %v1654_v16 = vpack.c.bf16 %v1633_v52, %v1632_v60  ;;  %v1384_v60 = vld [vmem:[#allocation2 + $0x120] sm:$0xff] }
 0x1b6   :  { %5446 = vmatmul.msk.bf16.gmra.mxu3 %vm50_vm0, %v1403_v8  ;;  %v1757_v41 = vpop.f32.mrf.mxu0  ;;  %v1404_v39 = vpack.c.bf16 %v1383_v44, %v1382_v7  ;;  %v6101_v44 = vld [vmem:[%s8522_s3 + $0x100] sm:$0xff] }
 0x1b7   :  { %v7310_v57 = vadd.f32 %v2002_v19, %v1831_v31  ;;  %2749 = vmatpush.bf16.msra.mxu0 %v6101_v44 }
 0x1b8   :  { %v1255_v58 = vpop.f32.mrf.mxu2 }
 0x1b9   :  { %v1505_v26 = vpop.f32.mrf.mxu3  ;;  %v1332_v43 = vadd.f32 %v1255_v58, %v7163_v5  ;;  %v1904_v5 = vpack.c.bf16 %v1883_v28, %v1882_v40  ;;  %5487 = vmatmul.msk.bf16.gmra.mxu0 %vm50_vm0, %v1654_v16  ;;  %v1635_v28 = vld [vmem:[#allocation2 + $0x129] sm:$0xff] }
 0x1bb   :  { %v1582_v10 = vadd.f32 %v1505_v26, %v1332_v43  ;;  %5527 = vmatmul.msk.bf16.gmra.mxu1 %vm50_vm0, %v1904_v5 }
 0x1bd   :  { %v1832_v34 = vadd.f32 %v1755_v12, %v1582_v10  ;;  %v2010_v31 = vpop.f32.mrf.mxu1  ;;  %v6093_v12 = vld [vmem:[%s8522_s3 + $0xc0] sm:$0xff] }
 0x1be   :  { %v1760_v62 = vpop.f32.mrf.mxu0  ;;  %2249 = vmatpush.bf16.msra.mxu2 %v6093_v12 }
 0x1bf   :  { %v7313_v23 = vadd.f32 %v2005_v27, %v1832_v34 }
 0x1c0   :  { %v1257_v61 = vpop.f32.mrf.mxu2 }
 0x1c1   :  { %v1507_v6 = vpop.f32.mrf.mxu3  ;;  %v1333_v19 = vadd.f32 %v1257_v61, %v7174_v14  ;;  %v6097_v14 = vld [vmem:[%s8522_s3 + $0xe0] sm:$0xff]  ;;  %v1385_v61 = vld [vmem:[#allocation2 + $0x128] sm:$0xff] }
 0x1c2   :  { %2499 = vmatpush.bf16.msra.mxu3 %v6097_v14 }
 0x1c3   :  { %v1583_v8 = vadd.f32 %v1507_v6, %v1333_v19  ;;  %v1634_v6 = vld [vmem:[#allocation2 + $0x121] sm:$0xff] }
 0x1c4   :  { %v1884_v19 = vld [vmem:[#allocation2 + $0x122] sm:$0xff] }
 0x1c5   :  { %v1833_v58 = vadd.f32 %v1757_v41, %v1583_v8  ;;  %5407 = vmatmul.msk.bf16.gmra.mxu2 %vm50_vm0, %v1903_v20  ;;  %v2012_v34 = vpop.f32.mrf.mxu1  ;;  %v1405_v8 = vpack.c.bf16 %v1385_v61, %v1384_v60  ;;  %v1386_v60 = vld [vmem:[#allocation2 + $0x138] sm:$0xff]  ;;  %v1387_v61 = vld [vmem:[#allocation2 + $0x140] sm:$0xff] }
 0x1c6   :  { %5447 = vmatmul.msk.bf16.gmra.mxu3 %vm50_vm0, %v1404_v39  ;;  %v1762_v41 = vpop.f32.mrf.mxu0 }
 0x1c7   :  { %v7326_v27 = vadd.f32 %v2007_v24, %v1833_v58 }
 0x1c8   :  { %v1260_v26 = vpop.f32.mrf.mxu2 }
 0x1c9   :  { %v1510_v43 = vpop.f32.mrf.mxu3  ;;  %v1334_v20 = vadd.f32 %v1260_v26, %v7180_v2  ;;  %v1885_v2 = vld [vmem:[#allocation2 + $0x12a] sm:$0xff] }
 0x1ca   :  { %v1905_v58 = vpack.c.bf16 %v1885_v2, %v1884_v19  ;;  %v1637_v19 = vld [vmem:[#allocation2 + $0x141] sm:$0xff] }
 0x1cb   :  { %v1584_v10 = vadd.f32 %v1510_v43, %v1334_v20  ;;  %v1886_v2 = vld [vmem:[#allocation2 + $0x13a] sm:$0xff] }
 0x1cc   :  { %5528 = vmatmul.msk.bf16.gmra.mxu1 %vm50_vm0, %v1905_v58 }
 0x1cd   :  { %v1834_v7 = vadd.f32 %v1760_v62, %v1584_v10  ;;  %v1655_v62 = vpack.c.bf16 %v1635_v28, %v1634_v6  ;;  %v2015_v14 = vpop.f32.mrf.mxu1  ;;  %v1636_v6 = vld [vmem:[#allocation2 + $0x139] sm:$0xff] }
 0x1ce   :  { %v1765_v12 = vpop.f32.mrf.mxu0 }
 0x1cf   :  { %v7332_v24 = vadd.f32 %v2010_v31, %v1834_v7  ;;  %v6109_v31 = vld [vmem:[%s8522_s3 + $0x20] sm:$0xff]  ;;  %5488 = vmatmul.msk.bf16.gmra.mxu0 %vm50_vm0, %v1655_v62  ;;  %v1656_v62 = vpack.c.bf16 %v1637_v19, %v1636_v6 }
 0x1d0   :  { %v1262_v52 = vpop.f32.mrf.mxu2  ;;  %3246 = vmatpush.bf16.msra.mxu1 %v6109_v31 }
 0x1d1   :  { %v1512_v40 = vpop.f32.mrf.mxu3  ;;  %v1335_v39 = vadd.f32 %v1262_v52, %v7198_v33 }
 0x1d3   :  { %v1585_v16 = vadd.f32 %v1512_v40, %v1335_v39 }
 0x1d5   :  { %v1835_v26 = vadd.f32 %v1762_v41, %v1585_v16  ;;  %5408 = vmatmul.msk.bf16.gmra.mxu2 %vm50_vm0, %v1904_v5  ;;  %v2017_v5 = vpop.f32.mrf.mxu1 }
 0x1d6   :  { %5448 = vmatmul.msk.bf16.gmra.mxu3 %vm50_vm0, %v1405_v8  ;;  %v1767_v7 = vpop.f32.mrf.mxu0  ;;  %v1406_v8 = vpack.c.bf16 %v1387_v61, %v1386_v60 }
 0x1d7   :  { %v7342_v33 = vadd.f32 %v2012_v34, %v1835_v26  ;;  %v1887_v34 = vld [vmem:[#allocation2 + $0x142] sm:$0xff] }
 0x1d8   :  { %v1265_v43 = vpop.f32.mrf.mxu2 }
 0x1d9   :  { %v1515_v20 = vpop.f32.mrf.mxu3  ;;  %v1336_v10 = vadd.f32 %v1265_v43, %v7210_v0  ;;  %v1906_v0 = vpack.c.bf16 %v1887_v34, %v1886_v2  ;;  %v1388_v34 = vld [vmem:[#allocation2 + $0x150] sm:$0xff] }
 0x1db   :  { %v1586_v41 = vadd.f32 %v1515_v20, %v1336_v10 }
 0x1dc   :  { %5529 = vmatmul.msk.bf16.gmra.mxu1 %vm50_vm0, %v1906_v0 }
 0x1dd   :  { %v1836_v44 = vadd.f32 %v1765_v12, %v1586_v41  ;;  %v2020_v31 = vpop.f32.mrf.mxu1  ;;  %v540_v12 = vld [vmem:[%s8523_s0 + $0xf0] sm:$0xff] }
 0x1de   :  { %v1770_v26 = vpop.f32.mrf.mxu0 }
 0x1df   :  { %v7345_v52 = vadd.f32 %v2015_v14, %v1836_v44  ;;  %v541_v14 = vld [vmem:[%s8523_s0 + $0xf8] sm:$0xff]  ;;  %5489 = vmatmul.msk.bf16.gmra.mxu0 %vm50_vm0, %v1656_v62 }
 0x1e0   :  { %v1267_v40 = vpop.f32.mrf.mxu2  ;;  %v576_v20 = vmul.f32 %v6780_v29, %v541_v14 }
 0x1e1   :  { %v1517_v28 = vpop.f32.mrf.mxu3  ;;  %v1337_v39 = vadd.f32 %v1267_v40, %v7222_v38  ;;  %v575_v38 = vmul.f32 %v6780_v29, %v540_v12  ;;  %v1639_v12 = vld [vmem:[#allocation2 + $0x159] sm:$0xff] }
 0x1e2   :  { %v611_v44 = vadd.f32 %v6794_v51, %v576_v20 }
 0x1e3   :  { %v1587_v16 = vadd.f32 %v1517_v28, %v1337_v39  ;;  %v610_v10 = vadd.f32 %v6794_v51, %v575_v38  ;;  %v1389_v39 = vld [vmem:[#allocation2 + $0x158] sm:$0xff] }
 0x1e4   :  { %v643_v6 = vmax.f32 %v611_v44, 0.0  ;;  %v1407_v38 = vpack.c.bf16 %v1389_v39, %v1388_v34  ;;  %v1640_v39 = vld [vmem:[#allocation2 + $0x169] sm:$0xff] }
 0x1e5   :  { %v1837_v43 = vadd.f32 %v1767_v7, %v1587_v16  ;;  %5409 = vmatmul.msk.bf16.gmra.mxu2 %vm50_vm0, %v1905_v58  ;;  %v642_v61 = vmax.f32 %v610_v10, 0.0  ;;  %v2022_v19 = vpop.f32.mrf.mxu1 }
 0x1e6   :  { %5449 = vmatmul.msk.bf16.gmra.mxu3 %vm50_vm0, %v1406_v8  ;;  %v1772_v28 = vpop.f32.mrf.mxu0  ;;  %676 = vst.msk [vmem:[#allocation2 + $0x189] sm:$0xff] %vm50_vm0, %v643_v6 }
 0x1e7   :  { %v7361_v41 = vadd.f32 %v2017_v5, %v1837_v43  ;;  %675 = vst.msk [vmem:[#allocation2 + $0x181] sm:$0xff] %vm50_vm0, %v642_v61  ;;  %v1638_v5 = vld [vmem:[#allocation2 + $0x151] sm:$0xff] }
 0x1e8   :  { %v1270_v7 = vpop.f32.mrf.mxu2  ;;  %v1888_v43 = vld [vmem:[#allocation2 + $0x152] sm:$0xff]  ;;  %v1657_v10 = vpack.c.bf16 %v1639_v12, %v1638_v5 }
 0x1e9   :  { %v1520_v58 = vpop.f32.mrf.mxu3  ;;  %v1338_v60 = vadd.f32 %v1270_v7, %v7228_v54  ;;  %v1889_v54 = vld [vmem:[#allocation2 + $0x15a] sm:$0xff]  ;;  %v1891_v12 = vld [vmem:[#allocation2 + $0x172] sm:$0xff] }
 0x1ea   :  { %v1907_v7 = vpack.c.bf16 %v1889_v54, %v1888_v43 }
 0x1eb   :  { %v1588_v40 = vadd.f32 %v1520_v58, %v1338_v60 }
 0x1ec   :  { %5530 = vmatmul.msk.bf16.gmra.mxu1 %vm50_vm0, %v1907_v7 }
 0x1ed   :  { %v1838_v2 = vadd.f32 %v1770_v26, %v1588_v40  ;;  %v2025_v44 = vpop.f32.mrf.mxu1 }
 0x1ee   :  { %v1775_v58 = vpop.f32.mrf.mxu0 }
 0x1ef   :  { %v7367_v8 = vadd.f32 %v2020_v31, %v1838_v2  ;;  %5490 = vmatmul.msk.bf16.gmra.mxu0 %vm50_vm0, %v1657_v10  ;;  %v6108_v10 = vld [vmem:[%s8522_s3 + $0x18] sm:$0xff] }
 0x1f0   :  { %v1272_v16 = vpop.f32.mrf.mxu2  ;;  %3404 = vmatpush.bf16.msrb.mxu2 %v6108_v10 }
 0x1f1   :  { %v1522_v62 = vpop.f32.mrf.mxu3  ;;  %v1339_v14 = vadd.f32 %v1272_v16, %v7240_v15  ;;  %v1641_v16 = vld [vmem:[#allocation2 + $0x171] sm:$0xff] }
 0x1f2   :  { %v1658_v54 = vpack.c.bf16 %v1641_v16, %v1640_v39  ;;  %v1642_v39 = vld [vmem:[#allocation2 + $0x181] sm:$0xff]  ;;  %v1643_v16 = vld [vmem:[#allocation2 + $0x189] sm:$0xff] }
 0x1f3   :  { %v1589_v20 = vadd.f32 %v1522_v62, %v1339_v14  ;;  %v1890_v62 = vld [vmem:[#allocation2 + $0x16a] sm:$0xff] }
 0x1f4   :  { %v1908_v14 = vpack.c.bf16 %v1891_v12, %v1890_v62  ;;  %v1892_v62 = vld [vmem:[#allocation2 + $0x182] sm:$0xff] }
 0x1f5   :  { %v1839_v60 = vadd.f32 %v1772_v28, %v1589_v20  ;;  %5410 = vmatmul.msk.bf16.gmra.mxu2 %vm50_vm0, %v1906_v0  ;;  %v2027_v2 = vpop.f32.mrf.mxu1 }
 0x1f6   :  { %5450 = vmatmul.msk.bf16.gmra.mxu3 %vm50_vm0, %v1407_v38  ;;  %v1777_v40 = vpop.f32.mrf.mxu0 }
 0x1f7   :  { %v7374_v26 = vadd.f32 %v2022_v19, %v1839_v60 }
 0x1f8   :  { %v1275_v31 = vpop.f32.mrf.mxu2 }
 0x1f9   :  { %v1525_v61 = vpop.f32.mrf.mxu3  ;;  %v1340_v15 = vadd.f32 %v1275_v31, %v7244_v32 }
 0x1fb   :  { %v1590_v6 = vadd.f32 %v1525_v61, %v1340_v15 }
 0x1fc   :  { %5531 = vmatmul.msk.bf16.gmra.mxu1 %vm50_vm0, %v1908_v14 }
 0x1fd   :  { %v1840_v34 = vadd.f32 %v1775_v58, %v1590_v6  ;;  %v2030_v20 = vpop.f32.mrf.mxu1  ;;  %v6120_v6 = vld [vmem:[%s8522_s3 + $0x78] sm:$0xff] }
 0x1fe   :  { %v1780_v38 = vpop.f32.mrf.mxu0  ;;  %3870 = vmatpush.bf16.msrb.mxu0 %v6120_v6 }
 0x1ff   :  { %v7377_v28 = vadd.f32 %v2025_v44, %v1840_v34  ;;  %5491 = vmatmul.msk.bf16.gmra.mxu0 %vm50_vm0, %v1658_v54  ;;  %v1393_v34 = vld [vmem:[#allocation2 + $0x188] sm:$0xff]  ;;  %v1659_v54 = vpack.c.bf16 %v1643_v16, %v1642_v39 }
 0x200   :  { %v1277_v0 = vpop.f32.mrf.mxu2 }
 0x201   :  { %v1527_v5 = vpop.f32.mrf.mxu3  ;;  %v1341_v43 = vadd.f32 %v1277_v0, %v7255_v45  ;;  %v6116_v45 = vld [vmem:[%s8522_s3 + $0x58] sm:$0xff] }
 0x202   :  { %3621 = vmatpush.bf16.msrb.mxu3 %v6116_v45 }
 0x203   :  { %v1591_v19 = vadd.f32 %v1527_v5, %v1341_v43 }
 0x205   :  { %v1841_v32 = vadd.f32 %v1777_v40, %v1591_v19  ;;  %5411 = vmatmul.msk.bf16.gmra.mxu2 %vm50_vm0, %v1907_v7  ;;  %v2032_v61 = vpop.f32.mrf.mxu1  ;;  %v1392_v40 = vld [vmem:[#allocation2 + $0x180] sm:$0xff] }
 0x206   :  { %5451 = vmatmul.msk.bf16.gmra.mxu3 %vm50_vm0, %v7122_v37  ;;  %v1782_v31 = vpop.f32.mrf.mxu0  ;;  %v1409_v43 = vpack.c.bf16 %v1393_v34, %v1392_v40 }
 0x207   :  { %v7391_v58 = vadd.f32 %v2027_v2, %v1841_v32 }
 0x208   :  { %v1280_v44 = vpop.f32.mrf.mxu2 }
 0x209   :  { %v1530_v60 = vpop.f32.mrf.mxu3  ;;  %v1342_v7 = vadd.f32 %v1280_v44, %v7259_v17  ;;  %v1893_v17 = vld [vmem:[#allocation2 + $0x18a] sm:$0xff] }
 0x20b   :  { %v1592_v37 = vadd.f32 %v1530_v60, %v1342_v7  ;;  %v5655_v7 = vld [vmem:[%s8523_s0 + $0x110] sm:$0xff] }
 0x20d   :  { %v1842_v15 = vadd.f32 %v1780_v38, %v1592_v37  ;;  %v1909_v38 = vpack.c.bf16 %v1893_v17, %v1892_v62  ;;  %v2035_v10 = vpop.f32.mrf.mxu1  ;;  %v2114_v17 = vld [vmem:[#allocation2 + $0x38] sm:$0xff] }
 0x20e   :  { %v1785_v32 = vpop.f32.mrf.mxu0 }
 0x20f   :  { %v7397_v2 = vadd.f32 %v2030_v20, %v1842_v15  ;;  %v6124_v20 = vld [vmem:[%s8522_s3 + $0x98] sm:$0xff]  ;;  %5492 = vmatmul.msk.bf16.gmra.mxu0 %vm50_vm0, %v1659_v54  ;;  %5532 = vmatmul.msk.bf16.gmra.mxu1 %vm50_vm0, %v1909_v38  ;;  %v3111_v38 = vld [vmem:[#allocation2 + $0x1] sm:$0xff] }
 0x210   :  { %v1282_v0 = vpop.f32.mrf.mxu2  ;;  %4119 = vmatpush.bf16.msrb.mxu1 %v6124_v20 }
 0x211   :  { %v1532_v5 = vpop.f32.mrf.mxu3  ;;  %v1343_v12 = vadd.f32 %v1282_v0, %v7275_v3 }
 0x213   :  { %v1593_v19 = vadd.f32 %v1532_v5, %v1343_v12  ;;  %v2113_v5 = vld [vmem:[#allocation2 + $0x30] sm:$0xff] }
 0x214   :  { %v2363_v12 = vld [vmem:[#allocation2 + $0x31] sm:$0xff] }
 0x215   :  { %v1843_v45 = vadd.f32 %v1782_v31, %v1593_v19  ;;  %5412 = vmatmul.msk.bf16.gmra.mxu2 %vm50_vm0, %v1908_v14  ;;  %v5656_v14 = vld [vmem:[%s8523_s0 + $0x118] sm:$0xff]  ;;  %v2929_v31 = vmul.f32 %v5655_v7, %v6780_v29  ;;  %v2037_v39 = vpop.f32.mrf.mxu1 }
 0x216   :  { %5452 = vmatmul.msk.bf16.gmra.mxu3 %vm50_vm0, %v1409_v43  ;;  %v2930_v15 = vmul.f32 %v5656_v14, %v6780_v29  ;;  %v1787_v34 = vpop.f32.mrf.mxu0  ;;  %v2364_v43 = vld [vmem:[#allocation2 + $0x39] sm:$0xff] }
 0x217   :  { %v7407_v3 = vadd.f32 %v2032_v61, %v1843_v45  ;;  %v2961_v61 = vadd.f32 %v2929_v31, %v6794_v51  ;;  %v3112_v45 = vld [vmem:[#allocation2 + $0x9] sm:$0xff] }
 0x218   :  { %v1285_v44 = vpop.f32.mrf.mxu2  ;;  %v2962_v40 = vadd.f32 %v2930_v15, %v6794_v51  ;;  %v3143_v7 = vpack.c.bf16 %v3112_v45, %v3111_v38  ;;  %v2365_v38 = vld [vmem:[#allocation2 + $0x49] sm:$0xff]  ;;  %v2366_v45 = vld [vmem:[#allocation2 + $0x51] sm:$0xff] }
 0x219   :  { %v1535_v60 = vpop.f32.mrf.mxu3  ;;  %v1344_v37 = vadd.f32 %v1285_v44, %v7282_v42  ;;  %v2993_v16 = vmax.f32 %v2961_v61, 0.0  ;;  %v2145_v44 = vpack.c.bf16 %v2114_v17, %v2113_v5  ;;  %v5658_v61 = vld [vmem:[%s8523_s0 + $0x128] sm:$0xff] }
 0x21a   :  { %v2994_v62 = vmax.f32 %v2962_v40, 0.0 }
 0x21b   :  { %v1594_v6 = vadd.f32 %v1535_v60, %v1344_v37  ;;  %3025 = vst.msk [vmem:[#allocation2 + $0x31] sm:$0xff] %vm50_vm0, %v2993_v16 }
 0x21c   :  { %3026 = vst.msk [vmem:[#allocation2 + $0x39] sm:$0xff] %vm50_vm0, %v2994_v62 }
 0x21d   :  { %v1844_v0 = vadd.f32 %v1785_v32, %v1594_v6  ;;  %v2395_v32 = vpack.c.bf16 %v2364_v43, %v2363_v12  ;;  %v2040_v37 = vpop.f32.mrf.mxu1  ;;  %v5657_v6 = vld [vmem:[%s8523_s0 + $0x120] sm:$0xff]  ;;  %v2115_v12 = vld [vmem:[#allocation2 + $0x48] sm:$0xff] }
 0x21e   :  { %v1790_v14 = vpop.f32.mrf.mxu0 }
 0x21f   :  { %v7421_v42 = vadd.f32 %v2035_v10, %v1844_v0  ;;  %5637 = vmatmul.msk.bf16.vlgmr.msra.gmra.mxu0 %vm50_vm0, %v7161_v36  ;;  %5709 = vmatmul.msk.bf16.vlgmr.msra.gmra.mxu1 %vm50_vm0, %v3143_v7  ;;  %v2932_v36 = vmul.f32 %v5658_v61, %v6780_v29 }
 0x220   :  { %v1287_v19 = vpop.f32.mrf.mxu2 }
 0x221   :  { %v1537_v54 = vpop.f32.mrf.mxu3  ;;  %v1345_v20 = vadd.f32 %v1287_v19, %v7293_v53  ;;  %v2964_v5 = vadd.f32 %v2932_v36, %v6794_v51  ;;  %v5659_v36 = vld [vmem:[%s8523_s0 + $0x130] sm:$0xff] }
 0x223   :  { %v1595_v60 = vadd.f32 %v1537_v54, %v1345_v20  ;;  %v2996_v19 = vmax.f32 %v2964_v5, 0.0  ;;  %v2116_v54 = vld [vmem:[#allocation2 + $0x50] sm:$0xff]  ;;  %v2933_v5 = vmul.f32 %v5659_v36, %v6780_v29 }
 0x225   :  { %v1845_v31 = vadd.f32 %v1787_v34, %v1595_v60  ;;  %5557 = vmatmul.msk.bf16.vlgmr.msra.gmra.mxu2 %vm50_vm0, %v2145_v44  ;;  %v2931_v34 = vmul.f32 %v5657_v6, %v6780_v29  ;;  %v2042_v62 = vpop.f32.mrf.mxu1  ;;  %v3114_v60 = vld [vmem:[#allocation2 + $0x21] sm:$0xff]  ;;  %3028 = vst.msk [vmem:[#allocation2 + $0x51] sm:$0xff] %vm50_vm0, %v2996_v19 }
 0x226   :  { %5597 = vmatmul.msk.bf16.vlgmr.msra.gmra.mxu3 %vm50_vm0, %v2395_v32  ;;  %v1792_v16 = vpop.f32.mrf.mxu0  ;;  %v3113_v32 = vld [vmem:[#allocation2 + $0x19] sm:$0xff] }
 0x227   :  { %v7430_v10 = vadd.f32 %v2037_v39, %v1845_v31  ;;  %v2963_v39 = vadd.f32 %v2931_v34, %v6794_v51  ;;  %v2146_v31 = vpack.c.bf16 %v2116_v54, %v2115_v12  ;;  %v2117_v54 = vld [vmem:[#allocation2 + $0x60] sm:$0xff] }
 0x228   :  { %v1290_v15 = vpop.f32.mrf.mxu2 }
 0x229   :  { %v1540_v53 = vpop.f32.mrf.mxu3  ;;  %v1346_v40 = vadd.f32 %v1290_v15, %v7153_v18  ;;  %v2995_v43 = vmax.f32 %v2963_v39, 0.0 }
 0x22b   :  { %v1596_v0 = vadd.f32 %v1540_v53, %v1346_v40  ;;  %3027 = vst.msk [vmem:[#allocation2 + $0x49] sm:$0xff] %vm50_vm0, %v2995_v43  ;;  %v3144_v53 = vpack.c.bf16 %v3114_v60, %v3113_v32  ;;  %v2368_v32 = vld [vmem:[#allocation2 + $0x69] sm:$0xff] }
 0x22d   :  { %v1846_v17 = vadd.f32 %v1790_v14, %v1596_v0  ;;  %v2396_v14 = vpack.c.bf16 %v2366_v45, %v2365_v38  ;;  %v2045_v61 = vpop.f32.mrf.mxu1  ;;  %v5660_v0 = vld [vmem:[%s8523_s0 + $0x138] sm:$0xff] }
 0x22e   :  { %v1795_v6 = vpop.f32.mrf.mxu0 }
 0x22f   :  { %v7444_v18 = vadd.f32 %v2040_v37, %v1846_v17  ;;  %5638 = vmatmul.msk.bf16.gmra.mxu0 %vm50_vm0, %v7178_v22  ;;  %5710 = vmatmul.msk.bf16.gmra.mxu1 %vm50_vm0, %v3144_v53  ;;  %v2934_v22 = vmul.f32 %v5660_v0, %v6780_v29 }
 0x230   :  { %v1292_v20 = vpop.f32.mrf.mxu2 }
 0x231   :  { %v1542_v44 = vpop.f32.mrf.mxu3  ;;  %v1347_v7 = vadd.f32 %v1292_v20, %v7159_v56  ;;  %v2966_v17 = vadd.f32 %v2934_v22, %v6794_v51  ;;  %v2118_v20 = vld [vmem:[#allocation2 + $0x68] sm:$0xff] }
 0x232   :  { %v2147_v53 = vpack.c.bf16 %v2118_v20, %v2117_v54 }
 0x233   :  { %v1597_v15 = vadd.f32 %v1542_v44, %v1347_v7  ;;  %v2998_v45 = vmax.f32 %v2966_v17, 0.0  ;;  %v2367_v44 = vld [vmem:[#allocation2 + $0x61] sm:$0xff] }
 0x235   :  { %v1847_v40 = vadd.f32 %v1792_v16, %v1597_v15  ;;  %5558 = vmatmul.msk.bf16.gmra.mxu2 %vm50_vm0, %v2146_v31  ;;  %v2047_v43 = vpop.f32.mrf.mxu1  ;;  %v3115_v31 = vld [vmem:[#allocation2 + $0x31] sm:$0xff]  ;;  %3030 = vst.msk [vmem:[#allocation2 + $0x69] sm:$0xff] %vm50_vm0, %v2998_v45 }
 0x236   :  { %5598 = vmatmul.msk.bf16.gmra.mxu3 %vm50_vm0, %v2396_v14  ;;  %v1797_v12 = vpop.f32.mrf.mxu0  ;;  %v3116_v14 = vld [vmem:[#allocation2 + $0x39] sm:$0xff] }
 0x237   :  { %v7453_v37 = vadd.f32 %v2042_v62, %v1847_v40  ;;  %v2965_v62 = vadd.f32 %v2933_v5, %v6794_v51 }
 0x238   :  { %v1295_v34 = vpop.f32.mrf.mxu2 }
 0x239   :  { %v1545_v56 = vpop.f32.mrf.mxu3  ;;  %v1348_v39 = vadd.f32 %v1295_v34, %v7172_v9  ;;  %v2997_v38 = vmax.f32 %v2965_v62, 0.0  ;;  %v3145_v34 = vpack.c.bf16 %v3116_v14, %v3115_v31  ;;  %v5662_v62 = vld [vmem:[%s8523_s0 + $0x148] sm:$0xff]  ;;  %v2369_v31 = vld [vmem:[#allocation2 + $0x79] sm:$0xff] }
 0x23a   :  { %v2370_v14 = vld [vmem:[#allocation2 + $0x81] sm:$0xff] }
 0x23b   :  { %v1598_v16 = vadd.f32 %v1545_v56, %v1348_v39  ;;  %3029 = vst.msk [vmem:[#allocation2 + $0x61] sm:$0xff] %vm50_vm0, %v2997_v38 }
 0x23d   :  { %v1848_v19 = vadd.f32 %v1795_v6, %v1598_v16  ;;  %v2397_v6 = vpack.c.bf16 %v2368_v32, %v2367_v44  ;;  %v2050_v36 = vpop.f32.mrf.mxu1  ;;  %v5661_v16 = vld [vmem:[%s8523_s0 + $0x140] sm:$0xff]  ;;  %v2119_v44 = vld [vmem:[#allocation2 + $0x78] sm:$0xff]  ;;  %v6119_v32 = vld [vmem:[%s8522_s3 + $0x70] sm:$0xff] }
 0x23e   :  { %v1800_v56 = vpop.f32.mrf.mxu0  ;;  %v2935_v17 = vmul.f32 %v5661_v16, %v6780_v29  ;;  %3871 = vmatpush.bf16.msrb.mxu0 %v6119_v32 }
 0x23f   :  { %v7467_v9 = vadd.f32 %v2045_v61, %v1848_v19  ;;  %v6107_v61 = vld [vmem:[%s8522_s3 + $0x10] sm:$0xff]  ;;  %5639 = vmatmul.msk.bf16.gmra.mxu0 %vm50_vm0, %v7208_v46  ;;  %5711 = vmatmul.msk.bf16.gmra.mxu1 %vm50_vm0, %v3145_v34 }
 0x240   :  { %v1297_v60 = vpop.f32.mrf.mxu2  ;;  %3405 = vmatpush.bf16.msrb.mxu2 %v6107_v61  ;;  %v2967_v19 = vadd.f32 %v2935_v17, %v6794_v51  ;;  %v3118_v34 = vld [vmem:[#allocation2 + $0x51] sm:$0xff]  ;;  %v2398_v61 = vpack.c.bf16 %v2370_v14, %v2369_v31 }
 0x241   :  { %v1547_v7 = vpop.f32.mrf.mxu3  ;;  %v1349_v15 = vadd.f32 %v1297_v60, %v7176_v25  ;;  %v6115_v25 = vld [vmem:[%s8522_s3 + $0x50] sm:$0xff] }
 0x242   :  { %3622 = vmatpush.bf16.msrb.mxu3 %v6115_v25  ;;  %v2999_v60 = vmax.f32 %v2967_v19, 0.0 }
 0x243   :  { %v1599_v40 = vadd.f32 %v1547_v7, %v1349_v15  ;;  %v2120_v7 = vld [vmem:[#allocation2 + $0x80] sm:$0xff] }
 0x244   :  { %3031 = vst.msk [vmem:[#allocation2 + $0x79] sm:$0xff] %vm50_vm0, %v2999_v60 }
 0x245   :  { %v1849_v0 = vadd.f32 %v1797_v12, %v1599_v40  ;;  %5559 = vmatmul.msk.bf16.gmra.mxu2 %vm50_vm0, %v2147_v53  ;;  %v2936_v12 = vmul.f32 %v5662_v62, %v6780_v29  ;;  %v2052_v45 = vpop.f32.mrf.mxu1  ;;  %v3117_v40 = vld [vmem:[#allocation2 + $0x49] sm:$0xff] }
 0x246   :  { %5599 = vmatmul.msk.bf16.gmra.mxu3 %vm50_vm0, %v2397_v6  ;;  %v1802_v38 = vpop.f32.mrf.mxu0 }
 0x247   :  { %v7482_v39 = vadd.f32 %v2047_v43, %v1849_v0  ;;  %v2968_v54 = vadd.f32 %v2936_v12, %v6794_v51  ;;  %v2148_v0 = vpack.c.bf16 %v2120_v7, %v2119_v44  ;;  %v5663_v12 = vld [vmem:[%s8523_s0 + $0x150] sm:$0xff]  ;;  %v2122_v7 = vld [vmem:[#allocation2 + $0x98] sm:$0xff] }
 0x248   :  { %v1300_v5 = vpop.f32.mrf.mxu2 }
 0x249   :  { %v1550_v22 = vpop.f32.mrf.mxu3  ;;  %v1350_v46 = vadd.f32 %v1300_v5, %v7196_v21  ;;  %v3000_v21 = vmax.f32 %v2968_v54, 0.0  ;;  %v3146_v5 = vpack.c.bf16 %v3118_v34, %v3117_v40  ;;  %v2937_v54 = vmul.f32 %v5663_v12, %v6780_v29  ;;  %v2621_v40 = vld [vmem:[#allocation2 + $0x92] sm:$0xff] }
 0x24b   :  { %v1600_v43 = vadd.f32 %v1550_v22, %v1350_v46  ;;  %3032 = vst.msk [vmem:[#allocation2 + $0x81] sm:$0xff] %vm50_vm0, %v3000_v21  ;;  %v2121_v21 = vld [vmem:[#allocation2 + $0x90] sm:$0xff] }
 0x24d   :  { %v1850_v20 = vadd.f32 %v1800_v56, %v1600_v43  ;;  %v2055_v16 = vpop.f32.mrf.mxu1  ;;  %v5664_v43 = vld [vmem:[%s8523_s0 + $0x158] sm:$0xff] }
 0x24e   :  { %v1805_v22 = vpop.f32.mrf.mxu0 }
 0x24f   :  { %v7499_v15 = vadd.f32 %v2050_v36, %v1850_v20  ;;  %v6123_v36 = vld [vmem:[%s8522_s3 + $0x90] sm:$0xff]  ;;  %5640 = vmatmul.msk.bf16.gmra.mxu0 %vm50_vm0, %v7226_v30  ;;  %5712 = vmatmul.msk.bf16.gmra.mxu1 %vm50_vm0, %v3146_v5  ;;  %v2938_v30 = vmul.f32 %v5664_v43, %v6780_v29 }
 0x250   :  { %v1302_v53 = vpop.f32.mrf.mxu2  ;;  %4120 = vmatpush.bf16.msrb.mxu1 %v6123_v36 }
 0x251   :  { %v1552_v6 = vpop.f32.mrf.mxu3  ;;  %v1351_v56 = vadd.f32 %v1302_v53, %v7203_v49  ;;  %v2970_v20 = vadd.f32 %v2938_v30, %v6794_v51  ;;  %v2371_v53 = vld [vmem:[#allocation2 + $0x91] sm:$0xff]  ;;  %v5665_v30 = vld [vmem:[%s8523_s0 + $0x160] sm:$0xff] }
 0x253   :  { %v1601_v25 = vadd.f32 %v1552_v6, %v1351_v56  ;;  %v3002_v14 = vmax.f32 %v2970_v20, 0.0  ;;  %v2372_v6 = vld [vmem:[#allocation2 + $0x99] sm:$0xff]  ;;  %v2939_v20 = vmul.f32 %v5665_v30, %v6780_v29 }
 0x255   :  { %v1851_v62 = vadd.f32 %v1802_v38, %v1601_v25  ;;  %5560 = vmatmul.msk.bf16.gmra.mxu2 %vm50_vm0, %v2148_v0  ;;  %v2057_v32 = vpop.f32.mrf.mxu1  ;;  %v3120_v25 = vld [vmem:[#allocation2 + $0x69] sm:$0xff] }
 0x256   :  { %5600 = vmatmul.msk.bf16.gmra.mxu3 %vm50_vm0, %v2398_v61  ;;  %v1807_v44 = vpop.f32.mrf.mxu0  ;;  %v3119_v61 = vld [vmem:[#allocation2 + $0x61] sm:$0xff] }
 0x257   :  { %v7511_v49 = vadd.f32 %v2052_v45, %v1851_v62  ;;  %v2969_v45 = vadd.f32 %v2937_v54, %v6794_v51  ;;  %v2399_v62 = vpack.c.bf16 %v2372_v6, %v2371_v53  ;;  %v2123_v53 = vld [vmem:[#allocation2 + $0xa8] sm:$0xff]  ;;  %v2124_v6 = vld [vmem:[#allocation2 + $0xb0] sm:$0xff] }
 0x258   :  { %v1305_v46 = vpop.f32.mrf.mxu2 }
 0x259   :  { %v1555_v17 = vpop.f32.mrf.mxu3  ;;  %v1352_v19 = vadd.f32 %v1305_v46, %v7220_v63  ;;  %v3001_v31 = vmax.f32 %v2969_v45, 0.0  ;;  %v2622_v63 = vld [vmem:[#allocation2 + $0x9a] sm:$0xff] }
 0x25a   :  { %3034 = vst.msk [vmem:[#allocation2 + $0x99] sm:$0xff] %vm50_vm0, %v3002_v14  ;;  %v2649_v46 = vpack.c.bf16 %v2622_v63, %v2621_v40 }
 0x25b   :  { %v1602_v38 = vadd.f32 %v1555_v17, %v1352_v19  ;;  %3033 = vst.msk [vmem:[#allocation2 + $0x91] sm:$0xff] %vm50_vm0, %v3001_v31  ;;  %v3147_v17 = vpack.c.bf16 %v3120_v25, %v3119_v61  ;;  %v2623_v61 = vld [vmem:[#allocation2 + $0xaa] sm:$0xff] }
 0x25d   :  { %v1852_v60 = vadd.f32 %v1805_v22, %v1602_v38  ;;  %v2149_v22 = vpack.c.bf16 %v2122_v7, %v2121_v21  ;;  %v2060_v43 = vpop.f32.mrf.mxu1  ;;  %v5666_v38 = vld [vmem:[%s8523_s0 + $0x168] sm:$0xff] }
 0x25e   :  { %v1810_v12 = vpop.f32.mrf.mxu0 }
 0x25f   :  { %v7525_v34 = vadd.f32 %v2055_v16, %v1852_v60  ;;  %5641 = vmatmul.msk.bf16.gmra.mxu0 %vm50_vm0, %v2649_v46  ;;  %5713 = vmatmul.msk.bf16.gmra.mxu1 %vm50_vm0, %v3147_v17  ;;  %v2150_v17 = vpack.c.bf16 %v2124_v6, %v2123_v53 }
 0x260   :  { %v1307_v56 = vpop.f32.mrf.mxu2 }
 0x261   :  { %v1557_v0 = vpop.f32.mrf.mxu3  ;;  %v1353_v5 = vadd.f32 %v1307_v56, %v7224_v4  ;;  %v2373_v56 = vld [vmem:[#allocation2 + $0xa9] sm:$0xff] }
 0x263   :  { %v1603_v36 = vadd.f32 %v1557_v0, %v1353_v5  ;;  %v2374_v0 = vld [vmem:[#allocation2 + $0xb1] sm:$0xff] }
 0x265   :  { %v1853_v19 = vadd.f32 %v1807_v44, %v1603_v36  ;;  %5561 = vmatmul.msk.bf16.gmra.mxu2 %vm50_vm0, %v2149_v22  ;;  %v2940_v44 = vmul.f32 %v5666_v38, %v6780_v29  ;;  %v2062_v31 = vpop.f32.mrf.mxu1  ;;  %v3122_v36 = vld [vmem:[#allocation2 + $0x81] sm:$0xff] }
 0x266   :  { %5601 = vmatmul.msk.bf16.gmra.mxu3 %vm50_vm0, %v2399_v62  ;;  %v1812_v7 = vpop.f32.mrf.mxu0  ;;  %v3121_v62 = vld [vmem:[#allocation2 + $0x79] sm:$0xff] }
 0x267   :  { %v7533_v16 = vadd.f32 %v2057_v32, %v1853_v19  ;;  %v2971_v32 = vadd.f32 %v2939_v20, %v6794_v51  ;;  %v2972_v21 = vadd.f32 %v2940_v44, %v6794_v51  ;;  %v5667_v44 = vld [vmem:[%s8523_s0 + $0x170] sm:$0xff] }
 0x268   :  { %v1310_v54 = vpop.f32.mrf.mxu2 }
 0x269   :  { %v1560_v4 = vpop.f32.mrf.mxu3  ;;  %v1354_v45 = vadd.f32 %v1310_v54, %v7238_v1  ;;  %v3003_v40 = vmax.f32 %v2971_v32, 0.0  ;;  %v3004_v63 = vmax.f32 %v2972_v21, 0.0  ;;  %v2624_v1 = vld [vmem:[#allocation2 + $0xb2] sm:$0xff]  ;;  %v2941_v21 = vmul.f32 %v5667_v44, %v6780_v29 }
 0x26a   :  { %v2650_v54 = vpack.c.bf16 %v2624_v1, %v2623_v61 }
 0x26b   :  { %v1604_v60 = vadd.f32 %v1560_v4, %v1354_v45  ;;  %3035 = vst.msk [vmem:[#allocation2 + $0xa9] sm:$0xff] %vm50_vm0, %v3003_v40  ;;  %v3148_v4 = vpack.c.bf16 %v3122_v36, %v3121_v62  ;;  %v2625_v62 = vld [vmem:[#allocation2 + $0xc2] sm:$0xff] }
 0x26c   :  { %3036 = vst.msk [vmem:[#allocation2 + $0xb1] sm:$0xff] %vm50_vm0, %v3004_v63 }
 0x26d   :  { %v1854_v14 = vadd.f32 %v1810_v12, %v1604_v60  ;;  %v2400_v12 = vpack.c.bf16 %v2374_v0, %v2373_v56  ;;  %v2065_v38 = vpop.f32.mrf.mxu1  ;;  %v5668_v60 = vld [vmem:[%s8523_s0 + $0x178] sm:$0xff]  ;;  %v2125_v56 = vld [vmem:[#allocation2 + $0xc0] sm:$0xff]  ;;  %v2126_v0 = vld [vmem:[#allocation2 + $0xc8] sm:$0xff] }
 0x26e   :  { %v1815_v30 = vpop.f32.mrf.mxu0 }
 0x26f   :  { %v7547_v25 = vadd.f32 %v2060_v43, %v1854_v14  ;;  %5642 = vmatmul.msk.bf16.gmra.mxu0 %vm50_vm0, %v2650_v54  ;;  %5714 = vmatmul.msk.bf16.gmra.mxu1 %vm50_vm0, %v3148_v4  ;;  %v2151_v4 = vpack.c.bf16 %v2126_v0, %v2125_v56 }
 0x270   :  { %v1312_v5 = vpop.f32.mrf.mxu2 }
 0x271   :  { %v1562_v22 = vpop.f32.mrf.mxu3  ;;  %v1355_v46 = vadd.f32 %v1312_v5, %v7242_v35  ;;  %v2375_v5 = vld [vmem:[#allocation2 + $0xc1] sm:$0xff] }
 0x273   :  { %v1605_v19 = vadd.f32 %v1562_v22, %v1355_v46  ;;  %v2376_v22 = vld [vmem:[#allocation2 + $0xc9] sm:$0xff] }
 0x275   :  { %v1855_v45 = vadd.f32 %v1812_v7, %v1605_v19  ;;  %5562 = vmatmul.msk.bf16.gmra.mxu2 %vm50_vm0, %v2150_v17  ;;  %v2942_v7 = vmul.f32 %v5668_v60, %v6780_v29  ;;  %v2067_v40 = vpop.f32.mrf.mxu1  ;;  %v3124_v19 = vld [vmem:[#allocation2 + $0x99] sm:$0xff] }
 0x276   :  { %5602 = vmatmul.msk.bf16.gmra.mxu3 %vm50_vm0, %v2400_v12  ;;  %v1817_v6 = vpop.f32.mrf.mxu0  ;;  %v3123_v12 = vld [vmem:[#allocation2 + $0x91] sm:$0xff] }
 0x277   :  { %v7555_v43 = vadd.f32 %v2062_v31, %v1855_v45  ;;  %v2973_v31 = vadd.f32 %v2941_v21, %v6794_v51  ;;  %v2974_v53 = vadd.f32 %v2942_v7, %v6794_v51 }
 0x278   :  { %v1315_v20 = vpop.f32.mrf.mxu2 }
 0x279   :  { %v1565_v35 = vpop.f32.mrf.mxu3  ;;  %v1356_v32 = vadd.f32 %v1315_v20, %v7253_v59  ;;  %v3005_v61 = vmax.f32 %v2973_v31, 0.0  ;;  %v3006_v1 = vmax.f32 %v2974_v53, 0.0  ;;  %v2626_v59 = vld [vmem:[#allocation2 + $0xca] sm:$0xff]  ;;  %v5669_v31 = vld [vmem:[%s8523_s0 + $0x180] sm:$0xff] }
 0x27a   :  { %v2651_v20 = vpack.c.bf16 %v2626_v59, %v2625_v62  ;;  %v5670_v53 = vld [vmem:[%s8523_s0 + $0x188] sm:$0xff]  ;;  %v2127_v62 = vld [vmem:[#allocation2 + $0xd8] sm:$0xff]  ;;  %v2128_v59 = vld [vmem:[#allocation2 + $0xe0] sm:$0xff] }
 0x27b   :  { %v1606_v14 = vadd.f32 %v1565_v35, %v1356_v32  ;;  %3037 = vst.msk [vmem:[#allocation2 + $0xc1] sm:$0xff] %vm50_vm0, %v3005_v61  ;;  %v3149_v35 = vpack.c.bf16 %v3124_v19, %v3123_v12  ;;  %v2944_v56 = vmul.f32 %v5670_v53, %v6780_v29  ;;  %v2377_v12 = vld [vmem:[#allocation2 + $0xd9] sm:$0xff]  ;;  %v2378_v19 = vld [vmem:[#allocation2 + $0xe1] sm:$0xff] }
 0x27c   :  { %3038 = vst.msk [vmem:[#allocation2 + $0xc9] sm:$0xff] %vm50_vm0, %v3006_v1 }
 0x27d   :  { %v1856_v63 = vadd.f32 %v1815_v30, %v1606_v14  ;;  %v2401_v30 = vpack.c.bf16 %v2376_v22, %v2375_v5  ;;  %v2070_v60 = vpop.f32.mrf.mxu1  ;;  %v2976_v61 = vadd.f32 %v2944_v56, %v6794_v51 }
 0x27e   :  { %v1820_v44 = vpop.f32.mrf.mxu0 }
 0x27f   :  { %v7569_v36 = vadd.f32 %v2065_v38, %v1856_v63  ;;  %v6106_v38 = vld [vmem:[%s8522_s3 + $0x8] sm:$0xff]  ;;  %5643 = vmatmul.msk.bf16.gmra.mxu0 %vm50_vm0, %v2651_v20  ;;  %5715 = vmatmul.msk.bf16.gmra.mxu1 %vm50_vm0, %v3149_v35  ;;  %v2943_v63 = vmul.f32 %v5669_v31, %v6780_v29 }
 0x280   :  { %v1317_v46 = vpop.f32.mrf.mxu2  ;;  %3406 = vmatpush.bf16.msrb.mxu2 %v6106_v38  ;;  %v3125_v35 = vld [vmem:[#allocation2 + $0xa9] sm:$0xff]  ;;  %v2152_v38 = vpack.c.bf16 %v2128_v59, %v2127_v62 }
 0x281   :  { %v1567_v17 = vpop.f32.mrf.mxu3  ;;  %v1357_v54 = vadd.f32 %v1317_v46, %v7257_v50  ;;  %v6114_v50 = vld [vmem:[%s8522_s3 + $0x48] sm:$0xff]  ;;  %v2975_v0 = vadd.f32 %v2943_v63, %v6794_v51 }
 0x282   :  { %3623 = vmatpush.bf16.msrb.mxu3 %v6114_v50  ;;  %v2402_v50 = vpack.c.bf16 %v2378_v19, %v2377_v12 }
 0x283   :  { %v1607_v45 = vadd.f32 %v1567_v17, %v1357_v54  ;;  %v3007_v46 = vmax.f32 %v2975_v0, 0.0  ;;  %v3008_v17 = vmax.f32 %v2976_v61, 0.0  ;;  %v2628_v54 = vld [vmem:[#allocation2 + $0xe2] sm:$0xff]  ;;  %v5671_v0 = vld [vmem:[%s8523_s0 + $0x190] sm:$0xff]  ;;  %v5672_v61 = vld [vmem:[%s8523_s0 + $0x198] sm:$0xff] }
 0x284   :  { %v2946_v62 = vmul.f32 %v5672_v61, %v6780_v29 }
 0x285   :  { %v1857_v32 = vadd.f32 %v1817_v6, %v1607_v45  ;;  %5563 = vmatmul.msk.bf16.gmra.mxu2 %vm50_vm0, %v2151_v4  ;;  %v2072_v5 = vpop.f32.mrf.mxu1  ;;  %v6118_v4 = vld [vmem:[%s8522_s3 + $0x68] sm:$0xff] }
 0x286   :  { %5603 = vmatmul.msk.bf16.gmra.mxu3 %vm50_vm0, %v2401_v30  ;;  %v1822_v1 = vpop.f32.mrf.mxu0  ;;  %3872 = vmatpush.bf16.msrb.mxu0 %v6118_v4 }
 0x287   :  { %v7583_v21 = vadd.f32 %v2067_v40, %v1857_v32 }
 0x288   :  { %v1320_v7 = vpop.f32.mrf.mxu2 }
 0x289   :  { %v1570_v14 = vpop.f32.mrf.mxu3  ;;  %v1358_v6 = vadd.f32 %v1320_v7, %v7273_v47  ;;  %v2627_v47 = vld [vmem:[#allocation2 + $0xda] sm:$0xff] }
 0x28a   :  { %3039 = vst.msk [vmem:[#allocation2 + $0xd9] sm:$0xff] %vm50_vm0, %v3007_v46  ;;  %v2978_v46 = vadd.f32 %v2946_v62, %v6794_v51  ;;  %v5673_v62 = vld [vmem:[%s8523_s0 + $0x1a0] sm:$0xff] }
 0x28b   :  { %v1608_v40 = vadd.f32 %v1570_v14, %v1358_v6  ;;  %3040 = vst.msk [vmem:[#allocation2 + $0xe1] sm:$0xff] %vm50_vm0, %v3008_v17  ;;  %v2652_v14 = vpack.c.bf16 %v2628_v54, %v2627_v47  ;;  %v2129_v47 = vld [vmem:[#allocation2 + $0xf0] sm:$0xff]  ;;  %v2130_v54 = vld [vmem:[#allocation2 + $0xf8] sm:$0xff] }
 0x28d   :  { %v1858_v22 = vadd.f32 %v1820_v44, %v1608_v40  ;;  %v3126_v44 = vld [vmem:[#allocation2 + $0xb1] sm:$0xff]  ;;  %v2075_v6 = vpop.f32.mrf.mxu1 }
 0x28e   :  { %v3150_v31 = vpack.c.bf16 %v3126_v44, %v3125_v35  ;;  %v1825_v53 = vpop.f32.mrf.mxu0  ;;  %v2380_v35 = vld [vmem:[#allocation2 + $0xf9] sm:$0xff] }
 0x28f   :  { %v7600_v30 = vadd.f32 %v2070_v60, %v1858_v22  ;;  %5644 = vmatmul.msk.bf16.gmra.mxu0 %vm50_vm0, %v2652_v14  ;;  %v2945_v22 = vmul.f32 %v5671_v0, %v6780_v29  ;;  %v2630_v44 = vld [vmem:[#allocation2 + $0xfa] sm:$0xff]  ;;  %v3128_v14 = vld [vmem:[#allocation2 + $0xc9] sm:$0xff] }
 0x290   :  { %v1322_v45 = vpop.f32.mrf.mxu2  ;;  %5716 = vmatmul.msk.bf16.gmra.mxu1 %vm50_vm0, %v3150_v31 }
 0x291   :  { %v1572_v20 = vpop.f32.mrf.mxu3  ;;  %v1359_v32 = vadd.f32 %v1322_v45, %v7280_v11  ;;  %v6122_v11 = vld [vmem:[%s8522_s3 + $0x88] sm:$0xff]  ;;  %v3010_v45 = vmax.f32 %v2978_v46, 0.0  ;;  %v2947_v46 = vmul.f32 %v5673_v62, %v6780_v29 }
 0x292   :  { %4121 = vmatpush.bf16.msrb.mxu1 %v6122_v11 }
 0x293   :  { %v1609_v7 = vadd.f32 %v1572_v20, %v1359_v32  ;;  %v2379_v20 = vld [vmem:[#allocation2 + $0xf1] sm:$0xff] }
 0x295   :  { %v1859_v63 = vadd.f32 %v1822_v1, %v1609_v7  ;;  %5564 = vmatmul.msk.bf16.gmra.mxu2 %vm50_vm0, %v2152_v38  ;;  %v2077_v12 = vpop.f32.mrf.mxu1  ;;  %v3127_v7 = vld [vmem:[#allocation2 + $0xc1] sm:$0xff] }
 0x296   :  { %5604 = vmatmul.msk.bf16.gmra.mxu3 %vm50_vm0, %v2402_v50  ;;  %v1827_v17 = vpop.f32.mrf.mxu0 }
 0x297   :  { %v7611_v60 = vadd.f32 %v2072_v5, %v1859_v63  ;;  %v2977_v5 = vadd.f32 %v2945_v22, %v6794_v51  ;;  %v2403_v63 = vpack.c.bf16 %v2380_v35, %v2379_v20  ;;  %v2131_v20 = vld [vmem:[#allocation2 + $0x108] sm:$0xff] }
 0x298   :  { %v1325_v56 = vpop.f32.mrf.mxu2 }
 0x299   :  { %v1575_v40 = vpop.f32.mrf.mxu3  ;;  %v1360_v1 = vadd.f32 %v1325_v56, %v7291_v48  ;;  %v3009_v4 = vmax.f32 %v2977_v5, 0.0  ;;  %v2629_v48 = vld [vmem:[#allocation2 + $0xf2] sm:$0xff] }
 0x29a   :  { %3042 = vst.msk [vmem:[#allocation2 + $0xf9] sm:$0xff] %vm50_vm0, %v3010_v45  ;;  %v2653_v56 = vpack.c.bf16 %v2630_v44, %v2629_v48  ;;  %v2132_v44 = vld [vmem:[#allocation2 + $0x110] sm:$0xff] }
 0x29b   :  { %v1610_v59 = vadd.f32 %v1575_v40, %v1360_v1  ;;  %3041 = vst.msk [vmem:[#allocation2 + $0xf1] sm:$0xff] %vm50_vm0, %v3009_v4  ;;  %v3151_v40 = vpack.c.bf16 %v3128_v14, %v3127_v7 }
 0x29d   :  { %v1860_v19 = vadd.f32 %v1825_v53, %v1610_v59  ;;  %v2153_v53 = vpack.c.bf16 %v2130_v54, %v2129_v47  ;;  %v7629_v61 = vpop.f32.mrf.mxu1  ;;  %v5674_v59 = vld [vmem:[%s8523_s0 + $0x1a8] sm:$0xff] }
 0x29e   :  { %v2751_v0 = vpop.f32.mrf.mxu0 }
 0x29f   :  { %v7625_v32 = vadd.f32 %v2075_v6, %v1860_v19  ;;  %5645 = vmatmul.msk.bf16.gmra.mxu0 %vm50_vm0, %v2653_v56  ;;  %v2154_v56 = vpack.c.bf16 %v2132_v44, %v2131_v20 }
 0x2a0   :  { %v1327_v38 = vpop.f32.mrf.mxu2  ;;  %5717 = vmatmul.msk.bf16.gmra.mxu1 %vm50_vm0, %v3151_v40 }
 0x2a1   :  { %v1577_v50 = vpop.f32.mrf.mxu3  ;;  %v1361_v31 = vadd.f32 %v1327_v38, %v7295_v13  ;;  %v2381_v38 = vld [vmem:[#allocation2 + $0x109] sm:$0xff] }
 0x2a3   :  { %v1611_v11 = vadd.f32 %v1577_v50, %v1361_v31  ;;  %v2382_v50 = vld [vmem:[#allocation2 + $0x111] sm:$0xff] }
 0x2a4   :  { %v2632_v31 = vld [vmem:[#allocation2 + $0x112] sm:$0xff]  ;;  %v2404_v40 = vpack.c.bf16 %v2382_v50, %v2381_v38  ;;  %v2133_v38 = vld [vmem:[#allocation2 + $0x120] sm:$0xff] }
 0x2a5   :  { %v1861_v1 = vadd.f32 %v1827_v17, %v1611_v11  ;;  %5565 = vmatmul.msk.bf16.gmra.mxu2 %vm50_vm0, %v2153_v53  ;;  %v2948_v17 = vmul.f32 %v5674_v59, %v6780_v29  ;;  %v7648_v4 = vpop.f32.mrf.mxu1  ;;  %v3129_v53 = vld [vmem:[#allocation2 + $0xd9] sm:$0xff] }
 0x2a6   :  { %5605 = vmatmul.msk.bf16.gmra.mxu3 %vm50_vm0, %v2403_v63  ;;  %v2753_v54 = vpop.f32.mrf.mxu0  ;;  %v3130_v63 = vld [vmem:[#allocation2 + $0xe1] sm:$0xff] }
 0x2a7   :  { %v7635_v6 = vadd.f32 %v2077_v12, %v1861_v1  ;;  %v2979_v12 = vadd.f32 %v2947_v46, %v6794_v51  ;;  %v2980_v47 = vadd.f32 %v2948_v17, %v6794_v51  ;;  %v5675_v46 = vld [vmem:[%s8523_s0 + $0x1b0] sm:$0xff]  ;;  %v5676_v17 = vld [vmem:[%s8523_s0 + $0x1b8] sm:$0xff] }
 0x2a8   :  { %v2251_v13 = vpop.f32.mrf.mxu2 }
 0x2a9   :  { %v2501_v22 = vpop.f32.mrf.mxu3  ;;  %v2331_v5 = vadd.f32 %v2251_v13, %v7304_v55  ;;  %v3011_v35 = vmax.f32 %v2979_v12, 0.0  ;;  %v3012_v48 = vmax.f32 %v2980_v47, 0.0  ;;  %v2631_v55 = vld [vmem:[#allocation2 + $0x10a] sm:$0xff]  ;;  %v3152_v13 = vpack.c.bf16 %v3130_v63, %v3129_v53 }
 0x2aa   :  { %v2654_v1 = vpack.c.bf16 %v2632_v31, %v2631_v55  ;;  %v2949_v12 = vmul.f32 %v5675_v46, %v6780_v29  ;;  %v2950_v47 = vmul.f32 %v5676_v17, %v6780_v29  ;;  %v2384_v31 = vld [vmem:[#allocation2 + $0x129] sm:$0xff] }
 0x2ab   :  { %v2581_v19 = vadd.f32 %v2501_v22, %v2331_v5  ;;  %3043 = vst.msk [vmem:[#allocation2 + $0x109] sm:$0xff] %vm50_vm0, %v3011_v35 }
 0x2ac   :  { %3044 = vst.msk [vmem:[#allocation2 + $0x111] sm:$0xff] %vm50_vm0, %v3012_v48  ;;  %v2982_v20 = vadd.f32 %v2950_v47, %v6794_v51 }
 0x2ad   :  { %v2831_v45 = vadd.f32 %v2751_v0, %v2581_v19  ;;  %v7656_v62 = vpop.f32.mrf.mxu1 }
 0x2ae   :  { %v2756_v22 = vpop.f32.mrf.mxu0  ;;  %v3014_v55 = vmax.f32 %v2982_v20, 0.0 }
 0x2af   :  { %2863 = vst [vmem:[%s8526_s4] sm:$0xff] %v2831_v45  ;;  %5646 = vmatmul.msk.bf16.gmra.mxu0 %vm50_vm0, %v2654_v1  ;;  %v2981_v45 = vadd.f32 %v2949_v12, %v6794_v51 }
 0x2b0   :  { %v2253_v7 = vpop.f32.mrf.mxu2  ;;  %5718 = vmatmul.msk.bf16.gmra.mxu1 %vm50_vm0, %v3152_v13 }
 0x2b1   :  { %v2503_v14 = vpop.f32.mrf.mxu3  ;;  %v2332_v11 = vadd.f32 %v2253_v7, %v7310_v57  ;;  %v3013_v50 = vmax.f32 %v2981_v45, 0.0  ;;  %v2134_v7 = vld [vmem:[#allocation2 + $0x128] sm:$0xff] }
 0x2b2   :  { %v2155_v1 = vpack.c.bf16 %v2134_v7, %v2133_v38  ;;  %v5678_v45 = vld [vmem:[%s8523_s0 + $0x1c8] sm:$0xff] }
 0x2b3   :  { %v2582_v0 = vadd.f32 %v2503_v14, %v2332_v11  ;;  %v2383_v14 = vld [vmem:[#allocation2 + $0x121] sm:$0xff]  ;;  %v2634_v11 = vld [vmem:[#allocation2 + $0x12a] sm:$0xff] }
 0x2b4   :  { %v2405_v13 = vpack.c.bf16 %v2384_v31, %v2383_v14 }
 0x2b5   :  { %v2832_v59 = vadd.f32 %v2753_v54, %v2582_v0  ;;  %5566 = vmatmul.msk.bf16.gmra.mxu2 %vm50_vm0, %v2154_v56  ;;  %v7676_v48 = vpop.f32.mrf.mxu1  ;;  %v3131_v56 = vld [vmem:[#allocation2 + $0xf1] sm:$0xff] }
 0x2b6   :  { %5606 = vmatmul.msk.bf16.gmra.mxu3 %vm50_vm0, %v2404_v40  ;;  %v2758_v35 = vpop.f32.mrf.mxu0  ;;  %v3132_v40 = vld [vmem:[#allocation2 + $0xf9] sm:$0xff] }
 0x2b7   :  { %2864 = vst [vmem:[%s8526_s4 + $0x8] sm:$0xff] %v2832_v59 }
 0x2b8   :  { %v2256_v57 = vpop.f32.mrf.mxu2 }
 0x2b9   :  { %v2506_v5 = vpop.f32.mrf.mxu3  ;;  %v2333_v19 = vadd.f32 %v2256_v57, %v7313_v23  ;;  %v2633_v23 = vld [vmem:[#allocation2 + $0x122] sm:$0xff]  ;;  %v3153_v57 = vpack.c.bf16 %v3132_v40, %v3131_v56  ;;  %v2635_v40 = vld [vmem:[#allocation2 + $0x13a] sm:$0xff] }
 0x2ba   :  { %3045 = vst.msk [vmem:[#allocation2 + $0x121] sm:$0xff] %vm50_vm0, %v3013_v50  ;;  %v2655_v59 = vpack.c.bf16 %v2634_v11, %v2633_v23  ;;  %v2135_v23 = vld [vmem:[#allocation2 + $0x138] sm:$0xff] }
 0x2bb   :  { %v2583_v54 = vadd.f32 %v2506_v5, %v2333_v19  ;;  %3046 = vst.msk [vmem:[#allocation2 + $0x129] sm:$0xff] %vm50_vm0, %v3014_v55  ;;  %v6113_v19 = vld [vmem:[%s8522_s3 + $0x40] sm:$0xff] }
 0x2bc   :  { %3624 = vmatpush.bf16.msrb.mxu3 %v6113_v19  ;;  %v2385_v11 = vld [vmem:[#allocation2 + $0x139] sm:$0xff] }
 0x2bd   :  { %v2833_v44 = vadd.f32 %v2756_v22, %v2583_v54  ;;  %v7684_v46 = vpop.f32.mrf.mxu1  ;;  %v5677_v54 = vld [vmem:[%s8523_s0 + $0x1c0] sm:$0xff] }
 0x2be   :  { %v2761_v5 = vpop.f32.mrf.mxu0 }
 0x2bf   :  { %2865 = vst [vmem:[%s8526_s4 + $0x10] sm:$0xff] %v2833_v44  ;;  %5647 = vmatmul.msk.bf16.gmra.mxu0 %vm50_vm0, %v2655_v59  ;;  %v2952_v44 = vmul.f32 %v5678_v45, %v6780_v29  ;;  %v3133_v59 = vld [vmem:[#allocation2 + $0x109] sm:$0xff] }
 0x2c0   :  { %v2258_v53 = vpop.f32.mrf.mxu2  ;;  %5719 = vmatmul.msk.bf16.gmra.mxu1 %vm50_vm0, %v3153_v57  ;;  %v3134_v57 = vld [vmem:[#allocation2 + $0x111] sm:$0xff] }
 0x2c1   :  { %v2508_v63 = vpop.f32.mrf.mxu3  ;;  %v2334_v0 = vadd.f32 %v2258_v53, %v7326_v27  ;;  %v6105_v27 = vld [vmem:[%s8522_s3] sm:$0xff]  ;;  %v2984_v14 = vadd.f32 %v2952_v44, %v6794_v51 }
 0x2c2   :  { %3407 = vmatpush.bf16.msrb.mxu2 %v6105_v27 }
 0x2c3   :  { %v2584_v22 = vadd.f32 %v2508_v63, %v2334_v0  ;;  %v2136_v63 = vld [vmem:[#allocation2 + $0x140] sm:$0xff]  ;;  %v3016_v56 = vmax.f32 %v2984_v14, 0.0 }
 0x2c4   :  { %v6117_v0 = vld [vmem:[%s8522_s3 + $0x60] sm:$0xff] }
 0x2c5   :  { %v2834_v17 = vadd.f32 %v2758_v35, %v2584_v22  ;;  %5567 = vmatmul.msk.bf16.gmra.mxu2 %vm50_vm0, %v2155_v1  ;;  %v2951_v35 = vmul.f32 %v5677_v54, %v6780_v29  ;;  %v7709_v7 = vpop.f32.mrf.mxu1  ;;  %v2636_v22 = vld [vmem:[#allocation2 + $0x142] sm:$0xff]  ;;  %3873 = vmatpush.bf16.msrb.mxu0 %v6117_v0 }
 0x2c6   :  { %5607 = vmatmul.msk.bf16.gmra.mxu3 %vm50_vm0, %v2405_v13  ;;  %v2763_v55 = vpop.f32.mrf.mxu0 }
 0x2c7   :  { %2866 = vst [vmem:[%s8526_s4 + $0x18] sm:$0xff] %v2834_v17  ;;  %v2983_v50 = vadd.f32 %v2951_v35, %v6794_v51  ;;  %v2156_v17 = vpack.c.bf16 %v2136_v63, %v2135_v23 }
 0x2c8   :  { %v2261_v12 = vpop.f32.mrf.mxu2 }
 0x2c9   :  { %v2511_v47 = vpop.f32.mrf.mxu3  ;;  %v2335_v20 = vadd.f32 %v2261_v12, %v7332_v24  ;;  %v3015_v53 = vmax.f32 %v2983_v50, 0.0  ;;  %v2386_v24 = vld [vmem:[#allocation2 + $0x141] sm:$0xff]  ;;  %v2656_v12 = vpack.c.bf16 %v2636_v22, %v2635_v40  ;;  %v5680_v50 = vld [vmem:[%s8523_s0 + $0x1d8] sm:$0xff]  ;;  %v2137_v40 = vld [vmem:[#allocation2 + $0x150] sm:$0xff] }
 0x2ca   :  { %v2406_v27 = vpack.c.bf16 %v2386_v24, %v2385_v11  ;;  %3048 = vst.msk [vmem:[#allocation2 + $0x141] sm:$0xff] %vm50_vm0, %v3016_v56  ;;  %v2387_v22 = vld [vmem:[#allocation2 + $0x151] sm:$0xff] }
 0x2cb   :  { %v2585_v38 = vadd.f32 %v2511_v47, %v2335_v20  ;;  %3047 = vst.msk [vmem:[#allocation2 + $0x139] sm:$0xff] %vm50_vm0, %v3015_v53  ;;  %v3154_v47 = vpack.c.bf16 %v3134_v57, %v3133_v59  ;;  %v2637_v59 = vld [vmem:[#allocation2 + $0x152] sm:$0xff] }
 0x2cd   :  { %v2835_v31 = vadd.f32 %v2761_v5, %v2585_v38  ;;  %v7721_v45 = vpop.f32.mrf.mxu1  ;;  %v5679_v38 = vld [vmem:[%s8523_s0 + $0x1d0] sm:$0xff] }
 0x2ce   :  { %v2766_v54 = vpop.f32.mrf.mxu0  ;;  %v2953_v14 = vmul.f32 %v5679_v38, %v6780_v29 }
 0x2cf   :  { %2867 = vst [vmem:[%s8526_s4 + $0x20] sm:$0xff] %v2835_v31  ;;  %5648 = vmatmul.msk.bf16.gmra.mxu0 %vm50_vm0, %v2656_v12  ;;  %v2954_v31 = vmul.f32 %v5680_v50, %v6780_v29 }
 0x2d0   :  { %v2263_v1 = vpop.f32.mrf.mxu2  ;;  %5720 = vmatmul.msk.bf16.gmra.mxu1 %vm50_vm0, %v3154_v47  ;;  %v2985_v53 = vadd.f32 %v2953_v14, %v6794_v51 }
 0x2d1   :  { %v2513_v13 = vpop.f32.mrf.mxu3  ;;  %v2336_v5 = vadd.f32 %v2263_v1, %v7342_v33  ;;  %v6121_v33 = vld [vmem:[%s8522_s3 + $0x80] sm:$0xff]  ;;  %v2986_v63 = vadd.f32 %v2954_v31, %v6794_v51 }
 0x2d2   :  { %4122 = vmatpush.bf16.msrb.mxu1 %v6121_v33  ;;  %v3017_v0 = vmax.f32 %v2985_v53, 0.0 }
 0x2d3   :  { %v2586_v19 = vadd.f32 %v2513_v13, %v2336_v5  ;;  %v3018_v1 = vmax.f32 %v2986_v63, 0.0  ;;  %v2138_v13 = vld [vmem:[#allocation2 + $0x158] sm:$0xff]  ;;  %v5681_v63 = vld [vmem:[%s8523_s0 + $0x1e0] sm:$0xff] }
 0x2d4   :  { %3049 = vst.msk [vmem:[#allocation2 + $0x151] sm:$0xff] %vm50_vm0, %v3017_v0  ;;  %v2157_v47 = vpack.c.bf16 %v2138_v13, %v2137_v40  ;;  %v2955_v40 = vmul.f32 %v5681_v63, %v6780_v29  ;;  %v3138_v63 = vld [vmem:[#allocation2 + $0x141] sm:$0xff] }
 0x2d5   :  { %v2836_v20 = vadd.f32 %v2763_v55, %v2586_v19  ;;  %5568 = vmatmul.msk.bf16.gmra.mxu2 %vm50_vm0, %v2156_v17  ;;  %v7744_v24 = vpop.f32.mrf.mxu1  ;;  %v2638_v17 = vld [vmem:[#allocation2 + $0x15a] sm:$0xff]  ;;  %v3136_v19 = vld [vmem:[#allocation2 + $0x129] sm:$0xff] }
 0x2d6   :  { %5608 = vmatmul.msk.bf16.gmra.mxu3 %vm50_vm0, %v2406_v27  ;;  %v2768_v11 = vpop.f32.mrf.mxu0  ;;  %v3135_v27 = vld [vmem:[#allocation2 + $0x121] sm:$0xff]  ;;  %v2657_v33 = vpack.c.bf16 %v2638_v17, %v2637_v59 }
 0x2d7   :  { %2868 = vst [vmem:[%s8526_s4 + $0x28] sm:$0xff] %v2836_v20  ;;  %v2139_v17 = vld [vmem:[#allocation2 + $0x168] sm:$0xff] }
 0x2d8   :  { %v2266_v35 = vpop.f32.mrf.mxu2 }
 0x2d9   :  { %v2516_v44 = vpop.f32.mrf.mxu3  ;;  %v2337_v55 = vadd.f32 %v2266_v35, %v7345_v52  ;;  %v2388_v52 = vld [vmem:[#allocation2 + $0x159] sm:$0xff]  ;;  %v3155_v35 = vpack.c.bf16 %v3136_v19, %v3135_v27 }
 0x2da   :  { %3050 = vst.msk [vmem:[#allocation2 + $0x159] sm:$0xff] %vm50_vm0, %v3018_v1  ;;  %v2141_v27 = vld [vmem:[#allocation2 + $0x180] sm:$0xff] }
 0x2db   :  { %v2587_v23 = vadd.f32 %v2516_v44, %v2337_v55  ;;  %v5684_v55 = vld [vmem:[%s8523_s0 + $0x1f8] sm:$0xff] }
 0x2dc   :  { %v2958_v53 = vmul.f32 %v5684_v55, %v6780_v29  ;;  %v2392_v55 = vld [vmem:[#allocation2 + $0x189] sm:$0xff] }
 0x2dd   :  { %v2837_v56 = vadd.f32 %v2766_v54, %v2587_v23  ;;  %v2407_v54 = vpack.c.bf16 %v2388_v52, %v2387_v22  ;;  %v7752_v38 = vpop.f32.mrf.mxu1  ;;  %v2987_v52 = vadd.f32 %v2955_v40, %v6794_v51 }
 0x2de   :  { %v2771_v44 = vpop.f32.mrf.mxu0  ;;  %v2990_v13 = vadd.f32 %v2958_v53, %v6794_v51  ;;  %v3137_v53 = vld [vmem:[#allocation2 + $0x139] sm:$0xff] }
 0x2df   :  { %2869 = vst [vmem:[%s8526_s4 + $0x30] sm:$0xff] %v2837_v56  ;;  %5649 = vmatmul.msk.bf16.gmra.mxu0 %vm50_vm0, %v2657_v33  ;;  %v2140_v33 = vld [vmem:[#allocation2 + $0x170] sm:$0xff] }
 0x2e0   :  { %v2268_v57 = vpop.f32.mrf.mxu2  ;;  %5721 = vmatmul.msk.bf16.gmra.mxu1 %vm50_vm0, %v3155_v35  ;;  %v2389_v35 = vld [vmem:[#allocation2 + $0x169] sm:$0xff] }
 0x2e1   :  { %v2518_v5 = vpop.f32.mrf.mxu3  ;;  %v2338_v12 = vadd.f32 %v2268_v57, %v7361_v41  ;;  %v5683_v41 = vld [vmem:[%s8523_s0 + $0x1f0] sm:$0xff] }
 0x2e2   :  { %v2957_v23 = vmul.f32 %v5683_v41, %v6780_v29 }
 0x2e3   :  { %v2588_v20 = vadd.f32 %v2518_v5, %v2338_v12 }
 0x2e4   :  { %v2989_v1 = vadd.f32 %v2957_v23, %v6794_v51 }
 0x2e5   :  { %v2838_v50 = vadd.f32 %v2768_v11, %v2588_v20  ;;  %5569 = vmatmul.msk.bf16.gmra.mxu2 %vm50_vm0, %v2157_v47  ;;  %v5682_v11 = vld [vmem:[%s8523_s0 + $0x1e8] sm:$0xff]  ;;  %v7782_v5 = vpop.f32.mrf.mxu1  ;;  %v3019_v20 = vmax.f32 %v2987_v52, 0.0 }
 0x2e6   :  { %5609 = vmatmul.msk.bf16.gmra.mxu3 %vm50_vm0, %v2407_v54  ;;  %v2956_v0 = vmul.f32 %v5682_v11, %v6780_v29  ;;  %v2773_v57 = vpop.f32.mrf.mxu0  ;;  %v3021_v19 = vmax.f32 %v2989_v1, 0.0  ;;  %v2142_v47 = vld [vmem:[#allocation2 + $0x188] sm:$0xff] }
 0x2e7   :  { %2870 = vst [vmem:[%s8526_s4 + $0x38] sm:$0xff] %v2838_v50  ;;  %v2391_v54 = vld [vmem:[#allocation2 + $0x181] sm:$0xff]  ;;  %v2390_v50 = vld [vmem:[#allocation2 + $0x171] sm:$0xff] }
 0x2e8   :  { %v2271_v14 = vpop.f32.mrf.mxu2  ;;  %v2988_v59 = vadd.f32 %v2956_v0, %v6794_v51  ;;  %v2641_v29 = vld [vmem:[#allocation2 + $0x182] sm:$0xff]  ;;  %v2639_v51 = vld [vmem:[#allocation2 + $0x16a] sm:$0xff]  ;;  %v2408_v40 = vpack.c.bf16 %v2390_v50, %v2389_v35 }
 0x2e9   :  { %v2521_v31 = vpop.f32.mrf.mxu3  ;;  %v2339_v56 = vadd.f32 %v2271_v14, %v7367_v8  ;;  %v3022_v8 = vmax.f32 %v2990_v13, 0.0  ;;  %3053 = vst.msk [vmem:[#allocation2 + $0x181] sm:$0xff] %vm50_vm0, %v3021_v19  ;;  %v2642_v14 = vld [vmem:[#allocation2 + $0x18a] sm:$0xff]  ;;  %v3156_v13 = vpack.c.bf16 %v3138_v63, %v3137_v53 }
 0x2ea   :  { %v3020_v41 = vmax.f32 %v2988_v59, 0.0  ;;  %3051 = vst.msk [vmem:[#allocation2 + $0x169] sm:$0xff] %vm50_vm0, %v3019_v20  ;;  %v3139_v50 = vld [vmem:[#allocation2 + $0x151] sm:$0xff]  ;;  %v2659_v53 = vpack.c.bf16 %v2642_v14, %v2641_v29 }
 0x2eb   :  { %v2589_v22 = vadd.f32 %v2521_v31, %v2339_v56  ;;  %3054 = vst.msk [vmem:[#allocation2 + $0x189] sm:$0xff] %vm50_vm0, %v3022_v8  ;;  %v2158_v56 = vpack.c.bf16 %v2140_v33, %v2139_v17 }
 0x2ed   :  { %v2839_v12 = vadd.f32 %v2771_v44, %v2589_v22  ;;  %v2640_v44 = vld [vmem:[#allocation2 + $0x172] sm:$0xff]  ;;  %v7792_v52 = vpop.f32.mrf.mxu1 }
 0x2ee   :  { %3052 = vst.msk [vmem:[#allocation2 + $0x171] sm:$0xff] %vm50_vm0, %v3020_v41  ;;  %v2658_v1 = vpack.c.bf16 %v2640_v44, %v2639_v51  ;;  %v2776_v22 = vpop.f32.mrf.mxu0  ;;  %v3140_v41 = vld [vmem:[#allocation2 + $0x159] sm:$0xff] }
 0x2ef   :  { %2871 = vst [vmem:[%s8526_s4 + $0x40] sm:$0xff] %v2839_v12 }
 0x2f0   :  { %v2273_v31 = vpop.f32.mrf.mxu2  ;;  %5650 = vmatmul.msk.bf16.gmra.mxu0 %vm50_vm0, %v2658_v1  ;;  %5722 = vmatmul.msk.bf16.gmra.mxu1 %vm50_vm0, %v3156_v13  ;;  %v2143_v1 = vld [vmem:[#allocation2 + $0x198] sm:$0xff]  ;;  %v2144_v13 = vld [vmem:[#allocation2 + $0x1a0] sm:$0xff] }
 0x2f1   :  { %v2523_v23 = vpop.f32.mrf.mxu3  ;;  %v2340_v11 = vadd.f32 %v2273_v31, %v7374_v26  ;;  %v2159_v31 = vpack.c.bf16 %v2142_v47, %v2141_v27  ;;  %v6132_v27 = vld [vmem:[%s8522_s3 + $0xd8] sm:$0xff] }
 0x2f2   :  { %4617 = vmatpush.bf16.msra.mxu3 %v6132_v27 }
 0x2f3   :  { %v2590_v0 = vadd.f32 %v2523_v23, %v2340_v11  ;;  %v2409_v23 = vpack.c.bf16 %v2392_v55, %v2391_v54 }
 0x2f5   :  { %v2840_v59 = vadd.f32 %v2773_v57, %v2590_v0  ;;  %5570 = vmatmul.msk.bf16.gmra.mxu2 %vm50_vm0, %v2158_v56  ;;  %v7802_v20 = vpop.f32.mrf.mxu1 }
 0x2f6   :  { %5610 = vmatmul.msk.bf16.gmra.mxu3 %vm50_vm0, %v2408_v40  ;;  %v2778_v12 = vpop.f32.mrf.mxu0 }
 0x2f7   :  { %2872 = vst [vmem:[%s8526_s4 + $0x48] sm:$0xff] %v2840_v59  ;;  %v2394_v59 = vld [vmem:[#allocation2 + $0x1a1] sm:$0xff] }
 0x2f8   :  { %v2276_v26 = vpop.f32.mrf.mxu2 }
 0x2f9   :  { %v2526_v17 = vpop.f32.mrf.mxu3  ;;  %v2341_v19 = vadd.f32 %v2276_v26, %v7377_v28  ;;  %v3157_v28 = vpack.c.bf16 %v3140_v41, %v3139_v50  ;;  %v2643_v26 = vld [vmem:[#allocation2 + $0x19a] sm:$0xff] }
 0x2fb   :  { %v2591_v8 = vadd.f32 %v2526_v17, %v2341_v19 }
 0x2fd   :  { %v2841_v57 = vadd.f32 %v2776_v22, %v2591_v8  ;;  %v7808_v11 = vpop.f32.mrf.mxu1  ;;  %v2393_v22 = vld [vmem:[#allocation2 + $0x199] sm:$0xff]  ;;  %v2644_v8 = vld [vmem:[#allocation2 + $0x1a2] sm:$0xff] }
 0x2fe   :  { %v2781_v63 = vpop.f32.mrf.mxu0  ;;  %v2410_v50 = vpack.c.bf16 %v2394_v59, %v2393_v22  ;;  %v3739_v59 = vld [vmem:[#allocation2 + $0x20] sm:$0xff] }
 0x2ff   :  { %2873 = vst [vmem:[%s8526_s4 + $0x50] sm:$0xff] %v2841_v57  ;;  %v3142_v57 = vld [vmem:[#allocation2 + $0x171] sm:$0xff] }
 0x300   :  { %v2278_v33 = vpop.f32.mrf.mxu2  ;;  %5651 = vmatmul.msk.bf16.gmra.mxu0 %vm50_vm0, %v2659_v53  ;;  %5723 = vmatmul.msk.bf16.gmra.mxu1 %vm50_vm0, %v3157_v28 }
 0x301   :  { %v2528_v35 = vpop.f32.mrf.mxu3  ;;  %v2342_v51 = vadd.f32 %v2278_v33, %v7391_v58  ;;  %v6128_v58 = vld [vmem:[%s8522_s3 + $0xb8] sm:$0xff] }
 0x302   :  { %4368 = vmatpush.bf16.msra.mxu2 %v6128_v58 }
 0x303   :  { %v2592_v44 = vadd.f32 %v2528_v35, %v2342_v51  ;;  %v2160_v35 = vpack.c.bf16 %v2144_v13, %v2143_v1  ;;  %v2660_v51 = vpack.c.bf16 %v2644_v8, %v2643_v26  ;;  %v3738_v1 = vld [vmem:[#allocation2 + $0x18] sm:$0xff] }
 0x304   :  { %v3987_v26 = vld [vmem:[#allocation2 + $0x19] sm:$0xff] }
 0x305   :  { %v2842_v56 = vadd.f32 %v2778_v12, %v2592_v44  ;;  %5571 = vmatmul.msk.bf16.gmra.mxu2 %vm50_vm0, %v2159_v31  ;;  %v7824_v40 = vpop.f32.mrf.mxu1  ;;  %v3141_v12 = vld [vmem:[#allocation2 + $0x169] sm:$0xff] }
 0x306   :  { %5611 = vmatmul.msk.bf16.gmra.mxu3 %vm50_vm0, %v2409_v23  ;;  %v2783_v14 = vpop.f32.mrf.mxu0  ;;  %v3158_v31 = vpack.c.bf16 %v3142_v57, %v3141_v12  ;;  %v3770_v12 = vpack.c.bf16 %v3739_v59, %v3738_v1 }
 0x307   :  { %2874 = vst [vmem:[%s8526_s4 + $0x58] sm:$0xff] %v2842_v56 }
 0x308   :  { %v2281_v47 = vpop.f32.mrf.mxu2 }
 0x309   :  { %v2531_v54 = vpop.f32.mrf.mxu3  ;;  %v2343_v29 = vadd.f32 %v2281_v47, %v7397_v2  ;;  %v6136_v2 = vld [vmem:[%s8522_s3 + $0xf8] sm:$0xff] }
 0x30a   :  { %4866 = vmatpush.bf16.msra.mxu0 %v6136_v2 }
 0x30b   :  { %v2593_v55 = vadd.f32 %v2531_v54, %v2343_v29  ;;  %v3055_v29 = vld [vmem:[#allocation2] sm:$0xff] }
 0x30d   :  { %v2843_v0 = vadd.f32 %v2781_v63, %v2593_v55  ;;  %v7833_v44 = vpop.f32.mrf.mxu1  ;;  %v3056_v55 = vld [vmem:[#allocation2 + $0x8] sm:$0xff] }
 0x30e   :  { %v2786_v23 = vpop.f32.mrf.mxu0 }
 0x30f   :  { %2875 = vst [vmem:[%s8526_s4 + $0x60] sm:$0xff] %v2843_v0  ;;  %v3490_v0 = vld [vmem:[#allocation2 + $0xa] sm:$0xff] }
 0x310   :  { %v2283_v17 = vpop.f32.mrf.mxu2  ;;  %5652 = vmatmul.msk.bf16.gmra.mxu0 %vm50_vm0, %v2660_v51  ;;  %5724 = vmatmul.msk.bf16.gmra.mxu1 %vm50_vm0, %v3158_v31 }
 0x311   :  { %v2533_v19 = vpop.f32.mrf.mxu3  ;;  %v2344_v33 = vadd.f32 %v2283_v17, %v7407_v3  ;;  %v6140_v3 = vld [vmem:[%s8522_s3 + $0x118] sm:$0xff]  ;;  %v3087_v17 = vpack.c.bf16 %v3056_v55, %v3055_v29 }
 0x312   :  { %5115 = vmatpush.bf16.msra.mxu1 %v6140_v3  ;;  %v3989_v29 = vld [vmem:[#allocation2 + $0x31] sm:$0xff]  ;;  %v3990_v55 = vld [vmem:[#allocation2 + $0x39] sm:$0xff] }
 0x313   :  { %v2594_v41 = vadd.f32 %v2533_v19, %v2344_v33 }
 0x315   :  { %v2844_v53 = vadd.f32 %v2783_v14, %v2594_v41  ;;  %5572 = vmatmul.msk.bf16.gmra.mxu2 %vm50_vm0, %v2160_v35  ;;  %v7846_v47 = vpop.f32.mrf.mxu1  ;;  %v3489_v14 = vld [vmem:[#allocation2 + $0x2] sm:$0xff] }
 0x316   :  { %5612 = vmatmul.msk.bf16.gmra.mxu3 %vm50_vm0, %v2410_v50  ;;  %v2788_v27 = vpop.f32.mrf.mxu0  ;;  %v3521_v19 = vpack.c.bf16 %v3490_v0, %v3489_v14 }
 0x317   :  { %2876 = vst [vmem:[%s8526_s4 + $0x68] sm:$0xff] %v2844_v53 }
 0x318   :  { %v2286_v28 = vpop.f32.mrf.mxu2 }
 0x319   :  { %v2536_v63 = vpop.f32.mrf.mxu3  ;;  %v2345_v56 = vadd.f32 %v2286_v28, %v7421_v42  ;;  %v3988_v42 = vld [vmem:[#allocation2 + $0x21] sm:$0xff] }
 0x31a   :  { %v4019_v57 = vpack.c.bf16 %v3988_v42, %v3987_v26  ;;  %v3491_v28 = vld [vmem:[#allocation2 + $0x1a] sm:$0xff] }
 0x31b   :  { %v2595_v58 = vadd.f32 %v2536_v63, %v2345_v56  ;;  %v3492_v63 = vld [vmem:[#allocation2 + $0x22] sm:$0xff]  ;;  %v3740_v56 = vld [vmem:[#allocation2 + $0x30] sm:$0xff] }
 0x31d   :  { %v2845_v54 = vadd.f32 %v2786_v23, %v2595_v58  ;;  %v7852_v35 = vpop.f32.mrf.mxu1 }
 0x31e   :  { %v2791_v33 = vpop.f32.mrf.mxu0 }
 0x31f   :  { %2877 = vst [vmem:[%s8526_s4 + $0x70] sm:$0xff] %v2845_v54  ;;  %v3741_v54 = vld [vmem:[#allocation2 + $0x38] sm:$0xff] }
 0x320   :  { %v2288_v13 = vpop.f32.mrf.mxu2  ;;  %5821 = vmatmul.msk.bf16.vlgmr.msrb.gmra.mxu0 %vm50_vm0, %v3770_v12  ;;  %5861 = vmatmul.msk.bf16.vlgmr.msrb.gmra.mxu1 %vm50_vm0, %v4019_v57  ;;  %v3771_v1 = vpack.c.bf16 %v3741_v54, %v3740_v56 }
 0x321   :  { %v2538_v22 = vpop.f32.mrf.mxu3  ;;  %v2346_v2 = vadd.f32 %v2288_v13, %v7430_v10  ;;  %v4020_v13 = vpack.c.bf16 %v3990_v55, %v3989_v29  ;;  %v6131_v29 = vld [vmem:[%s8522_s3 + $0xd0] sm:$0xff] }
 0x322   :  { %4618 = vmatpush.bf16.msra.mxu3 %v6131_v29 }
 0x323   :  { %v2596_v8 = vadd.f32 %v2538_v22, %v2346_v2 }
 0x325   :  { %v2846_v50 = vadd.f32 %v2788_v27, %v2596_v8  ;;  %5741 = vmatmul.msk.bf16.vlgmr.msrb.gmra.mxu2 %vm50_vm0, %v3087_v17  ;;  %v7862_v53 = vpop.f32.mrf.mxu1 }
 0x326   :  { %5781 = vmatmul.msk.bf16.vlgmr.msrb.gmra.mxu3 %vm50_vm0, %v3521_v19  ;;  %v2793_v23 = vpop.f32.mrf.mxu0 }
 0x327   :  { %2878 = vst [vmem:[%s8526_s4 + $0x78] sm:$0xff] %v2846_v50  ;;  %v3742_v50 = vld [vmem:[#allocation2 + $0x48] sm:$0xff] }
 0x328   :  { %v2291_v10 = vpop.f32.mrf.mxu2 }
 0x329   :  { %v2541_v41 = vpop.f32.mrf.mxu3  ;;  %v2347_v51 = vadd.f32 %v2291_v10, %v7444_v18  ;;  %v3522_v18 = vpack.c.bf16 %v3492_v63, %v3491_v28 }
 0x32b   :  { %v2597_v31 = vadd.f32 %v2541_v41, %v2347_v51  ;;  %v3743_v51 = vld [vmem:[#allocation2 + $0x50] sm:$0xff] }
 0x32c   :  { %v3772_v63 = vpack.c.bf16 %v3743_v51, %v3742_v50 }
 0x32d   :  { %v2847_v3 = vadd.f32 %v2791_v33, %v2597_v31  ;;  %v7868_v59 = vpop.f32.mrf.mxu1  ;;  %v3494_v33 = vld [vmem:[#allocation2 + $0x3a] sm:$0xff]  ;;  %v3991_v31 = vld [vmem:[#allocation2 + $0x49] sm:$0xff] }
 0x32e   :  { %v2796_v22 = vpop.f32.mrf.mxu0 }
 0x32f   :  { %2879 = vst [vmem:[%s8526_s4 + $0x80] sm:$0xff] %v2847_v3 }
 0x330   :  { %v2293_v58 = vpop.f32.mrf.mxu2  ;;  %5822 = vmatmul.msk.bf16.gmra.mxu0 %vm50_vm0, %v3771_v1  ;;  %5862 = vmatmul.msk.bf16.gmra.mxu1 %vm50_vm0, %v4020_v13 }
 0x331   :  { %v2543_v27 = vpop.f32.mrf.mxu3  ;;  %v2348_v14 = vadd.f32 %v2293_v58, %v7453_v37 }
 0x333   :  { %v2598_v0 = vadd.f32 %v2543_v27, %v2348_v14 }
 0x335   :  { %v2848_v26 = vadd.f32 %v2793_v23, %v2598_v0  ;;  %5742 = vmatmul.msk.bf16.gmra.mxu2 %vm50_vm0, %v3770_v12  ;;  %v7878_v8 = vpop.f32.mrf.mxu1  ;;  %v3493_v12 = vld [vmem:[#allocation2 + $0x32] sm:$0xff] }
 0x336   :  { %5782 = vmatmul.msk.bf16.gmra.mxu3 %vm50_vm0, %v3522_v18  ;;  %v2798_v19 = vpop.f32.mrf.mxu0  ;;  %v3992_v23 = vld [vmem:[#allocation2 + $0x51] sm:$0xff] }
 0x337   :  { %2880 = vst [vmem:[%s8526_s4 + $0x88] sm:$0xff] %v2848_v26  ;;  %v7886_v56 = vpack.c.bf16 %v3992_v23, %v3991_v31  ;;  %v3495_v26 = vld [vmem:[#allocation2 + $0x4a] sm:$0xff] }
 0x338   :  { %v2296_v37 = vpop.f32.mrf.mxu2 }
 0x339   :  { %v2546_v42 = vpop.f32.mrf.mxu3  ;;  %v2349_v2 = vadd.f32 %v2296_v37, %v7467_v9  ;;  %v7884_v9 = vpack.c.bf16 %v3494_v33, %v3493_v12  ;;  %v3496_v37 = vld [vmem:[#allocation2 + $0x52] sm:$0xff]  ;;  %v3994_v12 = vld [vmem:[#allocation2 + $0x69] sm:$0xff] }
 0x33a   :  { %v7915_v50 = vpack.c.bf16 %v3496_v37, %v3495_v26  ;;  %v3747_v26 = vld [vmem:[#allocation2 + $0x80] sm:$0xff] }
 0x33b   :  { %v2599_v17 = vadd.f32 %v2546_v42, %v2349_v2  ;;  %v3744_v42 = vld [vmem:[#allocation2 + $0x60] sm:$0xff]  ;;  %v6135_v2 = vld [vmem:[%s8522_s3 + $0xf0] sm:$0xff] }
 0x33c   :  { %4867 = vmatpush.bf16.msra.mxu0 %v6135_v2  ;;  %v3995_v37 = vld [vmem:[#allocation2 + $0x79] sm:$0xff] }
 0x33d   :  { %v2849_v57 = vadd.f32 %v2796_v22, %v2599_v17  ;;  %v7888_v27 = vpop.f32.mrf.mxu1 }
 0x33e   :  { %v2801_v58 = vpop.f32.mrf.mxu0 }
 0x33f   :  { %2881 = vst [vmem:[%s8526_s4 + $0x90] sm:$0xff] %v2849_v57  ;;  %v3993_v57 = vld [vmem:[#allocation2 + $0x61] sm:$0xff] }
 0x340   :  { %v2298_v10 = vpop.f32.mrf.mxu2  ;;  %5823 = vmatmul.msk.bf16.gmra.mxu0 %vm50_vm0, %v3772_v63  ;;  %5863 = vmatmul.msk.bf16.gmra.mxu1 %vm50_vm0, %v7886_v56  ;;  %v7917_v51 = vpack.c.bf16 %v3994_v12, %v3993_v57 }
 0x341   :  { %v2548_v41 = vpop.f32.mrf.mxu3  ;;  %v2350_v3 = vadd.f32 %v2298_v10, %v7482_v39  ;;  %v6127_v39 = vld [vmem:[%s8522_s3 + $0xb0] sm:$0xff] }
 0x342   :  { %4369 = vmatpush.bf16.msra.mxu2 %v6127_v39 }
 0x343   :  { %v2600_v28 = vadd.f32 %v2548_v41, %v2350_v3 }
 0x345   :  { %v2850_v54 = vadd.f32 %v2798_v19, %v2600_v28  ;;  %5743 = vmatmul.msk.bf16.gmra.mxu2 %vm50_vm0, %v3771_v1  ;;  %v7906_v13 = vpop.f32.mrf.mxu1  ;;  %v3745_v19 = vld [vmem:[#allocation2 + $0x68] sm:$0xff] }
 0x346   :  { %5783 = vmatmul.msk.bf16.gmra.mxu3 %vm50_vm0, %v7884_v9  ;;  %v2803_v1 = vpop.f32.mrf.mxu0  ;;  %v3773_v41 = vpack.c.bf16 %v3745_v19, %v3744_v42  ;;  %v3996_v42 = vld [vmem:[#allocation2 + $0x81] sm:$0xff] }
 0x347   :  { %2882 = vst [vmem:[%s8526_s4 + $0x98] sm:$0xff] %v2850_v54  ;;  %v7944_v19 = vpack.c.bf16 %v3996_v42, %v3995_v37 }
 0x348   :  { %v2301_v55 = vpop.f32.mrf.mxu2 }
 0x349   :  { %v2551_v14 = vpop.f32.mrf.mxu3  ;;  %v2351_v18 = vadd.f32 %v2301_v55, %v7499_v15 }
 0x34b   :  { %v2601_v0 = vadd.f32 %v2551_v14, %v2351_v18  ;;  %v3497_v14 = vld [vmem:[#allocation2 + $0x62] sm:$0xff]  ;;  %v3498_v18 = vld [vmem:[#allocation2 + $0x6a] sm:$0xff] }
 0x34c   :  { %v7940_v2 = vpack.c.bf16 %v3498_v18, %v3497_v14  ;;  %v3749_v14 = vld [vmem:[#allocation2 + $0x98] sm:$0xff] }
 0x34d   :  { %v2851_v22 = vadd.f32 %v2801_v58, %v2601_v0  ;;  %v7919_v23 = vpop.f32.mrf.mxu1  ;;  %v3746_v0 = vld [vmem:[#allocation2 + $0x78] sm:$0xff] }
 0x34e   :  { %v2806_v31 = vpop.f32.mrf.mxu0  ;;  %v3997_v18 = vld [vmem:[#allocation2 + $0x91] sm:$0xff] }
 0x34f   :  { %2883 = vst [vmem:[%s8526_s4 + $0xa0] sm:$0xff] %v2851_v22 }
 0x350   :  { %v2303_v17 = vpop.f32.mrf.mxu2  ;;  %5824 = vmatmul.msk.bf16.gmra.mxu0 %vm50_vm0, %v3773_v41  ;;  %5864 = vmatmul.msk.bf16.gmra.mxu1 %vm50_vm0, %v7917_v51 }
 0x351   :  { %v2553_v15 = vpop.f32.mrf.mxu3  ;;  %v2352_v33 = vadd.f32 %v2303_v17, %v7511_v49  ;;  %v6139_v49 = vld [vmem:[%s8522_s3 + $0x110] sm:$0xff] }
 0x352   :  { %5116 = vmatpush.bf16.msra.mxu1 %v6139_v49 }
 0x353   :  { %v2602_v10 = vadd.f32 %v2553_v15, %v2352_v33  ;;  %v7942_v15 = vpack.c.bf16 %v3747_v26, %v3746_v0  ;;  %v3998_v0 = vld [vmem:[#allocation2 + $0x99] sm:$0xff] }
 0x354   :  { %v7969_v37 = vpack.c.bf16 %v3998_v0, %v3997_v18 }
 0x355   :  { %v2852_v3 = vadd.f32 %v2803_v1, %v2602_v10  ;;  %5744 = vmatmul.msk.bf16.gmra.mxu2 %vm50_vm0, %v3772_v63  ;;  %v7934_v29 = vpop.f32.mrf.mxu1 }
 0x356   :  { %5784 = vmatmul.msk.bf16.gmra.mxu3 %vm50_vm0, %v7915_v50  ;;  %v2808_v39 = vpop.f32.mrf.mxu0 }
 0x357   :  { %2884 = vst [vmem:[%s8526_s4 + $0xa8] sm:$0xff] %v2852_v3 }
 0x358   :  { %v2306_v28 = vpop.f32.mrf.mxu2 }
 0x359   :  { %v2556_v58 = vpop.f32.mrf.mxu3  ;;  %v2353_v63 = vadd.f32 %v2306_v28, %v7525_v34 }
 0x35b   :  { %v2603_v54 = vadd.f32 %v2556_v58, %v2353_v63  ;;  %v3499_v58 = vld [vmem:[#allocation2 + $0x7a] sm:$0xff]  ;;  %v3500_v63 = vld [vmem:[#allocation2 + $0x82] sm:$0xff] }
 0x35d   :  { %v2853_v55 = vadd.f32 %v2806_v31, %v2603_v54  ;;  %v7946_v12 = vpop.f32.mrf.mxu1  ;;  %v3748_v54 = vld [vmem:[#allocation2 + $0x90] sm:$0xff] }
 0x35e   :  { %v2811_v57 = vpop.f32.mrf.mxu0  ;;  %v7967_v26 = vpack.c.bf16 %v3749_v14, %v3748_v54  ;;  %v4000_v14 = vld [vmem:[#allocation2 + $0xb1] sm:$0xff] }
 0x35f   :  { %2885 = vst [vmem:[%s8526_s4 + $0xb0] sm:$0xff] %v2853_v55 }
 0x360   :  { %v2308_v1 = vpop.f32.mrf.mxu2  ;;  %5825 = vmatmul.msk.bf16.gmra.mxu0 %vm50_vm0, %v7942_v15  ;;  %5865 = vmatmul.msk.bf16.gmra.mxu1 %vm50_vm0, %v7944_v19 }
 0x361   :  { %v2558_v22 = vpop.f32.mrf.mxu3  ;;  %v2354_v34 = vadd.f32 %v2308_v1, %v7533_v16 }
 0x363   :  { %v2604_v17 = vadd.f32 %v2558_v22, %v2354_v34 }
 0x365   :  { %v2854_v33 = vadd.f32 %v2808_v39, %v2604_v17  ;;  %5745 = vmatmul.msk.bf16.gmra.mxu2 %vm50_vm0, %v3773_v41  ;;  %v7959_v41 = vpop.f32.mrf.mxu1 }
 0x366   :  { %5785 = vmatmul.msk.bf16.gmra.mxu3 %vm50_vm0, %v7940_v2  ;;  %v2813_v49 = vpop.f32.mrf.mxu0 }
 0x367   :  { %2886 = vst [vmem:[%s8526_s4 + $0xb8] sm:$0xff] %v2854_v33 }
 0x368   :  { %v2311_v16 = vpop.f32.mrf.mxu2 }
 0x369   :  { %v2561_v10 = vpop.f32.mrf.mxu3  ;;  %v2355_v31 = vadd.f32 %v2311_v16, %v7547_v25  ;;  %v7965_v25 = vpack.c.bf16 %v3500_v63, %v3499_v58  ;;  %v3750_v58 = vld [vmem:[#allocation2 + $0xa8] sm:$0xff] }
 0x36b   :  { %v2605_v3 = vadd.f32 %v2561_v10, %v2355_v31 }
 0x36d   :  { %v2855_v28 = vadd.f32 %v2811_v57, %v2605_v3  ;;  %v7971_v34 = vpop.f32.mrf.mxu1 }
 0x36e   :  { %v2816_v42 = vpop.f32.mrf.mxu0 }
 0x36f   :  { %2887 = vst [vmem:[%s8526_s4 + $0xc0] sm:$0xff] %v2855_v28  ;;  %v3502_v28 = vld [vmem:[#allocation2 + $0x9a] sm:$0xff] }
 0x370   :  { %v2313_v39 = vpop.f32.mrf.mxu2  ;;  %5826 = vmatmul.msk.bf16.gmra.mxu0 %vm50_vm0, %v7967_v26  ;;  %5866 = vmatmul.msk.bf16.gmra.mxu1 %vm50_vm0, %v7969_v37 }
 0x371   :  { %v2563_v55 = vpop.f32.mrf.mxu3  ;;  %v2356_v1 = vadd.f32 %v2313_v39, %v7555_v43  ;;  %v3751_v39 = vld [vmem:[#allocation2 + $0xb0] sm:$0xff] }
 0x373   :  { %v2606_v22 = vadd.f32 %v2563_v55, %v2356_v1  ;;  %v3999_v55 = vld [vmem:[#allocation2 + $0xa9] sm:$0xff]  ;;  %v7993_v1 = vpack.c.bf16 %v3751_v39, %v3750_v58  ;;  %v3504_v39 = vld [vmem:[#allocation2 + $0xb2] sm:$0xff] }
 0x375   :  { %v2856_v17 = vadd.f32 %v2813_v49, %v2606_v22  ;;  %5746 = vmatmul.msk.bf16.gmra.mxu2 %vm50_vm0, %v7942_v15  ;;  %v7985_v31 = vpop.f32.mrf.mxu1  ;;  %v3501_v49 = vld [vmem:[#allocation2 + $0x92] sm:$0xff]  ;;  %v7995_v22 = vpack.c.bf16 %v4000_v14, %v3999_v55  ;;  %v3752_v55 = vld [vmem:[#allocation2 + $0xc0] sm:$0xff] }
 0x376   :  { %5786 = vmatmul.msk.bf16.gmra.mxu3 %vm50_vm0, %v7965_v25  ;;  %v2818_v10 = vpop.f32.mrf.mxu0 }
 0x377   :  { %2888 = vst [vmem:[%s8526_s4 + $0xc8] sm:$0xff] %v2856_v17 }
 0x378   :  { %v2316_v43 = vpop.f32.mrf.mxu2 }
 0x379   :  { %v2566_v57 = vpop.f32.mrf.mxu3  ;;  %v2357_v33 = vadd.f32 %v2316_v43, %v7569_v36  ;;  %v7991_v36 = vpack.c.bf16 %v3502_v28, %v3501_v49 }
 0x37b   :  { %v2607_v16 = vadd.f32 %v2566_v57, %v2357_v33  ;;  %v6130_v57 = vld [vmem:[%s8522_s3 + $0xc8] sm:$0xff] }
 0x37c   :  { %4619 = vmatpush.bf16.msra.mxu3 %v6130_v57 }
 0x37d   :  { %v2857_v3 = vadd.f32 %v2816_v42, %v2607_v16  ;;  %v7997_v17 = vpop.f32.mrf.mxu1 }
 0x37e   :  { %v2821_v42 = vpop.f32.mrf.mxu0  ;;  %8542 = vst [vmem:[#allocation3_spill] sm:$0xff] %v7997_v17  ;;  %v4005_v17 = vld [vmem:[#allocation2 + $0xf1] sm:$0xff] }
 0x37f   :  { %2889 = vst [vmem:[%s8526_s4 + $0xd0] sm:$0xff] %v2857_v3 }
 0x380   :  { %v2318_v63 = vpop.f32.mrf.mxu2  ;;  %5827 = vmatmul.msk.bf16.gmra.mxu0 %vm50_vm0, %v7993_v1  ;;  %5867 = vmatmul.msk.bf16.gmra.mxu1 %vm50_vm0, %v7995_v22 }
 0x381   :  { %v2568_v54 = vpop.f32.mrf.mxu3  ;;  %v2358_v18 = vadd.f32 %v2318_v63, %v7583_v21  ;;  %v6126_v21 = vld [vmem:[%s8522_s3 + $0xa8] sm:$0xff] }
 0x382   :  { %4370 = vmatpush.bf16.msra.mxu2 %v6126_v21  ;;  %v6134_v63 = vld [vmem:[%s8522_s3 + $0xe8] sm:$0xff] }
 0x383   :  { %v2608_v0 = vadd.f32 %v2568_v54, %v2358_v18  ;;  %v3503_v54 = vld [vmem:[#allocation2 + $0xaa] sm:$0xff]  ;;  %4868 = vmatpush.bf16.msra.mxu0 %v6134_v63 }
 0x384   :  { %v3753_v18 = vld [vmem:[#allocation2 + $0xc8] sm:$0xff] }
 0x385   :  { %v2858_v43 = vadd.f32 %v2818_v10, %v2608_v0  ;;  %5747 = vmatmul.msk.bf16.gmra.mxu2 %vm50_vm0, %v7967_v26  ;;  %v8017_v28 = vpop.f32.mrf.mxu1  ;;  %v4001_v0 = vld [vmem:[#allocation2 + $0xc1] sm:$0xff] }
 0x386   :  { %5787 = vmatmul.msk.bf16.gmra.mxu3 %vm50_vm0, %v7991_v36  ;;  %v2823_v49 = vpop.f32.mrf.mxu0  ;;  %8543 = vst [vmem:[#allocation4_spill] sm:$0xff] %v8017_v28  ;;  %v4004_v28 = vld [vmem:[#allocation2 + $0xe1] sm:$0xff] }
 0x387   :  { %2890 = vst [vmem:[%s8526_s4 + $0xd8] sm:$0xff] %v2858_v43  ;;  %v4002_v43 = vld [vmem:[#allocation2 + $0xc9] sm:$0xff] }
 0x388   :  { %v2321_v33 = vpop.f32.mrf.mxu2 }
 0x389   :  { %v2571_v16 = vpop.f32.mrf.mxu3  ;;  %v2359_v10 = vadd.f32 %v2321_v33, %v7600_v30  ;;  %v8028_v33 = vpack.c.bf16 %v3753_v18, %v3752_v55  ;;  %v3505_v18 = vld [vmem:[#allocation2 + $0xc2] sm:$0xff] }
 0x38b   :  { %v2609_v3 = vadd.f32 %v2571_v16, %v2359_v10  ;;  %8544 = vst [vmem:[#allocation5_spill] sm:$0xff] %v8028_v33  ;;  %v8030_v16 = vpack.c.bf16 %v4002_v43, %v4001_v0  ;;  %v3506_v0 = vld [vmem:[#allocation2 + $0xca] sm:$0xff]  ;;  %v3754_v43 = vld [vmem:[#allocation2 + $0xd8] sm:$0xff] }
 0x38d   :  { %v2859_v58 = vadd.f32 %v2821_v42, %v2609_v3  ;;  %v8026_v42 = vpack.c.bf16 %v3504_v39, %v3503_v54  ;;  %8545 = vst [vmem:[#allocation6_spill] sm:$0xff] %v8030_v16  ;;  %v8032_v3 = vpop.f32.mrf.mxu1 }
 0x38e   :  { %v2826_v10 = vpop.f32.mrf.mxu0  ;;  %8546 = vst [vmem:[#allocation7_spill] sm:$0xff] %v8032_v3  ;;  %v4003_v3 = vld [vmem:[#allocation2 + $0xd9] sm:$0xff] }
 0x38f   :  { %2891 = vst [vmem:[%s8526_s4 + $0xe0] sm:$0xff] %v2859_v58 }
 0x390   :  { %v2323_v30 = vpop.f32.mrf.mxu2  ;;  %5828 = vmatmul.msk.bf16.gmra.mxu0 %vm50_vm0, %v8028_v33  ;;  %5868 = vmatmul.msk.bf16.gmra.mxu1 %vm50_vm0, %v8030_v16 }
 0x391   :  { %v2573_v14 = vpop.f32.mrf.mxu3  ;;  %v2360_v21 = vadd.f32 %v2323_v30, %v7611_v60  ;;  %v6138_v60 = vld [vmem:[%s8522_s3 + $0x108] sm:$0xff] }
 0x392   :  { %5117 = vmatpush.bf16.msra.mxu1 %v6138_v60 }
 0x393   :  { %v2610_v57 = vadd.f32 %v2573_v14, %v2360_v21 }
 0x395   :  { %v2860_v58 = vadd.f32 %v2823_v49, %v2610_v57  ;;  %5748 = vmatmul.msk.bf16.gmra.mxu2 %vm50_vm0, %v7993_v1  ;;  %v8049_v30 = vpop.f32.mrf.mxu1 }
 0x396   :  { %5788 = vmatmul.msk.bf16.gmra.mxu3 %vm50_vm0, %v8026_v42  ;;  %v2828_v55 = vpop.f32.mrf.mxu0  ;;  %8547 = vst [vmem:[#allocation8_spill] sm:$0xff] %v8049_v30 }
 0x397   :  { %2892 = vst [vmem:[%s8526_s4 + $0xe8] sm:$0xff] %v2860_v58  ;;  %v3755_v58 = vld [vmem:[#allocation2 + $0xe0] sm:$0xff] }
 0x398   :  { %v2326_v49 = vpop.f32.mrf.mxu2 }
 0x399   :  { %v2576_v63 = vpop.f32.mrf.mxu3  ;;  %v2361_v54 = vadd.f32 %v2326_v49, %v7625_v32  ;;  %v8055_v32 = vpack.c.bf16 %v3506_v0, %v3505_v18 }
 0x39b   :  { %v2611_v39 = vadd.f32 %v2576_v63, %v2361_v54  ;;  %8548 = vst [vmem:[#allocation9_spill] sm:$0xff] %v8055_v32  ;;  %v8057_v63 = vpack.c.bf16 %v3755_v58, %v3754_v43  ;;  %v3507_v43 = vld [vmem:[#allocation2 + $0xda] sm:$0xff] }
 0x39d   :  { %v2861_v14 = vadd.f32 %v2826_v10, %v2611_v39  ;;  %v8059_v10 = vpack.c.bf16 %v4004_v28, %v4003_v3  ;;  %v4124_v39 = vpop.f32.mrf.mxu1 }
 0x39e   :  { %v3875_v54 = vpop.f32.mrf.mxu0 }
 0x39f   :  { %2893 = vst [vmem:[%s8526_s4 + $0xf0] sm:$0xff] %v2861_v14 }
 0x3a0   :  { %v2328_v21 = vpop.f32.mrf.mxu2  ;;  %8549 = vst [vmem:[#allocation10_spill] sm:$0xff] %v8059_v10  ;;  %5829 = vmatmul.msk.bf16.gmra.mxu0 %vm50_vm0, %v8057_v63  ;;  %5869 = vmatmul.msk.bf16.gmra.mxu1 %vm50_vm0, %v8059_v10 }
 0x3a1   :  { %v2578_v57 = vpop.f32.mrf.mxu3  ;;  %v2362_v60 = vadd.f32 %v2328_v21, %v7635_v6  ;;  %v3508_v21 = vld [vmem:[#allocation2 + $0xe2] sm:$0xff] }
 0x3a2   :  { %v8076_v16 = vpack.c.bf16 %v3508_v21, %v3507_v43  ;;  %v3510_v43 = vld [vmem:[#allocation2 + $0xfa] sm:$0xff]  ;;  %v3758_v21 = vld [vmem:[#allocation2 + $0x108] sm:$0xff] }
 0x3a3   :  { %v2612_v49 = vadd.f32 %v2578_v57, %v2362_v60  ;;  %v3756_v57 = vld [vmem:[#allocation2 + $0xf0] sm:$0xff] }
 0x3a5   :  { %v2862_v30 = vadd.f32 %v2828_v55, %v2612_v49  ;;  %5749 = vmatmul.msk.bf16.gmra.mxu2 %vm50_vm0, %v8028_v33  ;;  %v4126_v18 = vpop.f32.mrf.mxu1  ;;  %v3757_v49 = vld [vmem:[#allocation2 + $0xf8] sm:$0xff] }
 0x3a6   :  { %5789 = vmatmul.msk.bf16.gmra.mxu3 %vm50_vm0, %v8055_v32  ;;  %v3877_v14 = vpop.f32.mrf.mxu0  ;;  %v4006_v32 = vld [vmem:[#allocation2 + $0xf9] sm:$0xff] }
 0x3a7   :  { %2894 = vst [vmem:[%s8526_s4 + $0xf8] sm:$0xff] %v2862_v30 }
 0x3a8   :  { %v3409_v6 = vpop.f32.mrf.mxu2 }
 0x3a9   :  { %v3626_v28 = vpop.f32.mrf.mxu3  ;;  %v3410_v3 = vadd.f32 %v3409_v6, %v7629_v61  ;;  %v8078_v61 = vpack.c.bf16 %v3757_v49, %v3756_v57  ;;  %v8080_v6 = vpack.c.bf16 %v4006_v32, %v4005_v17  ;;  %v3759_v49 = vld [vmem:[#allocation2 + $0x110] sm:$0xff] }
 0x3ab   :  { %v3706_v55 = vadd.f32 %v3626_v28, %v3410_v3  ;;  %8551 = vst [vmem:[#allocation12_spill] sm:$0xff] %v8080_v6 }
 0x3ad   :  { %v3955_v0 = vadd.f32 %v3875_v54, %v3706_v55  ;;  %v4129_v28 = vpop.f32.mrf.mxu1 }
 0x3ae   :  { %v3880_v54 = vpop.f32.mrf.mxu0 }
 0x3af   :  { %v8073_v58 = vadd.f32 %v4124_v39, %v3955_v0  ;;  %v3509_v0 = vld [vmem:[#allocation2 + $0xf2] sm:$0xff] }
 0x3b0   :  { %v3411_v30 = vpop.f32.mrf.mxu2  ;;  %5830 = vmatmul.msk.bf16.gmra.mxu0 %vm50_vm0, %v8078_v61  ;;  %5870 = vmatmul.msk.bf16.gmra.mxu1 %vm50_vm0, %v8080_v6  ;;  %v4008_v6 = vld [vmem:[#allocation2 + $0x111] sm:$0xff] }
 0x3b1   :  { %8550 = vst [vmem:[#allocation11_spill] sm:$0xff] %v8073_v58  ;;  %v3628_v60 = vpop.f32.mrf.mxu3  ;;  %v3412_v10 = vadd.f32 %v3411_v30, %v7648_v4  ;;  %v4007_v58 = vld [vmem:[#allocation2 + $0x109] sm:$0xff] }
 0x3b3   :  { %v3707_v33 = vadd.f32 %v3628_v60, %v3412_v10 }
 0x3b5   :  { %v3956_v3 = vadd.f32 %v3877_v14, %v3707_v33  ;;  %5750 = vmatmul.msk.bf16.gmra.mxu2 %vm50_vm0, %v8057_v63  ;;  %v4131_v55 = vpop.f32.mrf.mxu1 }
 0x3b6   :  { %5790 = vmatmul.msk.bf16.gmra.mxu3 %vm50_vm0, %v8076_v16  ;;  %v3882_v33 = vpop.f32.mrf.mxu0 }
 0x3b7   :  { %v8090_v4 = vadd.f32 %v4126_v18, %v3956_v3  ;;  %v8096_v3 = vpack.c.bf16 %v3510_v43, %v3509_v0 }
 0x3b8   :  { %v3414_v10 = vpop.f32.mrf.mxu2 }
 0x3b9   :  { %8552 = vst [vmem:[#allocation13_spill] sm:$0xff] %v8090_v4  ;;  %v3631_v17 = vpop.f32.mrf.mxu3  ;;  %v3415_v32 = vadd.f32 %v3414_v10, %v7656_v62  ;;  %v8098_v62 = vpack.c.bf16 %v3759_v49, %v3758_v21  ;;  %v8100_v10 = vpack.c.bf16 %v4008_v6, %v4007_v58  ;;  %v6129_v58 = vld [vmem:[%s8522_s3 + $0xc0] sm:$0xff] }
 0x3ba   :  { %4620 = vmatpush.bf16.msra.mxu3 %v6129_v58  ;;  %v6133_v21 = vld [vmem:[%s8522_s3 + $0xe0] sm:$0xff] }
 0x3bb   :  { %v3708_v39 = vadd.f32 %v3631_v17, %v3415_v32  ;;  %8554 = vst [vmem:[#allocation15_spill] sm:$0xff] %v8100_v10  ;;  %v3760_v49 = vld [vmem:[#allocation2 + $0x120] sm:$0xff]  ;;  %4869 = vmatpush.bf16.msra.mxu0 %v6133_v21 }
 0x3bd   :  { %v3957_v14 = vadd.f32 %v3880_v54, %v3708_v39  ;;  %v4134_v17 = vpop.f32.mrf.mxu1 }
 0x3be   :  { %v3885_v54 = vpop.f32.mrf.mxu0 }
 0x3bf   :  { %v8093_v57 = vadd.f32 %v4129_v28, %v3957_v14 }
 0x3c0   :  { %v3416_v30 = vpop.f32.mrf.mxu2  ;;  %5831 = vmatmul.msk.bf16.gmra.mxu0 %vm50_vm0, %v8098_v62  ;;  %5871 = vmatmul.msk.bf16.gmra.mxu1 %vm50_vm0, %v8100_v10 }
 0x3c1   :  { %8553 = vst [vmem:[#allocation14_spill] sm:$0xff] %v8093_v57  ;;  %v3633_v60 = vpop.f32.mrf.mxu3  ;;  %v3417_v18 = vadd.f32 %v3416_v30, %v7676_v48  ;;  %v6125_v48 = vld [vmem:[%s8522_s3 + $0xa0] sm:$0xff]  ;;  %v3511_v30 = vld [vmem:[#allocation2 + $0x10a] sm:$0xff] }
 0x3c2   :  { %4371 = vmatpush.bf16.msra.mxu2 %v6125_v48  ;;  %v3761_v48 = vld [vmem:[#allocation2 + $0x128] sm:$0xff] }
 0x3c3   :  { %v3709_v4 = vadd.f32 %v3633_v60, %v3417_v18  ;;  %v3512_v60 = vld [vmem:[#allocation2 + $0x112] sm:$0xff] }
 0x3c5   :  { %v3958_v32 = vadd.f32 %v3882_v33, %v3709_v4  ;;  %5751 = vmatmul.msk.bf16.gmra.mxu2 %vm50_vm0, %v8078_v61  ;;  %v4136_v0 = vpop.f32.mrf.mxu1 }
 0x3c6   :  { %5791 = vmatmul.msk.bf16.gmra.mxu3 %vm50_vm0, %v8096_v3  ;;  %v3887_v14 = vpop.f32.mrf.mxu0 }
 0x3c7   :  { %v8116_v6 = vadd.f32 %v4131_v55, %v3958_v32 }
 0x3c8   :  { %v3419_v28 = vpop.f32.mrf.mxu2 }
 0x3c9   :  { %8555 = vst [vmem:[#allocation16_spill] sm:$0xff] %v8116_v6  ;;  %v3636_v4 = vpop.f32.mrf.mxu3  ;;  %v3420_v39 = vadd.f32 %v3419_v28, %v7684_v46  ;;  %v4009_v6 = vld [vmem:[#allocation2 + $0x121] sm:$0xff]  ;;  %v4010_v46 = vld [vmem:[#allocation2 + $0x129] sm:$0xff]  ;;  %v8125_v28 = vpack.c.bf16 %v3512_v60, %v3511_v30 }
 0x3cb   :  { %v3710_v33 = vadd.f32 %v3636_v4, %v3420_v39  ;;  %v8127_v4 = vpack.c.bf16 %v3761_v48, %v3760_v49  ;;  %v8129_v39 = vpack.c.bf16 %v4010_v46, %v4009_v6  ;;  %v3762_v48 = vld [vmem:[#allocation2 + $0x138] sm:$0xff] }
 0x3cd   :  { %v3959_v43 = vadd.f32 %v3885_v54, %v3710_v33  ;;  %8557 = vst [vmem:[#allocation18_spill] sm:$0xff] %v8129_v39  ;;  %v4139_v57 = vpop.f32.mrf.mxu1 }
 0x3ce   :  { %v3890_v33 = vpop.f32.mrf.mxu0 }
 0x3cf   :  { %v8122_v55 = vadd.f32 %v4134_v17, %v3959_v43 }
 0x3d0   :  { %v3421_v18 = vpop.f32.mrf.mxu2  ;;  %5832 = vmatmul.msk.bf16.gmra.mxu0 %vm50_vm0, %v8127_v4  ;;  %5872 = vmatmul.msk.bf16.gmra.mxu1 %vm50_vm0, %v8129_v39  ;;  %v4011_v39 = vld [vmem:[#allocation2 + $0x139] sm:$0xff] }
 0x3d1   :  { %8556 = vst [vmem:[#allocation17_spill] sm:$0xff] %v8122_v55  ;;  %v3638_v32 = vpop.f32.mrf.mxu3  ;;  %v3422_v58 = vadd.f32 %v3421_v18, %v7709_v7  ;;  %v6137_v7 = vld [vmem:[%s8522_s3 + $0x100] sm:$0xff] }
 0x3d2   :  { %5118 = vmatpush.bf16.msra.mxu1 %v6137_v7  ;;  %v3513_v18 = vld [vmem:[#allocation2 + $0x122] sm:$0xff] }
 0x3d3   :  { %v3711_v54 = vadd.f32 %v3638_v32, %v3422_v58  ;;  %v3514_v32 = vld [vmem:[#allocation2 + $0x12a] sm:$0xff]  ;;  %v3763_v55 = vld [vmem:[#allocation2 + $0x140] sm:$0xff] }
 0x3d5   :  { %v3960_v10 = vadd.f32 %v3887_v14, %v3711_v54  ;;  %5752 = vmatmul.msk.bf16.gmra.mxu2 %vm50_vm0, %v8098_v62  ;;  %v4141_v60 = vpop.f32.mrf.mxu1 }
 0x3d6   :  { %5792 = vmatmul.msk.bf16.gmra.mxu3 %vm50_vm0, %v8125_v28  ;;  %v3892_v30 = vpop.f32.mrf.mxu0 }
 0x3d7   :  { %v8142_v17 = vadd.f32 %v4136_v0, %v3960_v10  ;;  %v4012_v10 = vld [vmem:[#allocation2 + $0x141] sm:$0xff] }
 0x3d8   :  { %v3424_v6 = vpop.f32.mrf.mxu2 }
 0x3d9   :  { %8558 = vst [vmem:[#allocation19_spill] sm:$0xff] %v8142_v17  ;;  %v3641_v14 = vpop.f32.mrf.mxu3  ;;  %v3425_v43 = vadd.f32 %v3424_v6, %v7721_v45  ;;  %v8148_v17 = vpack.c.bf16 %v3514_v32, %v3513_v18  ;;  %v8150_v45 = vpack.c.bf16 %v3763_v55, %v3762_v48  ;;  %v8152_v6 = vpack.c.bf16 %v4012_v10, %v4011_v39  ;;  %v3515_v32 = vld [vmem:[#allocation2 + $0x13a] sm:$0xff]  ;;  %v3516_v48 = vld [vmem:[#allocation2 + $0x142] sm:$0xff] }
 0x3db   :  { %v3712_v21 = vadd.f32 %v3641_v14, %v3425_v43  ;;  %8560 = vst [vmem:[#allocation21_spill] sm:$0xff] %v8152_v6 }
 0x3dd   :  { %v3961_v49 = vadd.f32 %v3890_v33, %v3712_v21  ;;  %v4144_v14 = vpop.f32.mrf.mxu1 }
 0x3de   :  { %v3895_v33 = vpop.f32.mrf.mxu0 }
 0x3df   :  { %v8145_v46 = vadd.f32 %v4139_v57, %v3961_v49 }
 0x3e0   :  { %v3426_v58 = vpop.f32.mrf.mxu2  ;;  %5833 = vmatmul.msk.bf16.gmra.mxu0 %vm50_vm0, %v8150_v45  ;;  %5873 = vmatmul.msk.bf16.gmra.mxu1 %vm50_vm0, %v8152_v6  ;;  %v4014_v6 = vld [vmem:[#allocation2 + $0x159] sm:$0xff] }
 0x3e1   :  { %8559 = vst [vmem:[#allocation20_spill] sm:$0xff] %v8145_v46  ;;  %v3643_v54 = vpop.f32.mrf.mxu3  ;;  %v3427_v0 = vadd.f32 %v3426_v58, %v7744_v24  ;;  %v3764_v58 = vld [vmem:[#allocation2 + $0x150] sm:$0xff] }
 0x3e2   :  { %v4013_v46 = vld [vmem:[#allocation2 + $0x151] sm:$0xff] }
 0x3e3   :  { %v3713_v7 = vadd.f32 %v3643_v54, %v3427_v0 }
 0x3e5   :  { %v3962_v43 = vadd.f32 %v3892_v30, %v3713_v7  ;;  %5753 = vmatmul.msk.bf16.gmra.mxu2 %vm50_vm0, %v8127_v4  ;;  %v4146_v49 = vpop.f32.mrf.mxu1  ;;  %v3765_v7 = vld [vmem:[#allocation2 + $0x158] sm:$0xff] }
 0x3e6   :  { %5793 = vmatmul.msk.bf16.gmra.mxu3 %vm50_vm0, %v8148_v17  ;;  %v3897_v30 = vpop.f32.mrf.mxu0 }
 0x3e7   :  { %v8162_v24 = vadd.f32 %v4141_v60, %v3962_v43  ;;  %v8168_v43 = vpack.c.bf16 %v3516_v48, %v3515_v32  ;;  %v3517_v32 = vld [vmem:[#allocation2 + $0x152] sm:$0xff]  ;;  %v3518_v48 = vld [vmem:[#allocation2 + $0x15a] sm:$0xff] }
 0x3e8   :  { %v3429_v57 = vpop.f32.mrf.mxu2 }
 0x3e9   :  { %8561 = vst [vmem:[#allocation22_spill] sm:$0xff] %v8162_v24  ;;  %v3646_v55 = vpop.f32.mrf.mxu3  ;;  %v3430_v39 = vadd.f32 %v3429_v57, %v7752_v38  ;;  %v8170_v38 = vpack.c.bf16 %v3765_v7, %v3764_v58  ;;  %v8172_v57 = vpack.c.bf16 %v4014_v6, %v4013_v46  ;;  %v3766_v58 = vld [vmem:[#allocation2 + $0x168] sm:$0xff] }
 0x3eb   :  { %v3714_v21 = vadd.f32 %v3646_v55, %v3430_v39  ;;  %8563 = vst [vmem:[#allocation24_spill] sm:$0xff] %v8172_v57 }
 0x3ed   :  { %v3963_v18 = vadd.f32 %v3895_v33, %v3714_v21  ;;  %v4149_v55 = vpop.f32.mrf.mxu1 }
 0x3ee   :  { %v3900_v33 = vpop.f32.mrf.mxu0 }
 0x3ef   :  { %v8165_v54 = vadd.f32 %v4144_v14, %v3963_v18 }
 0x3f0   :  { %v3431_v10 = vpop.f32.mrf.mxu2  ;;  %5834 = vmatmul.msk.bf16.gmra.mxu0 %vm50_vm0, %v8170_v38  ;;  %5874 = vmatmul.msk.bf16.gmra.mxu1 %vm50_vm0, %v8172_v57  ;;  %v4016_v57 = vld [vmem:[#allocation2 + $0x171] sm:$0xff] }
 0x3f1   :  { %8562 = vst [vmem:[#allocation23_spill] sm:$0xff] %v8165_v54  ;;  %v3648_v0 = vpop.f32.mrf.mxu3  ;;  %v3432_v60 = vadd.f32 %v3431_v10, %v7782_v5  ;;  %v4015_v54 = vld [vmem:[#allocation2 + $0x169] sm:$0xff] }
 0x3f3   :  { %v3715_v24 = vadd.f32 %v3648_v0, %v3432_v60  ;;  %v3767_v60 = vld [vmem:[#allocation2 + $0x170] sm:$0xff] }
 0x3f5   :  { %v3964_v39 = vadd.f32 %v3897_v30, %v3715_v24  ;;  %5754 = vmatmul.msk.bf16.gmra.mxu2 %vm50_vm0, %v8150_v45  ;;  %v4151_v30 = vpop.f32.mrf.mxu1 }
 0x3f6   :  { %5794 = vmatmul.msk.bf16.gmra.mxu3 %vm50_vm0, %v8168_v43  ;;  %v3902_v24 = vpop.f32.mrf.mxu0 }
 0x3f7   :  { %v8182_v5 = vadd.f32 %v4146_v49, %v3964_v39  ;;  %v8188_v39 = vpack.c.bf16 %v3518_v48, %v3517_v32  ;;  %v3519_v32 = vld [vmem:[#allocation2 + $0x16a] sm:$0xff]  ;;  %v3520_v48 = vld [vmem:[#allocation2 + $0x172] sm:$0xff] }
 0x3f8   :  { %v3434_v14 = vpop.f32.mrf.mxu2 }
 0x3f9   :  { %8564 = vst [vmem:[#allocation25_spill] sm:$0xff] %v8182_v5  ;;  %v3651_v46 = vpop.f32.mrf.mxu3  ;;  %v3435_v6 = vadd.f32 %v3434_v14, %v7792_v52  ;;  %v8190_v52 = vpack.c.bf16 %v3767_v60, %v3766_v58  ;;  %v8192_v14 = vpack.c.bf16 %v4016_v57, %v4015_v54  ;;  %v3768_v58 = vld [vmem:[#allocation2 + $0x180] sm:$0xff] }
 0x3fb   :  { %v3716_v21 = vadd.f32 %v3651_v46, %v3435_v6  ;;  %8566 = vst [vmem:[#allocation27_spill] sm:$0xff] %v8192_v14 }
 0x3fd   :  { %v3965_v18 = vadd.f32 %v3900_v33, %v3716_v21  ;;  %v4154_v46 = vpop.f32.mrf.mxu1 }
 0x3fe   :  { %v3905_v33 = vpop.f32.mrf.mxu0 }
 0x3ff   :  { %v8185_v10 = vadd.f32 %v4149_v55, %v3965_v18 }
 0x400   :  { %v3436_v0 = vpop.f32.mrf.mxu2  ;;  %5835 = vmatmul.msk.bf16.gmra.mxu0 %vm50_vm0, %v8190_v52  ;;  %5875 = vmatmul.msk.bf16.gmra.mxu1 %vm50_vm0, %v8192_v14  ;;  %v4018_v14 = vld [vmem:[#allocation2 + $0x189] sm:$0xff] }
 0x401   :  { %8565 = vst [vmem:[#allocation26_spill] sm:$0xff] %v8185_v10  ;;  %v3653_v7 = vpop.f32.mrf.mxu3  ;;  %v3437_v49 = vadd.f32 %v3436_v0, %v7802_v20  ;;  %v4017_v10 = vld [vmem:[#allocation2 + $0x181] sm:$0xff] }
 0x403   :  { %v3717_v5 = vadd.f32 %v3653_v7, %v3437_v49  ;;  %v3769_v49 = vld [vmem:[#allocation2 + $0x188] sm:$0xff] }
 0x405   :  { %v3966_v6 = vadd.f32 %v3902_v24, %v3717_v5  ;;  %5755 = vmatmul.msk.bf16.gmra.mxu2 %vm50_vm0, %v8170_v38  ;;  %v4156_v24 = vpop.f32.mrf.mxu1 }
 0x406   :  { %5795 = vmatmul.msk.bf16.gmra.mxu3 %vm50_vm0, %v8188_v39  ;;  %v3907_v5 = vpop.f32.mrf.mxu0 }
 0x407   :  { %v8202_v20 = vadd.f32 %v4151_v30, %v3966_v6  ;;  %v8208_v6 = vpack.c.bf16 %v3520_v48, %v3519_v32  ;;  %v4236_v32 = vld [vmem:[#allocation2 + $0x1a] sm:$0xff]  ;;  %v4237_v48 = vld [vmem:[#allocation2 + $0x22] sm:$0xff] }
 0x408   :  { %v3439_v55 = vpop.f32.mrf.mxu2 }
 0x409   :  { %8567 = vst [vmem:[#allocation28_spill] sm:$0xff] %v8202_v20  ;;  %v3656_v54 = vpop.f32.mrf.mxu3  ;;  %v3440_v57 = vadd.f32 %v3439_v55, %v7808_v11  ;;  %v8210_v11 = vpack.c.bf16 %v3769_v49, %v3768_v58  ;;  %v8212_v55 = vpack.c.bf16 %v4018_v14, %v4017_v10  ;;  %v4485_v58 = vld [vmem:[#allocation2 + $0x30] sm:$0xff] }
 0x40b   :  { %v3718_v21 = vadd.f32 %v3656_v54, %v3440_v57  ;;  %8569 = vst [vmem:[#allocation30_spill] sm:$0xff] %v8210_v11 }
 0x40c   :  { %8570 = vst [vmem:[#allocation31_spill] sm:$0xff] %v8212_v55 }
 0x40d   :  { %v3967_v18 = vadd.f32 %v3905_v33, %v3718_v21  ;;  %v4159_v54 = vpop.f32.mrf.mxu1 }
 0x40e   :  { %v3910_v33 = vpop.f32.mrf.mxu0 }
 0x40f   :  { %v8205_v0 = vadd.f32 %v4154_v46, %v3967_v18 }
 0x410   :  { %v3441_v7 = vpop.f32.mrf.mxu2  ;;  %5836 = vmatmul.msk.bf16.gmra.mxu0 %vm50_vm0, %v8210_v11  ;;  %5876 = vmatmul.msk.bf16.gmra.mxu1 %vm50_vm0, %v8212_v55  ;;  %v4735_v55 = vld [vmem:[#allocation2 + $0x39] sm:$0xff] }
 0x411   :  { %8568 = vst [vmem:[#allocation29_spill] sm:$0xff] %v8205_v0  ;;  %v3658_v60 = vpop.f32.mrf.mxu3  ;;  %v3442_v30 = vadd.f32 %v3441_v7, %v7824_v40  ;;  %v4486_v7 = vld [vmem:[#allocation2 + $0x38] sm:$0xff] }
 0x412   :  { %v4734_v0 = vld [vmem:[#allocation2 + $0x31] sm:$0xff] }
 0x413   :  { %v3719_v20 = vadd.f32 %v3658_v60, %v3442_v30 }
 0x415   :  { %v3968_v57 = vadd.f32 %v3907_v5, %v3719_v20  ;;  %5756 = vmatmul.msk.bf16.gmra.mxu2 %vm50_vm0, %v8190_v52  ;;  %v4161_v5 = vpop.f32.mrf.mxu1 }
 0x416   :  { %5796 = vmatmul.msk.bf16.gmra.mxu3 %vm50_vm0, %v8208_v6  ;;  %v3912_v20 = vpop.f32.mrf.mxu0 }
 0x417   :  { %v8222_v40 = vadd.f32 %v4156_v24, %v3968_v57  ;;  %v4268_v57 = vpack.c.bf16 %v4237_v48, %v4236_v32  ;;  %v4487_v48 = vld [vmem:[#allocation2 + $0x48] sm:$0xff] }
 0x418   :  { %v3444_v46 = vpop.f32.mrf.mxu2 }
 0x419   :  { %8571 = vst [vmem:[#allocation32_spill] sm:$0xff] %v8222_v40  ;;  %v3661_v10 = vpop.f32.mrf.mxu3  ;;  %v3445_v14 = vadd.f32 %v3444_v46, %v7833_v44  ;;  %v4517_v40 = vpack.c.bf16 %v4486_v7, %v4485_v58  ;;  %v4766_v44 = vpack.c.bf16 %v4735_v55, %v4734_v0  ;;  %v4488_v58 = vld [vmem:[#allocation2 + $0x50] sm:$0xff] }
 0x41b   :  { %v3720_v21 = vadd.f32 %v3661_v10, %v3445_v14 }
 0x41d   :  { %v3969_v18 = vadd.f32 %v3910_v33, %v3720_v21  ;;  %v4164_v10 = vpop.f32.mrf.mxu1 }
 0x41e   :  { %v3915_v46 = vpop.f32.mrf.mxu0 }
 0x41f   :  { %v8225_v60 = vadd.f32 %v4159_v54, %v3969_v18 }
 0x420   :  { %v3446_v49 = vpop.f32.mrf.mxu2  ;;  %5981 = vmatmul.msk.bf16.vlgmr.msra.gmra.mxu0 %vm50_vm0, %v4766_v44  ;;  %6021 = vmatmul.msk.bf16.vlgmr.msra.gmra.mxu1 %vm50_vm0, %v7884_v9 }
 0x421   :  { %v3663_v30 = vpop.f32.mrf.mxu3  ;;  %v3447_v24 = vadd.f32 %v3446_v49, %v7846_v47 }
 0x423   :  { %v3721_v11 = vadd.f32 %v3663_v30, %v3447_v24  ;;  %v4518_v30 = vpack.c.bf16 %v4488_v58, %v4487_v48 }
 0x425   :  { %v3970_v14 = vadd.f32 %v3912_v20, %v3721_v11  ;;  %5901 = vmatmul.msk.bf16.vlgmr.msra.gmra.mxu2 %vm50_vm0, %v4268_v57  ;;  %v4166_v55 = vpop.f32.mrf.mxu1  ;;  %v4238_v11 = vld [vmem:[#allocation2 + $0x32] sm:$0xff]  ;;  %v4239_v20 = vld [vmem:[#allocation2 + $0x3a] sm:$0xff] }
 0x426   :  { %5941 = vmatmul.msk.bf16.vlgmr.msra.gmra.mxu3 %vm50_vm0, %v4517_v40  ;;  %v3917_v0 = vpop.f32.mrf.mxu0 }
 0x427   :  { %v8233_v33 = vadd.f32 %v4161_v5, %v3970_v14  ;;  %v4269_v5 = vpack.c.bf16 %v4239_v20, %v4238_v11  ;;  %v4489_v11 = vld [vmem:[#allocation2 + $0x60] sm:$0xff]  ;;  %v4490_v20 = vld [vmem:[#allocation2 + $0x68] sm:$0xff] }
 0x428   :  { %v3449_v54 = vpop.f32.mrf.mxu2 }
 0x429   :  { %v3666_v47 = vpop.f32.mrf.mxu3  ;;  %v3450_v21 = vadd.f32 %v3449_v54, %v7852_v35 }
 0x42b   :  { %v3722_v18 = vadd.f32 %v3666_v47, %v3450_v21 }
 0x42d   :  { %v3971_v32 = vadd.f32 %v3915_v46, %v3722_v18  ;;  %v4169_v44 = vpop.f32.mrf.mxu1 }
 0x42e   :  { %v3920_v57 = vpop.f32.mrf.mxu0 }
 0x42f   :  { %v8236_v40 = vadd.f32 %v4164_v10, %v3971_v32  ;;  %v4241_v32 = vld [vmem:[#allocation2 + $0x52] sm:$0xff] }
 0x430   :  { %v3451_v7 = vpop.f32.mrf.mxu2  ;;  %5982 = vmatmul.msk.bf16.gmra.mxu0 %vm50_vm0, %v7886_v56  ;;  %6022 = vmatmul.msk.bf16.gmra.mxu1 %vm50_vm0, %v7915_v50 }
 0x431   :  { %v3668_v49 = vpop.f32.mrf.mxu3  ;;  %v3452_v9 = vadd.f32 %v3451_v7, %v7862_v53  ;;  %v4519_v7 = vpack.c.bf16 %v4490_v20, %v4489_v11 }
 0x433   :  { %v3723_v24 = vadd.f32 %v3668_v49, %v3452_v9 }
 0x435   :  { %v3972_v35 = vadd.f32 %v3917_v0, %v3723_v24  ;;  %5902 = vmatmul.msk.bf16.gmra.mxu2 %vm50_vm0, %v4269_v5  ;;  %v4171_v21 = vpop.f32.mrf.mxu1  ;;  %v4240_v0 = vld [vmem:[#allocation2 + $0x4a] sm:$0xff] }
 0x436   :  { %5942 = vmatmul.msk.bf16.gmra.mxu3 %vm50_vm0, %v4518_v30  ;;  %v3922_v47 = vpop.f32.mrf.mxu0 }
 0x437   :  { %v8245_v46 = vadd.f32 %v4166_v55, %v3972_v35  ;;  %v4270_v55 = vpack.c.bf16 %v4241_v32, %v4240_v0 }
 0x438   :  { %v3454_v10 = vpop.f32.mrf.mxu2 }
 0x439   :  { %v3671_v53 = vpop.f32.mrf.mxu3  ;;  %v3455_v14 = vadd.f32 %v3454_v10, %v7868_v59 }
 0x43b   :  { %v3724_v54 = vadd.f32 %v3671_v53, %v3455_v14 }
 0x43d   :  { %v3973_v18 = vadd.f32 %v3920_v57, %v3724_v54  ;;  %v4174_v5 = vpop.f32.mrf.mxu1 }
 0x43e   :  { %v3925_v9 = vpop.f32.mrf.mxu0 }
 0x43f   :  { %v8248_v48 = vadd.f32 %v4169_v44, %v3973_v18 }
 0x440   :  { %v3456_v56 = vpop.f32.mrf.mxu2  ;;  %5983 = vmatmul.msk.bf16.gmra.mxu0 %vm50_vm0, %v7917_v51  ;;  %6023 = vmatmul.msk.bf16.gmra.mxu1 %vm50_vm0, %v7940_v2 }
 0x441   :  { %v3673_v58 = vpop.f32.mrf.mxu3  ;;  %v3457_v50 = vadd.f32 %v3456_v56, %v7878_v8 }
 0x443   :  { %v3725_v49 = vadd.f32 %v3673_v58, %v3457_v50 }
 0x445   :  { %v3974_v59 = vadd.f32 %v3922_v47, %v3725_v49  ;;  %5903 = vmatmul.msk.bf16.gmra.mxu2 %vm50_vm0, %v4270_v55  ;;  %v4176_v10 = vpop.f32.mrf.mxu1 }
 0x446   :  { %5943 = vmatmul.msk.bf16.gmra.mxu3 %vm50_vm0, %v4519_v7  ;;  %v3927_v35 = vpop.f32.mrf.mxu0 }
 0x447   :  { %v8257_v30 = vadd.f32 %v4171_v21, %v3974_v59 }
 0x448   :  { %v3459_v24 = vpop.f32.mrf.mxu2 }
 0x449   :  { %v3676_v8 = vpop.f32.mrf.mxu3  ;;  %v3460_v57 = vadd.f32 %v3459_v24, %v7888_v27 }
 0x44b   :  { %v3726_v44 = vadd.f32 %v3676_v8, %v3460_v57 }
 0x44d   :  { %v3975_v53 = vadd.f32 %v3925_v9, %v3726_v44  ;;  %v4179_v32 = vpop.f32.mrf.mxu1 }
 0x44e   :  { %v3930_v0 = vpop.f32.mrf.mxu0 }
 0x44f   :  { %v8260_v14 = vadd.f32 %v4174_v5, %v3975_v53 }
 0x450   :  { %v3461_v54 = vpop.f32.mrf.mxu2  ;;  %5984 = vmatmul.msk.bf16.gmra.mxu0 %vm50_vm0, %v7944_v19  ;;  %6024 = vmatmul.msk.bf16.gmra.mxu1 %vm50_vm0, %v7965_v25 }
 0x451   :  { %v3678_v47 = vpop.f32.mrf.mxu3  ;;  %v3462_v18 = vadd.f32 %v3461_v54, %v7906_v13 }
 0x453   :  { %v3727_v51 = vadd.f32 %v3678_v47, %v3462_v18 }
 0x455   :  { %v3976_v11 = vadd.f32 %v3927_v35, %v3727_v51  ;;  %5904 = vmatmul.msk.bf16.gmra.mxu2 %vm50_vm0, %v7940_v2  ;;  %v4181_v50 = vpop.f32.mrf.mxu1 }
 0x456   :  { %5944 = vmatmul.msk.bf16.gmra.mxu3 %vm50_vm0, %v7942_v15  ;;  %v3932_v58 = vpop.f32.mrf.mxu0 }
 0x457   :  { %v8271_v27 = vadd.f32 %v4176_v10, %v3976_v11 }
 0x458   :  { %v3464_v21 = vpop.f32.mrf.mxu2 }
 0x459   :  { %v3681_v13 = vpop.f32.mrf.mxu3  ;;  %v3465_v20 = vadd.f32 %v3464_v21, %v7919_v23 }
 0x45b   :  { %v3728_v56 = vadd.f32 %v3681_v13, %v3465_v20 }
 0x45d   :  { %v3977_v55 = vadd.f32 %v3930_v0, %v3728_v56  ;;  %v4184_v5 = vpop.f32.mrf.mxu1 }
 0x45e   :  { %v3935_v9 = vpop.f32.mrf.mxu0 }
 0x45f   :  { %v8274_v2 = vadd.f32 %v4179_v32, %v3977_v55 }
 0x460   :  { %v3466_v7 = vpop.f32.mrf.mxu2  ;;  %5985 = vmatmul.msk.bf16.gmra.mxu0 %vm50_vm0, %v7969_v37  ;;  %6025 = vmatmul.msk.bf16.gmra.mxu1 %vm50_vm0, %v7991_v36 }
 0x461   :  { %v3683_v15 = vpop.f32.mrf.mxu3  ;;  %v3467_v49 = vadd.f32 %v3466_v7, %v7934_v29 }
 0x463   :  { %v3729_v19 = vadd.f32 %v3683_v15, %v3467_v49  ;;  %v8572_v15 = vld [vmem:[#allocation5_spill] sm:$0xff] }
 0x464   :  { %v8574_v49 = vld [vmem:[#allocation9_spill] sm:$0xff] }
 0x465   :  { %v3978_v59 = vadd.f32 %v3932_v58, %v3729_v19  ;;  %5905 = vmatmul.msk.bf16.gmra.mxu2 %vm50_vm0, %v7965_v25  ;;  %v4186_v35 = vpop.f32.mrf.mxu1 }
 0x466   :  { %5945 = vmatmul.msk.bf16.gmra.mxu3 %vm50_vm0, %v7967_v26  ;;  %v3937_v44 = vpop.f32.mrf.mxu0 }
 0x467   :  { %v8285_v23 = vadd.f32 %v4181_v50, %v3978_v59 }
 0x468   :  { %v3469_v24 = vpop.f32.mrf.mxu2 }
 0x469   :  { %v3686_v29 = vpop.f32.mrf.mxu3  ;;  %v3470_v8 = vadd.f32 %v3469_v24, %v7946_v12 }
 0x46b   :  { %v3730_v57 = vadd.f32 %v3686_v29, %v3470_v8 }
 0x46d   :  { %v3979_v10 = vadd.f32 %v3935_v9, %v3730_v57  ;;  %v4189_v18 = vpop.f32.mrf.mxu1 }
 0x46e   :  { %v3940_v47 = vpop.f32.mrf.mxu0 }
 0x46f   :  { %v8288_v25 = vadd.f32 %v4184_v5, %v3979_v10  ;;  %v8575_v5 = vld [vmem:[#allocation3_spill] sm:$0xff]  ;;  %v8576_v10 = vld [vmem:[#allocation4_spill] sm:$0xff] }
 0x470   :  { %v3471_v53 = vpop.f32.mrf.mxu2  ;;  %5986 = vmatmul.msk.bf16.gmra.mxu0 %vm50_vm0, %v7995_v22  ;;  %6026 = vmatmul.msk.bf16.gmra.mxu1 %vm50_vm0, %v8026_v42 }
 0x471   :  { %v3688_v26 = vpop.f32.mrf.mxu3  ;;  %v3472_v54 = vadd.f32 %v3471_v53, %v7959_v41 }
 0x473   :  { %v3731_v37 = vadd.f32 %v3688_v26, %v3472_v54 }
 0x475   :  { %v3980_v51 = vadd.f32 %v3937_v44, %v3731_v37  ;;  %5906 = vmatmul.msk.bf16.gmra.mxu2 %vm50_vm0, %v7991_v36  ;;  %v4191_v13 = vpop.f32.mrf.mxu1 }
 0x476   :  { %5946 = vmatmul.msk.bf16.gmra.mxu3 %vm50_vm0, %v7993_v1  ;;  %v3942_v21 = vpop.f32.mrf.mxu0 }
 0x477   :  { %v8299_v12 = vadd.f32 %v4186_v35, %v3980_v51 }
 0x478   :  { %v3474_v0 = vpop.f32.mrf.mxu2 }
 0x479   :  { %v3691_v41 = vpop.f32.mrf.mxu3  ;;  %v3475_v32 = vadd.f32 %v3474_v0, %v7971_v34  ;;  %v8573_v34 = vld [vmem:[#allocation6_spill] sm:$0xff] }
 0x47b   :  { %v3732_v11 = vadd.f32 %v3691_v41, %v3475_v32  ;;  %v8578_v32 = vld [vmem:[#allocation7_spill] sm:$0xff] }
 0x47d   :  { %v3981_v20 = vadd.f32 %v3940_v47, %v3732_v11  ;;  %v4194_v55 = vpop.f32.mrf.mxu1 }
 0x47e   :  { %v3945_v50 = vpop.f32.mrf.mxu0 }
 0x47f   :  { %v8302_v36 = vadd.f32 %v4189_v18, %v3981_v20  ;;  %v8577_v18 = vld [vmem:[#allocation10_spill] sm:$0xff] }
 0x480   :  { %v3476_v56 = vpop.f32.mrf.mxu2  ;;  %5987 = vmatmul.msk.bf16.gmra.mxu0 %vm50_vm0, %v8573_v34  ;;  %6027 = vmatmul.msk.bf16.gmra.mxu1 %vm50_vm0, %v8574_v49 }
 0x481   :  { %v3693_v1 = vpop.f32.mrf.mxu3  ;;  %v3477_v58 = vadd.f32 %v3476_v56, %v7985_v31 }
 0x483   :  { %v3733_v22 = vadd.f32 %v3693_v1, %v3477_v58 }
 0x485   :  { %v3982_v7 = vadd.f32 %v3942_v21, %v3733_v22  ;;  %5907 = vmatmul.msk.bf16.gmra.mxu2 %vm50_vm0, %v8026_v42  ;;  %v4196_v8 = vpop.f32.mrf.mxu1  ;;  %v8579_v22 = vld [vmem:[#allocation8_spill] sm:$0xff] }
 0x486   :  { %5947 = vmatmul.msk.bf16.gmra.mxu3 %vm50_vm0, %v8572_v15  ;;  %v3947_v29 = vpop.f32.mrf.mxu0 }
 0x487   :  { %v8313_v19 = vadd.f32 %v4191_v13, %v3982_v7 }
 0x488   :  { %v3479_v9 = vpop.f32.mrf.mxu2 }
 0x489   :  { %v3696_v31 = vpop.f32.mrf.mxu3  ;;  %v3480_v59 = vadd.f32 %v3479_v9, %v8575_v5 }
 0x48b   :  { %v3734_v24 = vadd.f32 %v3696_v31, %v3480_v59  ;;  %v8581_v59 = vld [vmem:[#allocation11_spill] sm:$0xff] }
 0x48d   :  { %v3983_v57 = vadd.f32 %v3945_v50, %v3734_v24  ;;  %v4199_v37 = vpop.f32.mrf.mxu1 }
 0x48e   :  { %v3950_v54 = vpop.f32.mrf.mxu0 }
 0x48f   :  { %v8316_v42 = vadd.f32 %v4194_v55, %v3983_v57 }
 0x490   :  { %v3481_v44 = vpop.f32.mrf.mxu2  ;;  %5988 = vmatmul.msk.bf16.gmra.mxu0 %vm50_vm0, %v8577_v18  ;;  %6028 = vmatmul.msk.bf16.gmra.mxu1 %vm50_vm0, %v8076_v16 }
 0x491   :  { %v3698_v35 = vpop.f32.mrf.mxu3  ;;  %v3482_v53 = vadd.f32 %v3481_v44, %v8576_v10 }
 0x493   :  { %v3735_v26 = vadd.f32 %v3698_v35, %v3482_v53 }
 0x495   :  { %v3984_v47 = vadd.f32 %v3947_v29, %v3735_v26  ;;  %5908 = vmatmul.msk.bf16.gmra.mxu2 %vm50_vm0, %v8574_v49  ;;  %v4201_v20 = vpop.f32.mrf.mxu1  ;;  %v8580_v49 = vld [vmem:[#allocation12_spill] sm:$0xff] }
 0x496   :  { %5948 = vmatmul.msk.bf16.gmra.mxu3 %vm50_vm0, %v8057_v63  ;;  %v3952_v13 = vpop.f32.mrf.mxu0 }
 0x497   :  { %v8327_v51 = vadd.f32 %v4196_v8, %v3984_v47 }
 0x498   :  { %v3484_v0 = vpop.f32.mrf.mxu2 }
 0x499   :  { %v3701_v41 = vpop.f32.mrf.mxu3  ;;  %v3485_v11 = vadd.f32 %v3484_v0, %v8578_v32  ;;  %v8583_v0 = vld [vmem:[#allocation15_spill] sm:$0xff] }
 0x49b   :  { %v3736_v21 = vadd.f32 %v3701_v41, %v3485_v11  ;;  %v8584_v11 = vld [vmem:[#allocation14_spill] sm:$0xff] }
 0x49d   :  { %v3985_v56 = vadd.f32 %v3950_v54, %v3736_v21  ;;  %v5120_v15 = vpop.f32.mrf.mxu1 }
 0x49e   :  { %v4871_v7 = vpop.f32.mrf.mxu0 }
 0x49f   :  { %v8330_v1 = vadd.f32 %v4199_v37, %v3985_v56 }
 0x4a0   :  { %v3486_v58 = vpop.f32.mrf.mxu2  ;;  %5989 = vmatmul.msk.bf16.gmra.mxu0 %vm50_vm0, %v8580_v49  ;;  %6029 = vmatmul.msk.bf16.gmra.mxu1 %vm50_vm0, %v8096_v3 }
 0x4a1   :  { %v3703_v63 = vpop.f32.mrf.mxu3  ;;  %v3487_v50 = vadd.f32 %v3486_v58, %v8579_v22  ;;  %v8585_v22 = vld [vmem:[#allocation16_spill] sm:$0xff] }
 0x4a3   :  { %v3737_v55 = vadd.f32 %v3703_v63, %v3487_v50 }
 0x4a5   :  { %v3986_v34 = vadd.f32 %v3952_v13, %v3737_v55  ;;  %5909 = vmatmul.msk.bf16.gmra.mxu2 %vm50_vm0, %v8076_v16  ;;  %v5122_v57 = vpop.f32.mrf.mxu1 }
 0x4a6   :  { %5949 = vmatmul.msk.bf16.gmra.mxu3 %vm50_vm0, %v8078_v61  ;;  %v4873_v8 = vpop.f32.mrf.mxu0  ;;  %v8582_v61 = vld [vmem:[#allocation13_spill] sm:$0xff] }
 0x4a7   :  { %v8341_v9 = vadd.f32 %v4201_v20, %v3986_v34 }
 0x4a8   :  { %v4373_v31 = vpop.f32.mrf.mxu2 }
 0x4a9   :  { %v4622_v5 = vpop.f32.mrf.mxu3  ;;  %v4453_v24 = vadd.f32 %v4373_v31, %v8581_v59  ;;  %v8586_v31 = vld [vmem:[#allocation18_spill] sm:$0xff] }
 0x4ab   :  { %v4702_v29 = vadd.f32 %v4622_v5, %v4453_v24  ;;  %v8587_v24 = vld [vmem:[#allocation17_spill] sm:$0xff] }
 0x4ad   :  { %v4951_v44 = vadd.f32 %v4871_v7, %v4702_v29  ;;  %v5125_v37 = vpop.f32.mrf.mxu1 }
 0x4ae   :  { %v4876_v54 = vpop.f32.mrf.mxu0 }
 0x4af   :  { %v5200_v16 = vadd.f32 %v5120_v15, %v4951_v44 }
 0x4b0   :  { %v4375_v35 = vpop.f32.mrf.mxu2  ;;  %5990 = vmatmul.msk.bf16.gmra.mxu0 %vm50_vm0, %v8583_v0  ;;  %6030 = vmatmul.msk.bf16.gmra.mxu1 %vm50_vm0, %v8125_v28 }
 0x4b1   :  { %v4624_v10 = vpop.f32.mrf.mxu3  ;;  %6037 = vst [vmem:[%s8526_s4 + $0x100] sm:$0xff] %v5200_v16  ;;  %v4454_v53 = vadd.f32 %v4375_v35, %v8582_v61 }
 0x4b3   :  { %v4703_v26 = vadd.f32 %v4624_v10, %v4454_v53  ;;  %v8588_v10 = vld [vmem:[#allocation19_spill] sm:$0xff] }
 0x4b5   :  { %v4952_v47 = vadd.f32 %v4873_v8, %v4703_v26  ;;  %5910 = vmatmul.msk.bf16.gmra.mxu2 %vm50_vm0, %v8096_v3  ;;  %v5127_v20 = vpop.f32.mrf.mxu1 }
 0x4b6   :  { %5950 = vmatmul.msk.bf16.gmra.mxu3 %vm50_vm0, %v8098_v62  ;;  %v4878_v3 = vpop.f32.mrf.mxu0 }
 0x4b7   :  { %v5201_v18 = vadd.f32 %v5122_v57, %v4952_v47 }
 0x4b8   :  { %v4378_v41 = vpop.f32.mrf.mxu2 }
 0x4b9   :  { %v4627_v32 = vpop.f32.mrf.mxu3  ;;  %6038 = vst [vmem:[%s8526_s4 + $0x108] sm:$0xff] %v5201_v18  ;;  %v4455_v21 = vadd.f32 %v4378_v41, %v8584_v11  ;;  %v8589_v18 = vld [vmem:[#allocation21_spill] sm:$0xff] }
 0x4bb   :  { %v4704_v13 = vadd.f32 %v4627_v32, %v4455_v21  ;;  %v8590_v32 = vld [vmem:[#allocation20_spill] sm:$0xff] }
 0x4bd   :  { %v4953_v56 = vadd.f32 %v4876_v54, %v4704_v13  ;;  %v5130_v15 = vpop.f32.mrf.mxu1 }
 0x4be   :  { %v4881_v7 = vpop.f32.mrf.mxu0 }
 0x4bf   :  { %v5202_v62 = vadd.f32 %v5125_v37, %v4953_v56 }
 0x4c0   :  { %v4380_v58 = vpop.f32.mrf.mxu2  ;;  %5991 = vmatmul.msk.bf16.gmra.mxu0 %vm50_vm0, %v8586_v31  ;;  %6031 = vmatmul.msk.bf16.gmra.mxu1 %vm50_vm0, %v8148_v17  ;;  %v8593_v31 = vld [vmem:[#allocation23_spill] sm:$0xff] }
 0x4c1   :  { %v4629_v63 = vpop.f32.mrf.mxu3  ;;  %6039 = vst [vmem:[%s8526_s4 + $0x110] sm:$0xff] %v5202_v62  ;;  %v4456_v50 = vadd.f32 %v4380_v58, %v8585_v22  ;;  %v8591_v62 = vld [vmem:[#allocation22_spill] sm:$0xff] }
 0x4c3   :  { %v4705_v55 = vadd.f32 %v4629_v63, %v4456_v50 }
 0x4c5   :  { %v4954_v34 = vadd.f32 %v4878_v3, %v4705_v55  ;;  %5911 = vmatmul.msk.bf16.gmra.mxu2 %vm50_vm0, %v8125_v28  ;;  %v5132_v57 = vpop.f32.mrf.mxu1 }
 0x4c6   :  { %5951 = vmatmul.msk.bf16.gmra.mxu3 %vm50_vm0, %v8127_v4  ;;  %v4883_v28 = vpop.f32.mrf.mxu0 }
 0x4c7   :  { %v5203_v49 = vadd.f32 %v5127_v20, %v4954_v34 }
 0x4c8   :  { %v4383_v5 = vpop.f32.mrf.mxu2 }
 0x4c9   :  { %v4632_v59 = vpop.f32.mrf.mxu3  ;;  %6040 = vst [vmem:[%s8526_s4 + $0x118] sm:$0xff] %v5203_v49  ;;  %v4457_v29 = vadd.f32 %v4383_v5, %v8587_v24 }
 0x4cb   :  { %v4706_v8 = vadd.f32 %v4632_v59, %v4457_v29 }
 0x4cd   :  { %v4955_v44 = vadd.f32 %v4881_v7, %v4706_v8  ;;  %v5135_v54 = vpop.f32.mrf.mxu1 }
 0x4ce   :  { %v4886_v26 = vpop.f32.mrf.mxu0 }
 0x4cf   :  { %v5204_v4 = vadd.f32 %v5130_v15, %v4955_v44  ;;  %v8592_v15 = vld [vmem:[#allocation24_spill] sm:$0xff] }
 0x4d0   :  { %v4385_v16 = vpop.f32.mrf.mxu2  ;;  %5992 = vmatmul.msk.bf16.gmra.mxu0 %vm50_vm0, %v8589_v18  ;;  %6032 = vmatmul.msk.bf16.gmra.mxu1 %vm50_vm0, %v8168_v43 }
 0x4d1   :  { %v4634_v35 = vpop.f32.mrf.mxu3  ;;  %6041 = vst [vmem:[%s8526_s4 + $0x120] sm:$0xff] %v5204_v4  ;;  %v4458_v61 = vadd.f32 %v4385_v16, %v8588_v10 }
 0x4d3   :  { %v4707_v53 = vadd.f32 %v4634_v35, %v4458_v61 }
 0x4d5   :  { %v4956_v37 = vadd.f32 %v4883_v28, %v4707_v53  ;;  %5912 = vmatmul.msk.bf16.gmra.mxu2 %vm50_vm0, %v8148_v17  ;;  %v5137_v13 = vpop.f32.mrf.mxu1  ;;  %v8595_v53 = vld [vmem:[#allocation27_spill] sm:$0xff] }
 0x4d6   :  { %5952 = vmatmul.msk.bf16.gmra.mxu3 %vm50_vm0, %v8150_v45  ;;  %v4888_v17 = vpop.f32.mrf.mxu0 }
 0x4d7   :  { %v5205_v47 = vadd.f32 %v5132_v57, %v4956_v37  ;;  %v8594_v57 = vld [vmem:[#allocation25_spill] sm:$0xff]  ;;  %v8596_v37 = vld [vmem:[#allocation26_spill] sm:$0xff] }
 0x4d8   :  { %v4388_v0 = vpop.f32.mrf.mxu2 }
 0x4d9   :  { %v4637_v41 = vpop.f32.mrf.mxu3  ;;  %6042 = vst [vmem:[%s8526_s4 + $0x128] sm:$0xff] %v5205_v47  ;;  %v4459_v11 = vadd.f32 %v4388_v0, %v8590_v32 }
 0x4db   :  { %v4708_v21 = vadd.f32 %v4637_v41, %v4459_v11 }
 0x4dd   :  { %v4957_v3 = vadd.f32 %v4886_v26, %v4708_v21  ;;  %v5140_v50 = vpop.f32.mrf.mxu1  ;;  %v5011_v21 = vld [vmem:[#allocation2 + $0x182] sm:$0xff] }
 0x4de   :  { %v4891_v22 = vpop.f32.mrf.mxu0 }
 0x4df   :  { %v5206_v45 = vadd.f32 %v5135_v54, %v4957_v3 }
 0x4e0   :  { %v4390_v20 = vpop.f32.mrf.mxu2  ;;  %5993 = vmatmul.msk.bf16.gmra.mxu0 %vm50_vm0, %v8592_v15  ;;  %6033 = vmatmul.msk.bf16.gmra.mxu1 %vm50_vm0, %v8188_v39  ;;  %v8600_v15 = vld [vmem:[#allocation29_spill] sm:$0xff] }
 0x4e1   :  { %v4639_v56 = vpop.f32.mrf.mxu3  ;;  %6043 = vst [vmem:[%s8526_s4 + $0x130] sm:$0xff] %v5206_v45  ;;  %v4460_v58 = vadd.f32 %v4390_v20, %v8591_v62 }
 0x4e3   :  { %v4709_v63 = vadd.f32 %v4639_v56, %v4460_v58 }
 0x4e5   :  { %v4958_v55 = vadd.f32 %v4888_v17, %v4709_v63  ;;  %5913 = vmatmul.msk.bf16.gmra.mxu2 %vm50_vm0, %v8168_v43  ;;  %v5142_v24 = vpop.f32.mrf.mxu1  ;;  %v5012_v17 = vld [vmem:[#allocation2 + $0x18a] sm:$0xff] }
 0x4e6   :  { %5953 = vmatmul.msk.bf16.gmra.mxu3 %vm50_vm0, %v8170_v38  ;;  %v4893_v43 = vpop.f32.mrf.mxu0  ;;  %v5029_v20 = vpack.c.bf16 %v5012_v17, %v5011_v21  ;;  %v8598_v63 = vld [vmem:[#allocation30_spill] sm:$0xff] }
 0x4e7   :  { %v5207_v7 = vadd.f32 %v5137_v13, %v4958_v55  ;;  %v8597_v13 = vld [vmem:[#allocation28_spill] sm:$0xff] }
 0x4e8   :  { %v4393_v34 = vpop.f32.mrf.mxu2 }
 0x4e9   :  { %v4642_v49 = vpop.f32.mrf.mxu3  ;;  %6044 = vst [vmem:[%s8526_s4 + $0x138] sm:$0xff] %v5207_v7  ;;  %v4461_v5 = vadd.f32 %v4393_v34, %v8593_v31 }
 0x4eb   :  { %v4710_v59 = vadd.f32 %v4642_v49, %v4461_v5 }
 0x4ed   :  { %v4959_v29 = vadd.f32 %v4891_v22, %v4710_v59  ;;  %v5145_v35 = vpop.f32.mrf.mxu1  ;;  %v4515_v59 = vld [vmem:[#allocation2 + $0x198] sm:$0xff] }
 0x4ee   :  { %v4896_v16 = vpop.f32.mrf.mxu0 }
 0x4ef   :  { %v5208_v38 = vadd.f32 %v5140_v50, %v4959_v29  ;;  %v8599_v50 = vld [vmem:[#allocation31_spill] sm:$0xff]  ;;  %v4764_v29 = vld [vmem:[#allocation2 + $0x199] sm:$0xff] }
 0x4f0   :  { %v4395_v8 = vpop.f32.mrf.mxu2  ;;  %5994 = vmatmul.msk.bf16.gmra.mxu0 %vm50_vm0, %v8595_v53  ;;  %6034 = vmatmul.msk.bf16.gmra.mxu1 %vm50_vm0, %v8208_v6 }
 0x4f1   :  { %v4644_v28 = vpop.f32.mrf.mxu3  ;;  %6045 = vst [vmem:[%s8526_s4 + $0x140] sm:$0xff] %v5208_v38  ;;  %v4462_v44 = vadd.f32 %v4395_v8, %v8594_v57  ;;  %v5013_v57 = vld [vmem:[#allocation2 + $0x19a] sm:$0xff] }
 0x4f3   :  { %v4711_v4 = vadd.f32 %v4644_v28, %v4462_v44  ;;  %v4765_v28 = vld [vmem:[#allocation2 + $0x1a1] sm:$0xff] }
 0x4f4   :  { %v5014_v44 = vld [vmem:[#allocation2 + $0x1a2] sm:$0xff] }
 0x4f5   :  { %v4960_v10 = vadd.f32 %v4893_v43, %v4711_v4  ;;  %5914 = vmatmul.msk.bf16.gmra.mxu2 %vm50_vm0, %v8188_v39  ;;  %v5147_v0 = vpop.f32.mrf.mxu1  ;;  %v4516_v43 = vld [vmem:[#allocation2 + $0x1a0] sm:$0xff]  ;;  %v8601_v4 = vld [vmem:[#allocation32_spill] sm:$0xff]  ;;  %v5030_v53 = vpack.c.bf16 %v5014_v44, %v5013_v57 }
 0x4f6   :  { %5954 = vmatmul.msk.bf16.gmra.mxu3 %vm50_vm0, %v8190_v52  ;;  %v4898_v39 = vpop.f32.mrf.mxu0 }
 0x4f7   :  { %v5209_v61 = vadd.f32 %v5142_v24, %v4960_v10 }
 0x4f8   :  { %v4398_v26 = vpop.f32.mrf.mxu2 }
 0x4f9   :  { %v4647_v54 = vpop.f32.mrf.mxu3  ;;  %6046 = vst [vmem:[%s8526_s4 + $0x148] sm:$0xff] %v5209_v61  ;;  %v4463_v47 = vadd.f32 %v4398_v26, %v8596_v37  ;;  %v4781_v61 = vpack.c.bf16 %v4765_v28, %v4764_v29 }
 0x4fb   :  { %v4712_v18 = vadd.f32 %v4647_v54, %v4463_v47 }
 0x4fd   :  { %v4961_v41 = vadd.f32 %v4896_v16, %v4712_v18  ;;  %v5150_v62 = vpop.f32.mrf.mxu1 }
 0x4fe   :  { %v4901_v56 = vpop.f32.mrf.mxu0 }
 0x4ff   :  { %v5210_v52 = vadd.f32 %v5145_v35, %v4961_v41  ;;  %v4532_v35 = vpack.c.bf16 %v4516_v43, %v4515_v59 }
 0x500   :  { %v4400_v32 = vpop.f32.mrf.mxu2  ;;  %5995 = vmatmul.msk.bf16.gmra.mxu0 %vm50_vm0, %v8599_v50  ;;  %6035 = vmatmul.msk.bf16.gmra.mxu1 %vm50_vm0, %v5029_v20 }
 0x501   :  { %v4649_v11 = vpop.f32.mrf.mxu3  ;;  %6047 = vst [vmem:[%s8526_s4 + $0x150] sm:$0xff] %v5210_v52  ;;  %v4464_v3 = vadd.f32 %v4400_v32, %v8597_v13 }
 0x503   :  { %v4713_v45 = vadd.f32 %v4649_v11, %v4464_v3 }
 0x505   :  { %v4962_v58 = vadd.f32 %v4898_v39, %v4713_v45  ;;  %5915 = vmatmul.msk.bf16.gmra.mxu2 %vm50_vm0, %v8208_v6  ;;  %v5152_v6 = vpop.f32.mrf.mxu1 }
 0x506   :  { %5955 = vmatmul.msk.bf16.gmra.mxu3 %vm50_vm0, %v8598_v63  ;;  %v4903_v31 = vpop.f32.mrf.mxu0 }
 0x507   :  { %v5211_v22 = vadd.f32 %v5147_v0, %v4962_v58 }
 0x508   :  { %v4403_v55 = vpop.f32.mrf.mxu2 }
 0x509   :  { %v4652_v7 = vpop.f32.mrf.mxu3  ;;  %6048 = vst [vmem:[%s8526_s4 + $0x158] sm:$0xff] %v5211_v22  ;;  %v4465_v34 = vadd.f32 %v4403_v55, %v8600_v15 }
 0x50b   :  { %v4714_v49 = vadd.f32 %v4652_v7, %v4465_v34 }
 0x50d   :  { %v4963_v5 = vadd.f32 %v4901_v56, %v4714_v49  ;;  %v5155_v54 = vpop.f32.mrf.mxu1 }
 0x50e   :  { %v4906_v26 = vpop.f32.mrf.mxu0 }
 0x50f   :  { %v5212_v24 = vadd.f32 %v5150_v62, %v4963_v5 }
 0x510   :  { %v4405_v38 = vpop.f32.mrf.mxu2  ;;  %5996 = vmatmul.msk.bf16.gmra.mxu0 %vm50_vm0, %v4781_v61  ;;  %6036 = vmatmul.msk.bf16.gmra.mxu1 %vm50_vm0, %v5030_v53 }
 0x511   :  { %v4654_v8 = vpop.f32.mrf.mxu3  ;;  %6049 = vst [vmem:[%s8526_s4 + $0x160] sm:$0xff] %v5212_v24  ;;  %v4466_v16 = vadd.f32 %v4405_v38, %v8601_v4 }
 0x513   :  { %v4715_v10 = vadd.f32 %v4654_v8, %v4466_v16 }
 0x515   :  { %v4964_v37 = vadd.f32 %v4903_v31, %v4715_v10  ;;  %5916 = vmatmul.msk.bf16.gmra.mxu2 %vm50_vm0, %v5029_v20  ;;  %v5157_v32 = vpop.f32.mrf.mxu1 }
 0x516   :  { %5956 = vmatmul.msk.bf16.gmra.mxu3 %vm50_vm0, %v4532_v35  ;;  %v4908_v52 = vpop.f32.mrf.mxu0 }
 0x517   :  { %v5213_v47 = vadd.f32 %v5152_v6, %v4964_v37 }
 0x518   :  { %v4408_v18 = vpop.f32.mrf.mxu2 }
 0x519   :  { %v4657_v39 = vpop.f32.mrf.mxu3  ;;  %6050 = vst [vmem:[%s8526_s4 + $0x168] sm:$0xff] %v5213_v47  ;;  %v4467_v0 = vadd.f32 %v4408_v18, %v8225_v60 }
 0x51b   :  { %v4716_v41 = vadd.f32 %v4657_v39, %v4467_v0 }
 0x51d   :  { %v4965_v11 = vadd.f32 %v4906_v26, %v4716_v41  ;;  %v5160_v56 = vpop.f32.mrf.mxu1 }
 0x51e   :  { %v4911_v20 = vpop.f32.mrf.mxu0 }
 0x51f   :  { %v5214_v21 = vadd.f32 %v5155_v54, %v4965_v11 }
 0x520   :  { %v4410_v17 = vpop.f32.mrf.mxu2 }
 0x521   :  { %v4659_v13 = vpop.f32.mrf.mxu3  ;;  %6051 = vst [vmem:[%s8526_s4 + $0x170] sm:$0xff] %v5214_v21  ;;  %v4468_v3 = vadd.f32 %v4410_v17, %v8233_v33 }
 0x523   :  { %v4717_v45 = vadd.f32 %v4659_v13, %v4468_v3 }
 0x525   :  { %v4966_v62 = vadd.f32 %v4908_v52, %v4717_v45  ;;  %v5162_v7 = vpop.f32.mrf.mxu1 }
 0x526   :  { %v4913_v55 = vpop.f32.mrf.mxu0 }
 0x527   :  { %v5215_v58 = vadd.f32 %v5157_v32, %v4966_v62 }
 0x528   :  { %v4413_v63 = vpop.f32.mrf.mxu2 }
 0x529   :  { %v4662_v60 = vpop.f32.mrf.mxu3  ;;  %6052 = vst [vmem:[%s8526_s4 + $0x178] sm:$0xff] %v5215_v58  ;;  %v4469_v22 = vadd.f32 %v4413_v63, %v8236_v40 }
 0x52b   :  { %v4718_v50 = vadd.f32 %v4662_v60, %v4469_v22 }
 0x52d   :  { %v4967_v15 = vadd.f32 %v4911_v20, %v4718_v50  ;;  %v5165_v59 = vpop.f32.mrf.mxu1 }
 0x52e   :  { %v4916_v5 = vpop.f32.mrf.mxu0 }
 0x52f   :  { %v5216_v34 = vadd.f32 %v5160_v56, %v4967_v15 }
 0x530   :  { %v4415_v49 = vpop.f32.mrf.mxu2 }
 0x531   :  { %v4664_v33 = vpop.f32.mrf.mxu3  ;;  %6053 = vst [vmem:[%s8526_s4 + $0x180] sm:$0xff] %v5216_v34  ;;  %v4470_v31 = vadd.f32 %v4415_v49, %v8245_v46 }
 0x533   :  { %v4719_v6 = vadd.f32 %v4664_v33, %v4470_v31 }
 0x535   :  { %v4968_v43 = vadd.f32 %v4913_v55, %v4719_v6  ;;  %v5167_v57 = vpop.f32.mrf.mxu1 }
 0x536   :  { %v4918_v28 = vpop.f32.mrf.mxu0 }
 0x537   :  { %v5217_v24 = vadd.f32 %v5162_v7, %v4968_v43 }
 0x538   :  { %v4418_v29 = vpop.f32.mrf.mxu2 }
 0x539   :  { %v4667_v40 = vpop.f32.mrf.mxu3  ;;  %6054 = vst [vmem:[%s8526_s4 + $0x188] sm:$0xff] %v5217_v24  ;;  %v4471_v38 = vadd.f32 %v4418_v29, %v8248_v48 }
 0x53b   :  { %v4720_v8 = vadd.f32 %v4667_v40, %v4471_v38 }
 0x53d   :  { %v4969_v44 = vadd.f32 %v4916_v5, %v4720_v8  ;;  %v5170_v53 = vpop.f32.mrf.mxu1 }
 0x53e   :  { %v4921_v61 = vpop.f32.mrf.mxu0 }
 0x53f   :  { %v5218_v4 = vadd.f32 %v5165_v59, %v4969_v44 }
 0x540   :  { %v4420_v16 = vpop.f32.mrf.mxu2 }
 0x541   :  { %v4669_v46 = vpop.f32.mrf.mxu3  ;;  %6055 = vst [vmem:[%s8526_s4 + $0x190] sm:$0xff] %v5218_v4  ;;  %v4472_v35 = vadd.f32 %v4420_v16, %v8257_v30 }
 0x543   :  { %v4721_v10 = vadd.f32 %v4669_v46, %v4472_v35 }
 0x545   :  { %v4970_v26 = vadd.f32 %v4918_v28, %v4721_v10  ;;  %v5172_v0 = vpop.f32.mrf.mxu1 }
 0x546   :  { %v4923_v39 = vpop.f32.mrf.mxu0 }
 0x547   :  { %v5219_v54 = vadd.f32 %v5167_v57, %v4970_v26 }
 0x548   :  { %v4423_v37 = vpop.f32.mrf.mxu2 }
 0x549   :  { %v4672_v48 = vpop.f32.mrf.mxu3  ;;  %6056 = vst [vmem:[%s8526_s4 + $0x198] sm:$0xff] %v5219_v54  ;;  %v4473_v47 = vadd.f32 %v4423_v37, %v8260_v14 }
 0x54b   :  { %v4722_v18 = vadd.f32 %v4672_v48, %v4473_v47 }
 0x54d   :  { %v4971_v41 = vadd.f32 %v4921_v61, %v4722_v18  ;;  %v5175_v13 = vpop.f32.mrf.mxu1 }
 0x54e   :  { %v4926_v17 = vpop.f32.mrf.mxu0 }
 0x54f   :  { %v5220_v52 = vadd.f32 %v5170_v53, %v4971_v41 }
 0x550   :  { %v4425_v32 = vpop.f32.mrf.mxu2 }
 0x551   :  { %v4674_v30 = vpop.f32.mrf.mxu3  ;;  %6057 = vst [vmem:[%s8526_s4 + $0x1a0] sm:$0xff] %v5220_v52  ;;  %v4474_v11 = vadd.f32 %v4425_v32, %v8271_v27 }
 0x553   :  { %v4723_v21 = vadd.f32 %v4674_v30, %v4474_v11 }
 0x555   :  { %v4972_v3 = vadd.f32 %v4923_v39, %v4723_v21  ;;  %v5177_v63 = vpop.f32.mrf.mxu1 }
 0x556   :  { %v4928_v58 = vpop.f32.mrf.mxu0 }
 0x557   :  { %v5221_v45 = vadd.f32 %v5172_v0, %v4972_v3 }
 0x558   :  { %v4428_v20 = vpop.f32.mrf.mxu2 }
 0x559   :  { %v4677_v14 = vpop.f32.mrf.mxu3  ;;  %6058 = vst [vmem:[%s8526_s4 + $0x1a8] sm:$0xff] %v5221_v45  ;;  %v4475_v56 = vadd.f32 %v4428_v20, %v8274_v2 }
 0x55b   :  { %v4724_v62 = vadd.f32 %v4677_v14, %v4475_v56 }
 0x55d   :  { %v4973_v60 = vadd.f32 %v4926_v17, %v4724_v62  ;;  %v5180_v34 = vpop.f32.mrf.mxu1 }
 0x55e   :  { %v4931_v15 = vpop.f32.mrf.mxu0 }
 0x55f   :  { %v5222_v22 = vadd.f32 %v5175_v13, %v4973_v60 }
 0x560   :  { %v4430_v50 = vpop.f32.mrf.mxu2 }
 0x561   :  { %v4679_v27 = vpop.f32.mrf.mxu3  ;;  %6059 = vst [vmem:[%s8526_s4 + $0x1b0] sm:$0xff] %v5222_v22  ;;  %v4476_v55 = vadd.f32 %v4430_v50, %v8285_v23 }
 0x563   :  { %v4725_v7 = vadd.f32 %v4679_v27, %v4476_v55 }
 0x565   :  { %v4974_v49 = vadd.f32 %v4928_v58, %v4725_v7  ;;  %v5182_v43 = vpop.f32.mrf.mxu1 }
 0x566   :  { %v4933_v59 = vpop.f32.mrf.mxu0 }
 0x567   :  { %v5223_v33 = vadd.f32 %v5177_v63, %v4974_v49 }
 0x568   :  { %v4433_v31 = vpop.f32.mrf.mxu2 }
 0x569   :  { %v4682_v2 = vpop.f32.mrf.mxu3  ;;  %6060 = vst [vmem:[%s8526_s4 + $0x1b8] sm:$0xff] %v5223_v33  ;;  %v4477_v6 = vadd.f32 %v4433_v31, %v8288_v25 }
 0x56b   :  { %v4726_v5 = vadd.f32 %v4682_v2, %v4477_v6 }
 0x56d   :  { %v4975_v24 = vadd.f32 %v4931_v15, %v4726_v5  ;;  %v5185_v57 = vpop.f32.mrf.mxu1 }
 0x56e   :  { %v4936_v28 = vpop.f32.mrf.mxu0 }
 0x56f   :  { %v5224_v29 = vadd.f32 %v5180_v34, %v4975_v24 }
 0x570   :  { %v4435_v40 = vpop.f32.mrf.mxu2 }
 0x571   :  { %v4684_v23 = vpop.f32.mrf.mxu3  ;;  %6061 = vst [vmem:[%s8526_s4 + $0x1c0] sm:$0xff] %v5224_v29  ;;  %v4478_v38 = vadd.f32 %v4435_v40, %v8299_v12 }
 0x573   :  { %v4727_v8 = vadd.f32 %v4684_v23, %v4478_v38 }
 0x575   :  { %v4976_v44 = vadd.f32 %v4933_v59, %v4727_v8  ;;  %v5187_v53 = vpop.f32.mrf.mxu1 }
 0x576   :  { %v4938_v10 = vpop.f32.mrf.mxu0 }
 0x577   :  { %v5225_v4 = vadd.f32 %v5182_v43, %v4976_v44 }
 0x578   :  { %v4438_v16 = vpop.f32.mrf.mxu2 }
 0x579   :  { %v4687_v25 = vpop.f32.mrf.mxu3  ;;  %6062 = vst [vmem:[%s8526_s4 + $0x1c8] sm:$0xff] %v5225_v4  ;;  %v4479_v46 = vadd.f32 %v4438_v16, %v8302_v36 }
 0x57b   :  { %v4728_v35 = vadd.f32 %v4687_v25, %v4479_v46 }
 0x57d   :  { %v4977_v61 = vadd.f32 %v4936_v28, %v4728_v35  ;;  %v5190_v0 = vpop.f32.mrf.mxu1 }
 0x57e   :  { %v4941_v18 = vpop.f32.mrf.mxu0 }
 0x57f   :  { %v5226_v26 = vadd.f32 %v5185_v57, %v4977_v61 }
 0x580   :  { %v4440_v54 = vpop.f32.mrf.mxu2 }
 0x581   :  { %v4689_v12 = vpop.f32.mrf.mxu3  ;;  %6063 = vst [vmem:[%s8526_s4 + $0x1d0] sm:$0xff] %v5226_v26  ;;  %v4480_v37 = vadd.f32 %v4440_v54, %v8313_v19 }
 0x583   :  { %v4729_v48 = vadd.f32 %v4689_v12, %v4480_v37 }
 0x585   :  { %v4978_v47 = vadd.f32 %v4938_v10, %v4729_v48  ;;  %v5192_v3 = vpop.f32.mrf.mxu1 }
 0x586   :  { %v4943_v21 = vpop.f32.mrf.mxu0 }
 0x587   :  { %v5227_v39 = vadd.f32 %v5187_v53, %v4978_v47 }
 0x588   :  { %v4443_v41 = vpop.f32.mrf.mxu2 }
 0x589   :  { %v4692_v36 = vpop.f32.mrf.mxu3  ;;  %6064 = vst [vmem:[%s8526_s4 + $0x1d8] sm:$0xff] %v5227_v39  ;;  %v4481_v52 = vadd.f32 %v4443_v41, %v8316_v42 }
 0x58b   :  { %v4730_v32 = vadd.f32 %v4692_v36, %v4481_v52 }
 0x58d   :  { %v4979_v30 = vadd.f32 %v4941_v18, %v4730_v32  ;;  %v5195_v60 = vpop.f32.mrf.mxu1 }
 0x58e   :  { %v4946_v58 = vpop.f32.mrf.mxu0 }
 0x58f   :  { %v5228_v11 = vadd.f32 %v5190_v0, %v4979_v30 }
 0x590   :  { %v4445_v17 = vpop.f32.mrf.mxu2 }
 0x591   :  { %v4694_v13 = vpop.f32.mrf.mxu3  ;;  %6065 = vst [vmem:[%s8526_s4 + $0x1e0] sm:$0xff] %v5228_v11  ;;  %v4482_v19 = vadd.f32 %v4445_v17, %v8327_v51 }
 0x593   :  { %v4731_v45 = vadd.f32 %v4694_v13, %v4482_v19 }
 0x595   :  { %v4980_v20 = vadd.f32 %v4943_v21, %v4731_v45  ;;  %v5197_v49 = vpop.f32.mrf.mxu1 }
 0x596   :  { %v4948_v15 = vpop.f32.mrf.mxu0 }
 0x597   :  { %v5229_v14 = vadd.f32 %v5192_v3, %v4980_v20 }
 0x598   :  { %v4448_v56 = vpop.f32.mrf.mxu2 }
 0x599   :  { %v4697_v62 = vpop.f32.mrf.mxu3  ;;  %6066 = vst [vmem:[%s8526_s4 + $0x1e8] sm:$0xff] %v5229_v14  ;;  %v4483_v42 = vadd.f32 %v4448_v56, %v8330_v1 }
 0x59b   :  { %v4732_v63 = vadd.f32 %v4697_v62, %v4483_v42 }
 0x59d   :  { %v4981_v22 = vadd.f32 %v4946_v58, %v4732_v63 }
 0x59f   :  { %v5230_v50 = vadd.f32 %v5195_v60, %v4981_v22 }
 0x5a0   :  { %v4450_v27 = vpop.f32.mrf.mxu2 }
 0x5a1   :  { %6067 = vst [vmem:[%s8526_s4 + $0x1f0] sm:$0xff] %v5230_v50  ;;  %v4484_v51 = vadd.f32 %v4450_v27, %v8341_v9  ;;  %v4699_v55 = vpop.f32.mrf.mxu3 }
 0x5a3   :  { %v4733_v7 = vadd.f32 %v4699_v55, %v4484_v51 }
 0x5a5   :  { %v4982_v34 = vadd.f32 %v4948_v15, %v4733_v7 }
 0x5a7   :  { %v5231_v33 = vadd.f32 %v5197_v49, %v4982_v34 }
 0x5a9   :  { %6068 = vst [vmem:[%s8526_s4 + $0x1f8] sm:$0xff] %v5231_v33 }

</bundles_post_ra>
